<compile_context>
chip_gen: v5e
topology: v5e:2x2
jax: 0.10.0
libtpu: 0.0.40
codegen_flags: <defaults>
</compile_context>

<pallas_src>
import math
import jax
import jax.numpy as jnp
from jax.experimental import pallas as pl
from jax.experimental.pallas import tpu as pltpu  # noqa: F401  (TPU backend assumed)

# Small-but-TPU-friendly shapes (module defaults are dim=512, seq=8, layers=2).
B, S, D = 2, 8, 128          # batch, seq_len, dim
H = 4                        # nhead (fixed by the module)
HD = D // H                  # per-head dim
FF = 4 * D                   # dim_feedforward = dim * 4
NUM_LAYERS = 2
LN_EPS = 1e-5


# ------------------------------ kernel ------------------------------------- #

def _layer_norm(v, g, b):
    mu = jnp.mean(v, axis=-1, keepdims=True)
    var = jnp.mean((v - mu) ** 2, axis=-1, keepdims=True)
    return (v - mu) * jax.lax.rsqrt(var + LN_EPS) * g + b


def _encoder_layer(h, wqkv, bqkv, wo, bo, w1, b1, w2, b2,
                   ln1w, ln1b, ln2w, ln2b):
    """One post-norm TransformerEncoderLayer on the flattened (B*S, D) block."""
    scale = 1.0 / math.sqrt(HD)

    # Fused QKV projection: one wide matmul with M = B*S, N = 3*D.
    qkv = jnp.dot(h, wqkv, preferred_element_type=jnp.float32) + bqkv   # (B*S, 3D)
    qkv = qkv.reshape(B, S, 3 * D)
    q = qkv[:, :, 0:D]
    k = qkv[:, :, D:2 * D]
    v = qkv[:, :, 2 * D:3 * D]

    # Attention per head; the output projection is applied per head via the
    # corresponding row-slice of Wo and accumulated, so head outputs never need
    # a lane-dim concatenate.
    attn = jnp.zeros((B * S, D), jnp.float32)
    for hh in range(H):                                   # static head loop
        sl = slice(hh * HD, (hh + 1) * HD)
        qh, kh, vh = q[:, :, sl], k[:, :, sl], v[:, :, sl]          # (B, S, HD)
        s = jnp.einsum('bqe,bke->bqk', qh, kh,
                       preferred_element_type=jnp.float32) * scale   # (B, S, S)
        s = s - jnp.max(s, axis=-1, keepdims=True)
        p = jnp.exp(s)
        p = p * pl.reciprocal(jnp.sum(p, axis=-1, keepdims=True), approx=True)
        oh = jnp.einsum('bqk,bke->bqe', p, vh,
                        preferred_element_type=jnp.float32)          # (B, S, HD)
        attn = attn + jnp.dot(oh.reshape(B * S, HD), wo[sl, :],
                              preferred_element_type=jnp.float32)
    attn = attn + bo

    # post-norm residual (norm_first=False default); dropout = identity (eval)
    y = _layer_norm(h + attn, ln1w, ln1b)

    h1 = jnp.dot(y, w1, preferred_element_type=jnp.float32) + b1
    h1 = h1 * jax.nn.sigmoid(h1)                                     # SiLU
    z = jnp.dot(h1, w2, preferred_element_type=jnp.float32) + b2
    return _layer_norm(y + z, ln2w, ln2b)


def fused_encoder_kernel(x_ref, pe_ref, *rest):
    """PE add + NUM_LAYERS encoder layers + last-token select, single call."""
    o_ref = rest[-1]
    p_refs = rest[:-1]

    # positional encoding (broadcast over batch), then fold batch into M
    h = (x_ref[...] + pe_ref[...]).reshape(B * S, D)

    for l in range(NUM_LAYERS):                           # static layer loop
        lp = [r[...] for r in p_refs[l * 12:(l + 1) * 12]]
        h = _encoder_layer(h, *lp)

    # last-token selection: row S-1 of each batch element
    o_ref[...] = h.reshape(B, S, D)[:, S - 1, :]


# ------------------------------ wrapper ------------------------------------ #

def temporal_encoder_forward(x, pe, layers):
    """Equivalent of TemporalEncoder('transformer').forward(x) -> (B, D)."""
    flat = [w for lp in layers for w in lp]

    flops = NUM_LAYERS * (2 * B * S * (D * 3 * D + D * D + 2 * D * FF)
                          + 2 * 2 * B * H * S * S * HD)
    transcendentals = NUM_LAYERS * (B * H * S * S + B * S * FF)
    bytes_accessed = 4 * (x.size + pe.size + sum(w.size for w in flat) + B * D)

    return pl.pallas_call(
        fused_encoder_kernel,
        out_shape=jax.ShapeDtypeStruct((B, D), jnp.float32),
        cost_estimate=pl.CostEstimate(flops=flops,
                                      transcendentals=transcendentals,
                                      bytes_accessed=bytes_accessed),
    )(x, pe, *flat)


# --------------------------- params / glue --------------------------------- #

def make_positional_encoding(max_len, d):
    # standard sinusoidal PE (the referenced PositionalEncoding class)
    pos = jnp.arange(max_len, dtype=jnp.float32)[:, None]
    div = jnp.exp(jnp.arange(0, d, 2, dtype=jnp.float32) * (-math.log(10000.0) / d))
    pe = jnp.zeros((max_len, d), jnp.float32)
    pe = pe.at[:, 0::2].set(jnp.sin(pos * div))
    pe = pe.at[:, 1::2].set(jnp.cos(pos * div))
    return pe


def init_layer_params(key):
    ks = jax.random.split(key, 8)
    sd = 0.05
    n = lambda k, shp: jax.random.normal(k, shp, jnp.float32) * sd
    wqkv, bqkv = n(ks[0], (D, 3 * D)), n(ks[1], (1, 3 * D))   # fused in-proj
    wo, bo = n(ks[2], (D, D)), n(ks[3], (1, D))
    w1, b1 = n(ks[4], (D, FF)), n(ks[5], (1, FF))
    w2, b2 = n(ks[6], (FF, D)), n(ks[7], (1, D))
    ln1w, ln1b = jnp.ones((1, D), jnp.float32), jnp.zeros((1, D), jnp.float32)
    ln2w, ln2b = jnp.ones((1, D), jnp.float32), jnp.zeros((1, D), jnp.float32)
    return [wqkv, bqkv, wo, bo, w1, b1, w2, b2, ln1w, ln1b, ln2w, ln2b]


# --------------------------- pure-JAX reference ----------------------------- #

def ref_layer(x, params):
    wqkv, bqkv, wo, bo, w1, b1, w2, b2, ln1w, ln1b, ln2w, ln2b = params
    scale = 1.0 / math.sqrt(HD)
    qkv = x @ wqkv + bqkv                                    # (B, S, 3D)
    q, k, v = qkv[..., :D], qkv[..., D:2 * D], qkv[..., 2 * D:]
    q = q.reshape(B, S, H, HD).transpose(0, 2, 1, 3)
    k = k.reshape(B, S, H, HD).transpose(0, 2, 1, 3)
    v = v.reshape(B, S, H, HD).transpose(0, 2, 1, 3)
    s = jnp.einsum('bhqe,bhke->bhqk', q, k) * scale
    p = jax.nn.softmax(s, axis=-1)
    o = jnp.einsum('bhqk,bhke->bhqe', p, v)
    o = o.transpose(0, 2, 1, 3).reshape(B, S, D)
    attn = o @ wo + bo

    def ln(u, g, bb):
        mu = u.mean(-1, keepdims=True)
        var = ((u - mu) ** 2).mean(-1, keepdims=True)
        return (u - mu) / jnp.sqrt(var + LN_EPS) * g + bb

    y = ln(x + attn, ln1w, ln1b)
    h1 = y @ w1 + b1
    h1 = h1 * jax.nn.sigmoid(h1)
    z = h1 @ w2 + b2
    return ln(y + z, ln2w, ln2b)


def ref_forward(x, pe, layers):
    h = x + pe[None, :S, :]
    for params in layers:
        h = ref_layer(h, params)
    return h[:, -1, :]


# ----------------------------------- main ----------------------------------- #

if __name__ == "__main__":
    root = jax.random.PRNGKey(0)
    kx, *lkeys = jax.random.split(root, 1 + NUM_LAYERS)

    x = jax.random.normal(kx, (B, S, D), jnp.float32)        # (batch, seq, dim)
    pe = make_positional_encoding(S, D)
    layers = [init_layer_params(k) for k in lkeys]

    out = temporal_encoder_forward(x, pe, layers)             # (B, D)
    out = jax.block_until_ready(out)

    ref = jax.block_until_ready(ref_forward(x, pe, layers))
    assert out.shape == (B, D)
    # Tolerance is slightly looser than pure f32 because the softmax uses the
    # EUP approximate reciprocal (~2^-12 relative error).
    err = jnp.max(jnp.abs(out - ref))
    assert jnp.allclose(out, ref, atol=2e-3, rtol=2e-3), f"max abs err = {err}"

    print("KERNEL_OK")
</pallas_src>

<mosaic_0001>
module attributes {stable_mosaic.version = 11 : i64} {
  func.func @fused_encoder_kernel(%arg0: memref<2x8x128xf32, #tpu.memory_space<vmem>>, %arg1: memref<8x128xf32, #tpu.memory_space<vmem>>, %arg2: memref<128x384xf32, #tpu.memory_space<vmem>>, %arg3: memref<1x384xf32, #tpu.memory_space<vmem>>, %arg4: memref<128x128xf32, #tpu.memory_space<vmem>>, %arg5: memref<1x128xf32, #tpu.memory_space<vmem>>, %arg6: memref<128x512xf32, #tpu.memory_space<vmem>>, %arg7: memref<1x512xf32, #tpu.memory_space<vmem>>, %arg8: memref<512x128xf32, #tpu.memory_space<vmem>>, %arg9: memref<1x128xf32, #tpu.memory_space<vmem>>, %arg10: memref<1x128xf32, #tpu.memory_space<vmem>>, %arg11: memref<1x128xf32, #tpu.memory_space<vmem>>, %arg12: memref<1x128xf32, #tpu.memory_space<vmem>>, %arg13: memref<1x128xf32, #tpu.memory_space<vmem>>, %arg14: memref<128x384xf32, #tpu.memory_space<vmem>>, %arg15: memref<1x384xf32, #tpu.memory_space<vmem>>, %arg16: memref<128x128xf32, #tpu.memory_space<vmem>>, %arg17: memref<1x128xf32, #tpu.memory_space<vmem>>, %arg18: memref<128x512xf32, #tpu.memory_space<vmem>>, %arg19: memref<1x512xf32, #tpu.memory_space<vmem>>, %arg20: memref<512x128xf32, #tpu.memory_space<vmem>>, %arg21: memref<1x128xf32, #tpu.memory_space<vmem>>, %arg22: memref<1x128xf32, #tpu.memory_space<vmem>>, %arg23: memref<1x128xf32, #tpu.memory_space<vmem>>, %arg24: memref<1x128xf32, #tpu.memory_space<vmem>>, %arg25: memref<1x128xf32, #tpu.memory_space<vmem>>, %arg26: memref<2x128xf32, #tpu.memory_space<vmem>>) attributes {dimension_semantics = [], scalar_prefetch = 0 : i64, scratch_operands = 0 : i64, tpu.core_type = #tpu.core_type<tc>} {
    %c0 = arith.constant 0 : index
    %c0_0 = arith.constant 0 : index
    %c0_1 = arith.constant 0 : index
    %0 = vector.load %arg0[%c0, %c0_0, %c0_1] : memref<2x8x128xf32, #tpu.memory_space<vmem>>, vector<2x8x128xf32>
    %c0_2 = arith.constant 0 : index
    %c0_3 = arith.constant 0 : index
    %1 = vector.load %arg1[%c0_2, %c0_3] : memref<8x128xf32, #tpu.memory_space<vmem>>, vector<8x128xf32>
    %2 = vector.shape_cast %1 : vector<8x128xf32> to vector<1x8x128xf32>
    %3 = vector.broadcast %2 : vector<1x8x128xf32> to vector<2x8x128xf32>
    %4 = arith.addf %0, %3 : vector<2x8x128xf32>
    %5 = vector.shape_cast %4 : vector<2x8x128xf32> to vector<16x128xf32>
    %c0_4 = arith.constant 0 : index
    %c0_5 = arith.constant 0 : index
    %6 = vector.load %arg2[%c0_4, %c0_5] : memref<128x384xf32, #tpu.memory_space<vmem>>, vector<128x384xf32>
    %c0_6 = arith.constant 0 : index
    %c0_7 = arith.constant 0 : index
    %7 = vector.load %arg3[%c0_6, %c0_7] : memref<1x384xf32, #tpu.memory_space<vmem>>, vector<1x384xf32>
    %c0_8 = arith.constant 0 : index
    %c0_9 = arith.constant 0 : index
    %8 = vector.load %arg4[%c0_8, %c0_9] : memref<128x128xf32, #tpu.memory_space<vmem>>, vector<128x128xf32>
    %c0_10 = arith.constant 0 : index
    %c0_11 = arith.constant 0 : index
    %9 = vector.load %arg5[%c0_10, %c0_11] : memref<1x128xf32, #tpu.memory_space<vmem>>, vector<1x128xf32>
    %c0_12 = arith.constant 0 : index
    %c0_13 = arith.constant 0 : index
    %10 = vector.load %arg6[%c0_12, %c0_13] : memref<128x512xf32, #tpu.memory_space<vmem>>, vector<128x512xf32>
    %c0_14 = arith.constant 0 : index
    %c0_15 = arith.constant 0 : index
    %11 = vector.load %arg7[%c0_14, %c0_15] : memref<1x512xf32, #tpu.memory_space<vmem>>, vector<1x512xf32>
    %c0_16 = arith.constant 0 : index
    %c0_17 = arith.constant 0 : index
    %12 = vector.load %arg8[%c0_16, %c0_17] : memref<512x128xf32, #tpu.memory_space<vmem>>, vector<512x128xf32>
    %c0_18 = arith.constant 0 : index
    %c0_19 = arith.constant 0 : index
    %13 = vector.load %arg9[%c0_18, %c0_19] : memref<1x128xf32, #tpu.memory_space<vmem>>, vector<1x128xf32>
    %c0_20 = arith.constant 0 : index
    %c0_21 = arith.constant 0 : index
    %14 = vector.load %arg10[%c0_20, %c0_21] : memref<1x128xf32, #tpu.memory_space<vmem>>, vector<1x128xf32>
    %c0_22 = arith.constant 0 : index
    %c0_23 = arith.constant 0 : index
    %15 = vector.load %arg11[%c0_22, %c0_23] : memref<1x128xf32, #tpu.memory_space<vmem>>, vector<1x128xf32>
    %c0_24 = arith.constant 0 : index
    %c0_25 = arith.constant 0 : index
    %16 = vector.load %arg12[%c0_24, %c0_25] : memref<1x128xf32, #tpu.memory_space<vmem>>, vector<1x128xf32>
    %c0_26 = arith.constant 0 : index
    %c0_27 = arith.constant 0 : index
    %17 = vector.load %arg13[%c0_26, %c0_27] : memref<1x128xf32, #tpu.memory_space<vmem>>, vector<1x128xf32>
    %cst = arith.constant dense<0.000000e+00> : vector<16x384xf32>
    %18 = tpu.matmul %5, %6, %cst {dimension_numbers = #tpu.dot_dimension_numbers<[1], [0], [0], [1], [0, 0, 1, 1], [], []>} : vector<16x128xf32>, vector<128x384xf32>, vector<16x384xf32> -> vector<16x384xf32>
    %19 = vector.broadcast %7 : vector<1x384xf32> to vector<16x384xf32>
    %20 = arith.addf %18, %19 : vector<16x384xf32>
    %21 = vector.shape_cast %20 : vector<16x384xf32> to vector<2x8x384xf32>
    %22 = vector.extract_strided_slice %21 {offsets = [0, 0, 0], sizes = [2, 8, 128], strides = [1, 1, 1]} : vector<2x8x384xf32> to vector<2x8x128xf32>
    %23 = vector.extract_strided_slice %21 {offsets = [0, 0, 128], sizes = [2, 8, 128], strides = [1, 1, 1]} : vector<2x8x384xf32> to vector<2x8x128xf32>
    %24 = vector.extract_strided_slice %21 {offsets = [0, 0, 256], sizes = [2, 8, 128], strides = [1, 1, 1]} : vector<2x8x384xf32> to vector<2x8x128xf32>
    %cst_28 = arith.constant 0.000000e+00 : f32
    %25 = vector.broadcast %cst_28 : f32 to vector<16x128xf32>
    %26 = vector.extract_strided_slice %22 {offsets = [0, 0, 0], sizes = [2, 8, 32], strides = [1, 1, 1]} : vector<2x8x128xf32> to vector<2x8x32xf32>
    %27 = vector.extract_strided_slice %23 {offsets = [0, 0, 0], sizes = [2, 8, 32], strides = [1, 1, 1]} : vector<2x8x128xf32> to vector<2x8x32xf32>
    %28 = vector.extract_strided_slice %24 {offsets = [0, 0, 0], sizes = [2, 8, 32], strides = [1, 1, 1]} : vector<2x8x128xf32> to vector<2x8x32xf32>
    "tpu.trace_start"() <{level = 10 : i32, message = "bqe,bke->bqk"}> : () -> ()
    %cst_29 = arith.constant dense<0.000000e+00> : vector<2x8x8xf32>
    %29 = tpu.matmul %26, %27, %cst_29 {dimension_numbers = #tpu.dot_dimension_numbers<[2], [2], [1], [1], [0, 0, 0, 1, 1, 1], [0], [0]>} : vector<2x8x32xf32>, vector<2x8x32xf32>, vector<2x8x8xf32> -> vector<2x8x8xf32>
    "tpu.trace_stop"() : () -> ()
    %cst_30 = arith.constant 0.176776692 : f32
    %30 = vector.broadcast %cst_30 : f32 to vector<2x8x8xf32>
    %31 = arith.mulf %29, %30 : vector<2x8x8xf32>
    %cst_31 = arith.constant dense<0xFF800000> : vector<2x8xf32>
    %32 = vector.multi_reduction <maximumf>, %31, %cst_31 [2] : vector<2x8x8xf32> to vector<2x8xf32>
    %33 = vector.shape_cast %32 : vector<2x8xf32> to vector<2x8x1xf32>
    %34 = vector.broadcast %33 : vector<2x8x1xf32> to vector<2x8x8xf32>
    %35 = arith.subf %31, %34 : vector<2x8x8xf32>
    %36 = math.exp %35 : vector<2x8x8xf32>
    %cst_32 = arith.constant dense<0.000000e+00> : vector<2x8xf32>
    %37 = vector.multi_reduction <add>, %36, %cst_32 [2] : vector<2x8x8xf32> to vector<2x8xf32>
    %38 = vector.shape_cast %37 : vector<2x8xf32> to vector<2x8x1xf32>
    %39 = tpu.reciprocal %38 {approx = true} : vector<2x8x1xf32> -> vector<2x8x1xf32>
    %40 = vector.broadcast %39 : vector<2x8x1xf32> to vector<2x8x8xf32>
    %41 = arith.mulf %36, %40 : vector<2x8x8xf32>
    "tpu.trace_start"() <{level = 10 : i32, message = "bqk,bke->bqe"}> : () -> ()
    %cst_33 = arith.constant dense<0.000000e+00> : vector<2x8x32xf32>
    %42 = tpu.matmul %41, %28, %cst_33 {dimension_numbers = #tpu.dot_dimension_numbers<[2], [1], [1], [2], [0, 0, 0, 1, 1, 2], [0], [0]>} : vector<2x8x8xf32>, vector<2x8x32xf32>, vector<2x8x32xf32> -> vector<2x8x32xf32>
    "tpu.trace_stop"() : () -> ()
    %43 = vector.shape_cast %42 : vector<2x8x32xf32> to vector<16x32xf32>
    %44 = vector.extract_strided_slice %8 {offsets = [0, 0], sizes = [32, 128], strides = [1, 1]} : vector<128x128xf32> to vector<32x128xf32>
    %cst_34 = arith.constant dense<0.000000e+00> : vector<16x128xf32>
    %45 = tpu.matmul %43, %44, %cst_34 {dimension_numbers = #tpu.dot_dimension_numbers<[1], [0], [0], [1], [0, 0, 1, 1], [], []>} : vector<16x32xf32>, vector<32x128xf32>, vector<16x128xf32> -> vector<16x128xf32>
    %46 = arith.addf %25, %45 : vector<16x128xf32>
    %47 = vector.extract_strided_slice %22 {offsets = [0, 0, 32], sizes = [2, 8, 32], strides = [1, 1, 1]} : vector<2x8x128xf32> to vector<2x8x32xf32>
    %48 = vector.extract_strided_slice %23 {offsets = [0, 0, 32], sizes = [2, 8, 32], strides = [1, 1, 1]} : vector<2x8x128xf32> to vector<2x8x32xf32>
    %49 = vector.extract_strided_slice %24 {offsets = [0, 0, 32], sizes = [2, 8, 32], strides = [1, 1, 1]} : vector<2x8x128xf32> to vector<2x8x32xf32>
    "tpu.trace_start"() <{level = 10 : i32, message = "bqe,bke->bqk"}> : () -> ()
    %cst_35 = arith.constant dense<0.000000e+00> : vector<2x8x8xf32>
    %50 = tpu.matmul %47, %48, %cst_35 {dimension_numbers = #tpu.dot_dimension_numbers<[2], [2], [1], [1], [0, 0, 0, 1, 1, 1], [0], [0]>} : vector<2x8x32xf32>, vector<2x8x32xf32>, vector<2x8x8xf32> -> vector<2x8x8xf32>
    "tpu.trace_stop"() : () -> ()
    %cst_36 = arith.constant 0.176776692 : f32
    %51 = vector.broadcast %cst_36 : f32 to vector<2x8x8xf32>
    %52 = arith.mulf %50, %51 : vector<2x8x8xf32>
    %cst_37 = arith.constant dense<0xFF800000> : vector<2x8xf32>
    %53 = vector.multi_reduction <maximumf>, %52, %cst_37 [2] : vector<2x8x8xf32> to vector<2x8xf32>
    %54 = vector.shape_cast %53 : vector<2x8xf32> to vector<2x8x1xf32>
    %55 = vector.broadcast %54 : vector<2x8x1xf32> to vector<2x8x8xf32>
    %56 = arith.subf %52, %55 : vector<2x8x8xf32>
    %57 = math.exp %56 : vector<2x8x8xf32>
    %cst_38 = arith.constant dense<0.000000e+00> : vector<2x8xf32>
    %58 = vector.multi_reduction <add>, %57, %cst_38 [2] : vector<2x8x8xf32> to vector<2x8xf32>
    %59 = vector.shape_cast %58 : vector<2x8xf32> to vector<2x8x1xf32>
    %60 = tpu.reciprocal %59 {approx = true} : vector<2x8x1xf32> -> vector<2x8x1xf32>
    %61 = vector.broadcast %60 : vector<2x8x1xf32> to vector<2x8x8xf32>
    %62 = arith.mulf %57, %61 : vector<2x8x8xf32>
    "tpu.trace_start"() <{level = 10 : i32, message = "bqk,bke->bqe"}> : () -> ()
    %cst_39 = arith.constant dense<0.000000e+00> : vector<2x8x32xf32>
    %63 = tpu.matmul %62, %49, %cst_39 {dimension_numbers = #tpu.dot_dimension_numbers<[2], [1], [1], [2], [0, 0, 0, 1, 1, 2], [0], [0]>} : vector<2x8x8xf32>, vector<2x8x32xf32>, vector<2x8x32xf32> -> vector<2x8x32xf32>
    "tpu.trace_stop"() : () -> ()
    %64 = vector.shape_cast %63 : vector<2x8x32xf32> to vector<16x32xf32>
    %65 = vector.extract_strided_slice %8 {offsets = [32, 0], sizes = [32, 128], strides = [1, 1]} : vector<128x128xf32> to vector<32x128xf32>
    %cst_40 = arith.constant dense<0.000000e+00> : vector<16x128xf32>
    %66 = tpu.matmul %64, %65, %cst_40 {dimension_numbers = #tpu.dot_dimension_numbers<[1], [0], [0], [1], [0, 0, 1, 1], [], []>} : vector<16x32xf32>, vector<32x128xf32>, vector<16x128xf32> -> vector<16x128xf32>
    %67 = arith.addf %46, %66 : vector<16x128xf32>
    %68 = vector.extract_strided_slice %22 {offsets = [0, 0, 64], sizes = [2, 8, 32], strides = [1, 1, 1]} : vector<2x8x128xf32> to vector<2x8x32xf32>
    %69 = vector.extract_strided_slice %23 {offsets = [0, 0, 64], sizes = [2, 8, 32], strides = [1, 1, 1]} : vector<2x8x128xf32> to vector<2x8x32xf32>
    %70 = vector.extract_strided_slice %24 {offsets = [0, 0, 64], sizes = [2, 8, 32], strides = [1, 1, 1]} : vector<2x8x128xf32> to vector<2x8x32xf32>
    "tpu.trace_start"() <{level = 10 : i32, message = "bqe,bke->bqk"}> : () -> ()
    %cst_41 = arith.constant dense<0.000000e+00> : vector<2x8x8xf32>
    %71 = tpu.matmul %68, %69, %cst_41 {dimension_numbers = #tpu.dot_dimension_numbers<[2], [2], [1], [1], [0, 0, 0, 1, 1, 1], [0], [0]>} : vector<2x8x32xf32>, vector<2x8x32xf32>, vector<2x8x8xf32> -> vector<2x8x8xf32>
    "tpu.trace_stop"() : () -> ()
    %cst_42 = arith.constant 0.176776692 : f32
    %72 = vector.broadcast %cst_42 : f32 to vector<2x8x8xf32>
    %73 = arith.mulf %71, %72 : vector<2x8x8xf32>
    %cst_43 = arith.constant dense<0xFF800000> : vector<2x8xf32>
    %74 = vector.multi_reduction <maximumf>, %73, %cst_43 [2] : vector<2x8x8xf32> to vector<2x8xf32>
    %75 = vector.shape_cast %74 : vector<2x8xf32> to vector<2x8x1xf32>
    %76 = vector.broadcast %75 : vector<2x8x1xf32> to vector<2x8x8xf32>
    %77 = arith.subf %73, %76 : vector<2x8x8xf32>
    %78 = math.exp %77 : vector<2x8x8xf32>
    %cst_44 = arith.constant dense<0.000000e+00> : vector<2x8xf32>
    %79 = vector.multi_reduction <add>, %78, %cst_44 [2] : vector<2x8x8xf32> to vector<2x8xf32>
    %80 = vector.shape_cast %79 : vector<2x8xf32> to vector<2x8x1xf32>
    %81 = tpu.reciprocal %80 {approx = true} : vector<2x8x1xf32> -> vector<2x8x1xf32>
    %82 = vector.broadcast %81 : vector<2x8x1xf32> to vector<2x8x8xf32>
    %83 = arith.mulf %78, %82 : vector<2x8x8xf32>
    "tpu.trace_start"() <{level = 10 : i32, message = "bqk,bke->bqe"}> : () -> ()
    %cst_45 = arith.constant dense<0.000000e+00> : vector<2x8x32xf32>
    %84 = tpu.matmul %83, %70, %cst_45 {dimension_numbers = #tpu.dot_dimension_numbers<[2], [1], [1], [2], [0, 0, 0, 1, 1, 2], [0], [0]>} : vector<2x8x8xf32>, vector<2x8x32xf32>, vector<2x8x32xf32> -> vector<2x8x32xf32>
    "tpu.trace_stop"() : () -> ()
    %85 = vector.shape_cast %84 : vector<2x8x32xf32> to vector<16x32xf32>
    %86 = vector.extract_strided_slice %8 {offsets = [64, 0], sizes = [32, 128], strides = [1, 1]} : vector<128x128xf32> to vector<32x128xf32>
    %cst_46 = arith.constant dense<0.000000e+00> : vector<16x128xf32>
    %87 = tpu.matmul %85, %86, %cst_46 {dimension_numbers = #tpu.dot_dimension_numbers<[1], [0], [0], [1], [0, 0, 1, 1], [], []>} : vector<16x32xf32>, vector<32x128xf32>, vector<16x128xf32> -> vector<16x128xf32>
    %88 = arith.addf %67, %87 : vector<16x128xf32>
    %89 = vector.extract_strided_slice %22 {offsets = [0, 0, 96], sizes = [2, 8, 32], strides = [1, 1, 1]} : vector<2x8x128xf32> to vector<2x8x32xf32>
    %90 = vector.extract_strided_slice %23 {offsets = [0, 0, 96], sizes = [2, 8, 32], strides = [1, 1, 1]} : vector<2x8x128xf32> to vector<2x8x32xf32>
    %91 = vector.extract_strided_slice %24 {offsets = [0, 0, 96], sizes = [2, 8, 32], strides = [1, 1, 1]} : vector<2x8x128xf32> to vector<2x8x32xf32>
    "tpu.trace_start"() <{level = 10 : i32, message = "bqe,bke->bqk"}> : () -> ()
    %cst_47 = arith.constant dense<0.000000e+00> : vector<2x8x8xf32>
    %92 = tpu.matmul %89, %90, %cst_47 {dimension_numbers = #tpu.dot_dimension_numbers<[2], [2], [1], [1], [0, 0, 0, 1, 1, 1], [0], [0]>} : vector<2x8x32xf32>, vector<2x8x32xf32>, vector<2x8x8xf32> -> vector<2x8x8xf32>
    "tpu.trace_stop"() : () -> ()
    %cst_48 = arith.constant 0.176776692 : f32
    %93 = vector.broadcast %cst_48 : f32 to vector<2x8x8xf32>
    %94 = arith.mulf %92, %93 : vector<2x8x8xf32>
    %cst_49 = arith.constant dense<0xFF800000> : vector<2x8xf32>
    %95 = vector.multi_reduction <maximumf>, %94, %cst_49 [2] : vector<2x8x8xf32> to vector<2x8xf32>
    %96 = vector.shape_cast %95 : vector<2x8xf32> to vector<2x8x1xf32>
    %97 = vector.broadcast %96 : vector<2x8x1xf32> to vector<2x8x8xf32>
    %98 = arith.subf %94, %97 : vector<2x8x8xf32>
    %99 = math.exp %98 : vector<2x8x8xf32>
    %cst_50 = arith.constant dense<0.000000e+00> : vector<2x8xf32>
    %100 = vector.multi_reduction <add>, %99, %cst_50 [2] : vector<2x8x8xf32> to vector<2x8xf32>
    %101 = vector.shape_cast %100 : vector<2x8xf32> to vector<2x8x1xf32>
    %102 = tpu.reciprocal %101 {approx = true} : vector<2x8x1xf32> -> vector<2x8x1xf32>
    %103 = vector.broadcast %102 : vector<2x8x1xf32> to vector<2x8x8xf32>
    %104 = arith.mulf %99, %103 : vector<2x8x8xf32>
    "tpu.trace_start"() <{level = 10 : i32, message = "bqk,bke->bqe"}> : () -> ()
    %cst_51 = arith.constant dense<0.000000e+00> : vector<2x8x32xf32>
    %105 = tpu.matmul %104, %91, %cst_51 {dimension_numbers = #tpu.dot_dimension_numbers<[2], [1], [1], [2], [0, 0, 0, 1, 1, 2], [0], [0]>} : vector<2x8x8xf32>, vector<2x8x32xf32>, vector<2x8x32xf32> -> vector<2x8x32xf32>
    "tpu.trace_stop"() : () -> ()
    %106 = vector.shape_cast %105 : vector<2x8x32xf32> to vector<16x32xf32>
    %107 = vector.extract_strided_slice %8 {offsets = [96, 0], sizes = [32, 128], strides = [1, 1]} : vector<128x128xf32> to vector<32x128xf32>
    %cst_52 = arith.constant dense<0.000000e+00> : vector<16x128xf32>
    %108 = tpu.matmul %106, %107, %cst_52 {dimension_numbers = #tpu.dot_dimension_numbers<[1], [0], [0], [1], [0, 0, 1, 1], [], []>} : vector<16x32xf32>, vector<32x128xf32>, vector<16x128xf32> -> vector<16x128xf32>
    %109 = arith.addf %88, %108 : vector<16x128xf32>
    %110 = vector.broadcast %9 : vector<1x128xf32> to vector<16x128xf32>
    %111 = arith.addf %109, %110 : vector<16x128xf32>
    %112 = arith.addf %5, %111 : vector<16x128xf32>
    %cst_53 = arith.constant dense<0.000000e+00> : vector<16xf32>
    %113 = vector.multi_reduction <add>, %112, %cst_53 [1] : vector<16x128xf32> to vector<16xf32>
    %114 = vector.shape_cast %113 : vector<16xf32> to vector<16x1xf32>
    %cst_54 = arith.constant 1.280000e+02 : f32
    %115 = vector.broadcast %cst_54 : f32 to vector<16x1xf32>
    %116 = arith.divf %114, %115 : vector<16x1xf32>
    %117 = vector.broadcast %116 : vector<16x1xf32> to vector<16x128xf32>
    %118 = arith.subf %112, %117 : vector<16x128xf32>
    %119 = arith.mulf %118, %118 : vector<16x128xf32>
    %cst_55 = arith.constant dense<0.000000e+00> : vector<16xf32>
    %120 = vector.multi_reduction <add>, %119, %cst_55 [1] : vector<16x128xf32> to vector<16xf32>
    %121 = vector.shape_cast %120 : vector<16xf32> to vector<16x1xf32>
    %cst_56 = arith.constant 1.280000e+02 : f32
    %122 = vector.broadcast %cst_56 : f32 to vector<16x1xf32>
    %123 = arith.divf %121, %122 : vector<16x1xf32>
    %124 = vector.broadcast %116 : vector<16x1xf32> to vector<16x128xf32>
    %125 = arith.subf %112, %124 : vector<16x128xf32>
    %cst_57 = arith.constant 9.99999974E-6 : f32
    %126 = vector.broadcast %cst_57 : f32 to vector<16x1xf32>
    %127 = arith.addf %123, %126 : vector<16x1xf32>
    %128 = math.rsqrt %127 : vector<16x1xf32>
    %129 = vector.broadcast %128 : vector<16x1xf32> to vector<16x128xf32>
    %130 = arith.mulf %125, %129 : vector<16x128xf32>
    %131 = vector.broadcast %14 : vector<1x128xf32> to vector<16x128xf32>
    %132 = arith.mulf %130, %131 : vector<16x128xf32>
    %133 = vector.broadcast %15 : vector<1x128xf32> to vector<16x128xf32>
    %134 = arith.addf %132, %133 : vector<16x128xf32>
    %cst_58 = arith.constant dense<0.000000e+00> : vector<16x512xf32>
    %135 = tpu.matmul %134, %10, %cst_58 {dimension_numbers = #tpu.dot_dimension_numbers<[1], [0], [0], [1], [0, 0, 1, 1], [], []>} : vector<16x128xf32>, vector<128x512xf32>, vector<16x512xf32> -> vector<16x512xf32>
    %136 = vector.broadcast %11 : vector<1x512xf32> to vector<16x512xf32>
    %137 = arith.addf %135, %136 : vector<16x512xf32>
    %138 = arith.negf %137 : vector<16x512xf32>
    %139 = math.exp %138 : vector<16x512xf32>
    %cst_59 = arith.constant 1.000000e+00 : f32
    %140 = vector.broadcast %cst_59 : f32 to vector<16x512xf32>
    %141 = arith.addf %140, %139 : vector<16x512xf32>
    %142 = arith.divf %140, %141 : vector<16x512xf32>
    %143 = arith.mulf %137, %142 : vector<16x512xf32>
    %cst_60 = arith.constant dense<0.000000e+00> : vector<16x128xf32>
    %144 = tpu.matmul %143, %12, %cst_60 {dimension_numbers = #tpu.dot_dimension_numbers<[1], [0], [0], [1], [0, 0, 1, 1], [], []>} : vector<16x512xf32>, vector<512x128xf32>, vector<16x128xf32> -> vector<16x128xf32>
    %145 = vector.broadcast %13 : vector<1x128xf32> to vector<16x128xf32>
    %146 = arith.addf %144, %145 : vector<16x128xf32>
    %147 = arith.addf %134, %146 : vector<16x128xf32>
    %cst_61 = arith.constant dense<0.000000e+00> : vector<16xf32>
    %148 = vector.multi_reduction <add>, %147, %cst_61 [1] : vector<16x128xf32> to vector<16xf32>
    %149 = vector.shape_cast %148 : vector<16xf32> to vector<16x1xf32>
    %cst_62 = arith.constant 1.280000e+02 : f32
    %150 = vector.broadcast %cst_62 : f32 to vector<16x1xf32>
    %151 = arith.divf %149, %150 : vector<16x1xf32>
    %152 = vector.broadcast %151 : vector<16x1xf32> to vector<16x128xf32>
    %153 = arith.subf %147, %152 : vector<16x128xf32>
    %154 = arith.mulf %153, %153 : vector<16x128xf32>
    %cst_63 = arith.constant dense<0.000000e+00> : vector<16xf32>
    %155 = vector.multi_reduction <add>, %154, %cst_63 [1] : vector<16x128xf32> to vector<16xf32>
    %156 = vector.shape_cast %155 : vector<16xf32> to vector<16x1xf32>
    %cst_64 = arith.constant 1.280000e+02 : f32
    %157 = vector.broadcast %cst_64 : f32 to vector<16x1xf32>
    %158 = arith.divf %156, %157 : vector<16x1xf32>
    %159 = vector.broadcast %151 : vector<16x1xf32> to vector<16x128xf32>
    %160 = arith.subf %147, %159 : vector<16x128xf32>
    %cst_65 = arith.constant 9.99999974E-6 : f32
    %161 = vector.broadcast %cst_65 : f32 to vector<16x1xf32>
    %162 = arith.addf %158, %161 : vector<16x1xf32>
    %163 = math.rsqrt %162 : vector<16x1xf32>
    %164 = vector.broadcast %163 : vector<16x1xf32> to vector<16x128xf32>
    %165 = arith.mulf %160, %164 : vector<16x128xf32>
    %166 = vector.broadcast %16 : vector<1x128xf32> to vector<16x128xf32>
    %167 = arith.mulf %165, %166 : vector<16x128xf32>
    %168 = vector.broadcast %17 : vector<1x128xf32> to vector<16x128xf32>
    %169 = arith.addf %167, %168 : vector<16x128xf32>
    %c0_66 = arith.constant 0 : index
    %c0_67 = arith.constant 0 : index
    %170 = vector.load %arg14[%c0_66, %c0_67] : memref<128x384xf32, #tpu.memory_space<vmem>>, vector<128x384xf32>
    %c0_68 = arith.constant 0 : index
    %c0_69 = arith.constant 0 : index
    %171 = vector.load %arg15[%c0_68, %c0_69] : memref<1x384xf32, #tpu.memory_space<vmem>>, vector<1x384xf32>
    %c0_70 = arith.constant 0 : index
    %c0_71 = arith.constant 0 : index
    %172 = vector.load %arg16[%c0_70, %c0_71] : memref<128x128xf32, #tpu.memory_space<vmem>>, vector<128x128xf32>
    %c0_72 = arith.constant 0 : index
    %c0_73 = arith.constant 0 : index
    %173 = vector.load %arg17[%c0_72, %c0_73] : memref<1x128xf32, #tpu.memory_space<vmem>>, vector<1x128xf32>
    %c0_74 = arith.constant 0 : index
    %c0_75 = arith.constant 0 : index
    %174 = vector.load %arg18[%c0_74, %c0_75] : memref<128x512xf32, #tpu.memory_space<vmem>>, vector<128x512xf32>
    %c0_76 = arith.constant 0 : index
    %c0_77 = arith.constant 0 : index
    %175 = vector.load %arg19[%c0_76, %c0_77] : memref<1x512xf32, #tpu.memory_space<vmem>>, vector<1x512xf32>
    %c0_78 = arith.constant 0 : index
    %c0_79 = arith.constant 0 : index
    %176 = vector.load %arg20[%c0_78, %c0_79] : memref<512x128xf32, #tpu.memory_space<vmem>>, vector<512x128xf32>
    %c0_80 = arith.constant 0 : index
    %c0_81 = arith.constant 0 : index
    %177 = vector.load %arg21[%c0_80, %c0_81] : memref<1x128xf32, #tpu.memory_space<vmem>>, vector<1x128xf32>
    %c0_82 = arith.constant 0 : index
    %c0_83 = arith.constant 0 : index
    %178 = vector.load %arg22[%c0_82, %c0_83] : memref<1x128xf32, #tpu.memory_space<vmem>>, vector<1x128xf32>
    %c0_84 = arith.constant 0 : index
    %c0_85 = arith.constant 0 : index
    %179 = vector.load %arg23[%c0_84, %c0_85] : memref<1x128xf32, #tpu.memory_space<vmem>>, vector<1x128xf32>
    %c0_86 = arith.constant 0 : index
    %c0_87 = arith.constant 0 : index
    %180 = vector.load %arg24[%c0_86, %c0_87] : memref<1x128xf32, #tpu.memory_space<vmem>>, vector<1x128xf32>
    %c0_88 = arith.constant 0 : index
    %c0_89 = arith.constant 0 : index
    %181 = vector.load %arg25[%c0_88, %c0_89] : memref<1x128xf32, #tpu.memory_space<vmem>>, vector<1x128xf32>
    %cst_90 = arith.constant dense<0.000000e+00> : vector<16x384xf32>
    %182 = tpu.matmul %169, %170, %cst_90 {dimension_numbers = #tpu.dot_dimension_numbers<[1], [0], [0], [1], [0, 0, 1, 1], [], []>} : vector<16x128xf32>, vector<128x384xf32>, vector<16x384xf32> -> vector<16x384xf32>
    %183 = vector.broadcast %171 : vector<1x384xf32> to vector<16x384xf32>
    %184 = arith.addf %182, %183 : vector<16x384xf32>
    %185 = vector.shape_cast %184 : vector<16x384xf32> to vector<2x8x384xf32>
    %186 = vector.extract_strided_slice %185 {offsets = [0, 0, 0], sizes = [2, 8, 128], strides = [1, 1, 1]} : vector<2x8x384xf32> to vector<2x8x128xf32>
    %187 = vector.extract_strided_slice %185 {offsets = [0, 0, 128], sizes = [2, 8, 128], strides = [1, 1, 1]} : vector<2x8x384xf32> to vector<2x8x128xf32>
    %188 = vector.extract_strided_slice %185 {offsets = [0, 0, 256], sizes = [2, 8, 128], strides = [1, 1, 1]} : vector<2x8x384xf32> to vector<2x8x128xf32>
    %cst_91 = arith.constant 0.000000e+00 : f32
    %189 = vector.broadcast %cst_91 : f32 to vector<16x128xf32>
    %190 = vector.extract_strided_slice %186 {offsets = [0, 0, 0], sizes = [2, 8, 32], strides = [1, 1, 1]} : vector<2x8x128xf32> to vector<2x8x32xf32>
    %191 = vector.extract_strided_slice %187 {offsets = [0, 0, 0], sizes = [2, 8, 32], strides = [1, 1, 1]} : vector<2x8x128xf32> to vector<2x8x32xf32>
    %192 = vector.extract_strided_slice %188 {offsets = [0, 0, 0], sizes = [2, 8, 32], strides = [1, 1, 1]} : vector<2x8x128xf32> to vector<2x8x32xf32>
    "tpu.trace_start"() <{level = 10 : i32, message = "bqe,bke->bqk"}> : () -> ()
    %cst_92 = arith.constant dense<0.000000e+00> : vector<2x8x8xf32>
    %193 = tpu.matmul %190, %191, %cst_92 {dimension_numbers = #tpu.dot_dimension_numbers<[2], [2], [1], [1], [0, 0, 0, 1, 1, 1], [0], [0]>} : vector<2x8x32xf32>, vector<2x8x32xf32>, vector<2x8x8xf32> -> vector<2x8x8xf32>
    "tpu.trace_stop"() : () -> ()
    %cst_93 = arith.constant 0.176776692 : f32
    %194 = vector.broadcast %cst_93 : f32 to vector<2x8x8xf32>
    %195 = arith.mulf %193, %194 : vector<2x8x8xf32>
    %cst_94 = arith.constant dense<0xFF800000> : vector<2x8xf32>
    %196 = vector.multi_reduction <maximumf>, %195, %cst_94 [2] : vector<2x8x8xf32> to vector<2x8xf32>
    %197 = vector.shape_cast %196 : vector<2x8xf32> to vector<2x8x1xf32>
    %198 = vector.broadcast %197 : vector<2x8x1xf32> to vector<2x8x8xf32>
    %199 = arith.subf %195, %198 : vector<2x8x8xf32>
    %200 = math.exp %199 : vector<2x8x8xf32>
    %cst_95 = arith.constant dense<0.000000e+00> : vector<2x8xf32>
    %201 = vector.multi_reduction <add>, %200, %cst_95 [2] : vector<2x8x8xf32> to vector<2x8xf32>
    %202 = vector.shape_cast %201 : vector<2x8xf32> to vector<2x8x1xf32>
    %203 = tpu.reciprocal %202 {approx = true} : vector<2x8x1xf32> -> vector<2x8x1xf32>
    %204 = vector.broadcast %203 : vector<2x8x1xf32> to vector<2x8x8xf32>
    %205 = arith.mulf %200, %204 : vector<2x8x8xf32>
    "tpu.trace_start"() <{level = 10 : i32, message = "bqk,bke->bqe"}> : () -> ()
    %cst_96 = arith.constant dense<0.000000e+00> : vector<2x8x32xf32>
    %206 = tpu.matmul %205, %192, %cst_96 {dimension_numbers = #tpu.dot_dimension_numbers<[2], [1], [1], [2], [0, 0, 0, 1, 1, 2], [0], [0]>} : vector<2x8x8xf32>, vector<2x8x32xf32>, vector<2x8x32xf32> -> vector<2x8x32xf32>
    "tpu.trace_stop"() : () -> ()
    %207 = vector.shape_cast %206 : vector<2x8x32xf32> to vector<16x32xf32>
    %208 = vector.extract_strided_slice %172 {offsets = [0, 0], sizes = [32, 128], strides = [1, 1]} : vector<128x128xf32> to vector<32x128xf32>
    %cst_97 = arith.constant dense<0.000000e+00> : vector<16x128xf32>
    %209 = tpu.matmul %207, %208, %cst_97 {dimension_numbers = #tpu.dot_dimension_numbers<[1], [0], [0], [1], [0, 0, 1, 1], [], []>} : vector<16x32xf32>, vector<32x128xf32>, vector<16x128xf32> -> vector<16x128xf32>
    %210 = arith.addf %189, %209 : vector<16x128xf32>
    %211 = vector.extract_strided_slice %186 {offsets = [0, 0, 32], sizes = [2, 8, 32], strides = [1, 1, 1]} : vector<2x8x128xf32> to vector<2x8x32xf32>
    %212 = vector.extract_strided_slice %187 {offsets = [0, 0, 32], sizes = [2, 8, 32], strides = [1, 1, 1]} : vector<2x8x128xf32> to vector<2x8x32xf32>
    %213 = vector.extract_strided_slice %188 {offsets = [0, 0, 32], sizes = [2, 8, 32], strides = [1, 1, 1]} : vector<2x8x128xf32> to vector<2x8x32xf32>
    "tpu.trace_start"() <{level = 10 : i32, message = "bqe,bke->bqk"}> : () -> ()
    %cst_98 = arith.constant dense<0.000000e+00> : vector<2x8x8xf32>
    %214 = tpu.matmul %211, %212, %cst_98 {dimension_numbers = #tpu.dot_dimension_numbers<[2], [2], [1], [1], [0, 0, 0, 1, 1, 1], [0], [0]>} : vector<2x8x32xf32>, vector<2x8x32xf32>, vector<2x8x8xf32> -> vector<2x8x8xf32>
    "tpu.trace_stop"() : () -> ()
    %cst_99 = arith.constant 0.176776692 : f32
    %215 = vector.broadcast %cst_99 : f32 to vector<2x8x8xf32>
    %216 = arith.mulf %214, %215 : vector<2x8x8xf32>
    %cst_100 = arith.constant dense<0xFF800000> : vector<2x8xf32>
    %217 = vector.multi_reduction <maximumf>, %216, %cst_100 [2] : vector<2x8x8xf32> to vector<2x8xf32>
    %218 = vector.shape_cast %217 : vector<2x8xf32> to vector<2x8x1xf32>
    %219 = vector.broadcast %218 : vector<2x8x1xf32> to vector<2x8x8xf32>
    %220 = arith.subf %216, %219 : vector<2x8x8xf32>
    %221 = math.exp %220 : vector<2x8x8xf32>
    %cst_101 = arith.constant dense<0.000000e+00> : vector<2x8xf32>
    %222 = vector.multi_reduction <add>, %221, %cst_101 [2] : vector<2x8x8xf32> to vector<2x8xf32>
    %223 = vector.shape_cast %222 : vector<2x8xf32> to vector<2x8x1xf32>
    %224 = tpu.reciprocal %223 {approx = true} : vector<2x8x1xf32> -> vector<2x8x1xf32>
    %225 = vector.broadcast %224 : vector<2x8x1xf32> to vector<2x8x8xf32>
    %226 = arith.mulf %221, %225 : vector<2x8x8xf32>
    "tpu.trace_start"() <{level = 10 : i32, message = "bqk,bke->bqe"}> : () -> ()
    %cst_102 = arith.constant dense<0.000000e+00> : vector<2x8x32xf32>
    %227 = tpu.matmul %226, %213, %cst_102 {dimension_numbers = #tpu.dot_dimension_numbers<[2], [1], [1], [2], [0, 0, 0, 1, 1, 2], [0], [0]>} : vector<2x8x8xf32>, vector<2x8x32xf32>, vector<2x8x32xf32> -> vector<2x8x32xf32>
    "tpu.trace_stop"() : () -> ()
    %228 = vector.shape_cast %227 : vector<2x8x32xf32> to vector<16x32xf32>
    %229 = vector.extract_strided_slice %172 {offsets = [32, 0], sizes = [32, 128], strides = [1, 1]} : vector<128x128xf32> to vector<32x128xf32>
    %cst_103 = arith.constant dense<0.000000e+00> : vector<16x128xf32>
    %230 = tpu.matmul %228, %229, %cst_103 {dimension_numbers = #tpu.dot_dimension_numbers<[1], [0], [0], [1], [0, 0, 1, 1], [], []>} : vector<16x32xf32>, vector<32x128xf32>, vector<16x128xf32> -> vector<16x128xf32>
    %231 = arith.addf %210, %230 : vector<16x128xf32>
    %232 = vector.extract_strided_slice %186 {offsets = [0, 0, 64], sizes = [2, 8, 32], strides = [1, 1, 1]} : vector<2x8x128xf32> to vector<2x8x32xf32>
    %233 = vector.extract_strided_slice %187 {offsets = [0, 0, 64], sizes = [2, 8, 32], strides = [1, 1, 1]} : vector<2x8x128xf32> to vector<2x8x32xf32>
    %234 = vector.extract_strided_slice %188 {offsets = [0, 0, 64], sizes = [2, 8, 32], strides = [1, 1, 1]} : vector<2x8x128xf32> to vector<2x8x32xf32>
    "tpu.trace_start"() <{level = 10 : i32, message = "bqe,bke->bqk"}> : () -> ()
    %cst_104 = arith.constant dense<0.000000e+00> : vector<2x8x8xf32>
    %235 = tpu.matmul %232, %233, %cst_104 {dimension_numbers = #tpu.dot_dimension_numbers<[2], [2], [1], [1], [0, 0, 0, 1, 1, 1], [0], [0]>} : vector<2x8x32xf32>, vector<2x8x32xf32>, vector<2x8x8xf32> -> vector<2x8x8xf32>
    "tpu.trace_stop"() : () -> ()
    %cst_105 = arith.constant 0.176776692 : f32
    %236 = vector.broadcast %cst_105 : f32 to vector<2x8x8xf32>
    %237 = arith.mulf %235, %236 : vector<2x8x8xf32>
    %cst_106 = arith.constant dense<0xFF800000> : vector<2x8xf32>
    %238 = vector.multi_reduction <maximumf>, %237, %cst_106 [2] : vector<2x8x8xf32> to vector<2x8xf32>
    %239 = vector.shape_cast %238 : vector<2x8xf32> to vector<2x8x1xf32>
    %240 = vector.broadcast %239 : vector<2x8x1xf32> to vector<2x8x8xf32>
    %241 = arith.subf %237, %240 : vector<2x8x8xf32>
    %242 = math.exp %241 : vector<2x8x8xf32>
    %cst_107 = arith.constant dense<0.000000e+00> : vector<2x8xf32>
    %243 = vector.multi_reduction <add>, %242, %cst_107 [2] : vector<2x8x8xf32> to vector<2x8xf32>
    %244 = vector.shape_cast %243 : vector<2x8xf32> to vector<2x8x1xf32>
    %245 = tpu.reciprocal %244 {approx = true} : vector<2x8x1xf32> -> vector<2x8x1xf32>
    %246 = vector.broadcast %245 : vector<2x8x1xf32> to vector<2x8x8xf32>
    %247 = arith.mulf %242, %246 : vector<2x8x8xf32>
    "tpu.trace_start"() <{level = 10 : i32, message = "bqk,bke->bqe"}> : () -> ()
    %cst_108 = arith.constant dense<0.000000e+00> : vector<2x8x32xf32>
    %248 = tpu.matmul %247, %234, %cst_108 {dimension_numbers = #tpu.dot_dimension_numbers<[2], [1], [1], [2], [0, 0, 0, 1, 1, 2], [0], [0]>} : vector<2x8x8xf32>, vector<2x8x32xf32>, vector<2x8x32xf32> -> vector<2x8x32xf32>
    "tpu.trace_stop"() : () -> ()
    %249 = vector.shape_cast %248 : vector<2x8x32xf32> to vector<16x32xf32>
    %250 = vector.extract_strided_slice %172 {offsets = [64, 0], sizes = [32, 128], strides = [1, 1]} : vector<128x128xf32> to vector<32x128xf32>
    %cst_109 = arith.constant dense<0.000000e+00> : vector<16x128xf32>
    %251 = tpu.matmul %249, %250, %cst_109 {dimension_numbers = #tpu.dot_dimension_numbers<[1], [0], [0], [1], [0, 0, 1, 1], [], []>} : vector<16x32xf32>, vector<32x128xf32>, vector<16x128xf32> -> vector<16x128xf32>
    %252 = arith.addf %231, %251 : vector<16x128xf32>
    %253 = vector.extract_strided_slice %186 {offsets = [0, 0, 96], sizes = [2, 8, 32], strides = [1, 1, 1]} : vector<2x8x128xf32> to vector<2x8x32xf32>
    %254 = vector.extract_strided_slice %187 {offsets = [0, 0, 96], sizes = [2, 8, 32], strides = [1, 1, 1]} : vector<2x8x128xf32> to vector<2x8x32xf32>
    %255 = vector.extract_strided_slice %188 {offsets = [0, 0, 96], sizes = [2, 8, 32], strides = [1, 1, 1]} : vector<2x8x128xf32> to vector<2x8x32xf32>
    "tpu.trace_start"() <{level = 10 : i32, message = "bqe,bke->bqk"}> : () -> ()
    %cst_110 = arith.constant dense<0.000000e+00> : vector<2x8x8xf32>
    %256 = tpu.matmul %253, %254, %cst_110 {dimension_numbers = #tpu.dot_dimension_numbers<[2], [2], [1], [1], [0, 0, 0, 1, 1, 1], [0], [0]>} : vector<2x8x32xf32>, vector<2x8x32xf32>, vector<2x8x8xf32> -> vector<2x8x8xf32>
    "tpu.trace_stop"() : () -> ()
    %cst_111 = arith.constant 0.176776692 : f32
    %257 = vector.broadcast %cst_111 : f32 to vector<2x8x8xf32>
    %258 = arith.mulf %256, %257 : vector<2x8x8xf32>
    %cst_112 = arith.constant dense<0xFF800000> : vector<2x8xf32>
    %259 = vector.multi_reduction <maximumf>, %258, %cst_112 [2] : vector<2x8x8xf32> to vector<2x8xf32>
    %260 = vector.shape_cast %259 : vector<2x8xf32> to vector<2x8x1xf32>
    %261 = vector.broadcast %260 : vector<2x8x1xf32> to vector<2x8x8xf32>
    %262 = arith.subf %258, %261 : vector<2x8x8xf32>
    %263 = math.exp %262 : vector<2x8x8xf32>
    %cst_113 = arith.constant dense<0.000000e+00> : vector<2x8xf32>
    %264 = vector.multi_reduction <add>, %263, %cst_113 [2] : vector<2x8x8xf32> to vector<2x8xf32>
    %265 = vector.shape_cast %264 : vector<2x8xf32> to vector<2x8x1xf32>
    %266 = tpu.reciprocal %265 {approx = true} : vector<2x8x1xf32> -> vector<2x8x1xf32>
    %267 = vector.broadcast %266 : vector<2x8x1xf32> to vector<2x8x8xf32>
    %268 = arith.mulf %263, %267 : vector<2x8x8xf32>
    "tpu.trace_start"() <{level = 10 : i32, message = "bqk,bke->bqe"}> : () -> ()
    %cst_114 = arith.constant dense<0.000000e+00> : vector<2x8x32xf32>
    %269 = tpu.matmul %268, %255, %cst_114 {dimension_numbers = #tpu.dot_dimension_numbers<[2], [1], [1], [2], [0, 0, 0, 1, 1, 2], [0], [0]>} : vector<2x8x8xf32>, vector<2x8x32xf32>, vector<2x8x32xf32> -> vector<2x8x32xf32>
    "tpu.trace_stop"() : () -> ()
    %270 = vector.shape_cast %269 : vector<2x8x32xf32> to vector<16x32xf32>
    %271 = vector.extract_strided_slice %172 {offsets = [96, 0], sizes = [32, 128], strides = [1, 1]} : vector<128x128xf32> to vector<32x128xf32>
    %cst_115 = arith.constant dense<0.000000e+00> : vector<16x128xf32>
    %272 = tpu.matmul %270, %271, %cst_115 {dimension_numbers = #tpu.dot_dimension_numbers<[1], [0], [0], [1], [0, 0, 1, 1], [], []>} : vector<16x32xf32>, vector<32x128xf32>, vector<16x128xf32> -> vector<16x128xf32>
    %273 = arith.addf %252, %272 : vector<16x128xf32>
    %274 = vector.broadcast %173 : vector<1x128xf32> to vector<16x128xf32>
    %275 = arith.addf %273, %274 : vector<16x128xf32>
    %276 = arith.addf %169, %275 : vector<16x128xf32>
    %cst_116 = arith.constant dense<0.000000e+00> : vector<16xf32>
    %277 = vector.multi_reduction <add>, %276, %cst_116 [1] : vector<16x128xf32> to vector<16xf32>
    %278 = vector.shape_cast %277 : vector<16xf32> to vector<16x1xf32>
    %cst_117 = arith.constant 1.280000e+02 : f32
    %279 = vector.broadcast %cst_117 : f32 to vector<16x1xf32>
    %280 = arith.divf %278, %279 : vector<16x1xf32>
    %281 = vector.broadcast %280 : vector<16x1xf32> to vector<16x128xf32>
    %282 = arith.subf %276, %281 : vector<16x128xf32>
    %283 = arith.mulf %282, %282 : vector<16x128xf32>
    %cst_118 = arith.constant dense<0.000000e+00> : vector<16xf32>
    %284 = vector.multi_reduction <add>, %283, %cst_118 [1] : vector<16x128xf32> to vector<16xf32>
    %285 = vector.shape_cast %284 : vector<16xf32> to vector<16x1xf32>
    %cst_119 = arith.constant 1.280000e+02 : f32
    %286 = vector.broadcast %cst_119 : f32 to vector<16x1xf32>
    %287 = arith.divf %285, %286 : vector<16x1xf32>
    %288 = vector.broadcast %280 : vector<16x1xf32> to vector<16x128xf32>
    %289 = arith.subf %276, %288 : vector<16x128xf32>
    %cst_120 = arith.constant 9.99999974E-6 : f32
    %290 = vector.broadcast %cst_120 : f32 to vector<16x1xf32>
    %291 = arith.addf %287, %290 : vector<16x1xf32>
    %292 = math.rsqrt %291 : vector<16x1xf32>
    %293 = vector.broadcast %292 : vector<16x1xf32> to vector<16x128xf32>
    %294 = arith.mulf %289, %293 : vector<16x128xf32>
    %295 = vector.broadcast %178 : vector<1x128xf32> to vector<16x128xf32>
    %296 = arith.mulf %294, %295 : vector<16x128xf32>
    %297 = vector.broadcast %179 : vector<1x128xf32> to vector<16x128xf32>
    %298 = arith.addf %296, %297 : vector<16x128xf32>
    %cst_121 = arith.constant dense<0.000000e+00> : vector<16x512xf32>
    %299 = tpu.matmul %298, %174, %cst_121 {dimension_numbers = #tpu.dot_dimension_numbers<[1], [0], [0], [1], [0, 0, 1, 1], [], []>} : vector<16x128xf32>, vector<128x512xf32>, vector<16x512xf32> -> vector<16x512xf32>
    %300 = vector.broadcast %175 : vector<1x512xf32> to vector<16x512xf32>
    %301 = arith.addf %299, %300 : vector<16x512xf32>
    %302 = arith.negf %301 : vector<16x512xf32>
    %303 = math.exp %302 : vector<16x512xf32>
    %cst_122 = arith.constant 1.000000e+00 : f32
    %304 = vector.broadcast %cst_122 : f32 to vector<16x512xf32>
    %305 = arith.addf %304, %303 : vector<16x512xf32>
    %306 = arith.divf %304, %305 : vector<16x512xf32>
    %307 = arith.mulf %301, %306 : vector<16x512xf32>
    %cst_123 = arith.constant dense<0.000000e+00> : vector<16x128xf32>
    %308 = tpu.matmul %307, %176, %cst_123 {dimension_numbers = #tpu.dot_dimension_numbers<[1], [0], [0], [1], [0, 0, 1, 1], [], []>} : vector<16x512xf32>, vector<512x128xf32>, vector<16x128xf32> -> vector<16x128xf32>
    %309 = vector.broadcast %177 : vector<1x128xf32> to vector<16x128xf32>
    %310 = arith.addf %308, %309 : vector<16x128xf32>
    %311 = arith.addf %298, %310 : vector<16x128xf32>
    %cst_124 = arith.constant dense<0.000000e+00> : vector<16xf32>
    %312 = vector.multi_reduction <add>, %311, %cst_124 [1] : vector<16x128xf32> to vector<16xf32>
    %313 = vector.shape_cast %312 : vector<16xf32> to vector<16x1xf32>
    %cst_125 = arith.constant 1.280000e+02 : f32
    %314 = vector.broadcast %cst_125 : f32 to vector<16x1xf32>
    %315 = arith.divf %313, %314 : vector<16x1xf32>
    %316 = vector.broadcast %315 : vector<16x1xf32> to vector<16x128xf32>
    %317 = arith.subf %311, %316 : vector<16x128xf32>
    %318 = arith.mulf %317, %317 : vector<16x128xf32>
    %cst_126 = arith.constant dense<0.000000e+00> : vector<16xf32>
    %319 = vector.multi_reduction <add>, %318, %cst_126 [1] : vector<16x128xf32> to vector<16xf32>
    %320 = vector.shape_cast %319 : vector<16xf32> to vector<16x1xf32>
    %cst_127 = arith.constant 1.280000e+02 : f32
    %321 = vector.broadcast %cst_127 : f32 to vector<16x1xf32>
    %322 = arith.divf %320, %321 : vector<16x1xf32>
    %323 = vector.broadcast %315 : vector<16x1xf32> to vector<16x128xf32>
    %324 = arith.subf %311, %323 : vector<16x128xf32>
    %cst_128 = arith.constant 9.99999974E-6 : f32
    %325 = vector.broadcast %cst_128 : f32 to vector<16x1xf32>
    %326 = arith.addf %322, %325 : vector<16x1xf32>
    %327 = math.rsqrt %326 : vector<16x1xf32>
    %328 = vector.broadcast %327 : vector<16x1xf32> to vector<16x128xf32>
    %329 = arith.mulf %324, %328 : vector<16x128xf32>
    %330 = vector.broadcast %180 : vector<1x128xf32> to vector<16x128xf32>
    %331 = arith.mulf %329, %330 : vector<16x128xf32>
    %332 = vector.broadcast %181 : vector<1x128xf32> to vector<16x128xf32>
    %333 = arith.addf %331, %332 : vector<16x128xf32>
    %334 = vector.shape_cast %333 : vector<16x128xf32> to vector<2x8x128xf32>
    %335 = vector.extract_strided_slice %334 {offsets = [0, 7, 0], sizes = [2, 1, 128], strides = [1, 1, 1]} : vector<2x8x128xf32> to vector<2x1x128xf32>
    %336 = vector.shape_cast %335 : vector<2x1x128xf32> to vector<2x128xf32>
    %c0_129 = arith.constant 0 : index
    %c0_130 = arith.constant 0 : index
    %337 = vector.load %arg26[%c0_129, %c0_130] : memref<2x128xf32, #tpu.memory_space<vmem>>, vector<2x128xf32>
    tpu.vector_store %arg26[%c0_129, %c0_130], %336 {strides = array<i32>} : memref<2x128xf32, #tpu.memory_space<vmem>>, vector<2x128xf32>,
    return
  }
}

</mosaic_0001>

<bundles_post_ra>
// kernel: tpu_custom_call.1
= control target key start
LH: loop header
LB: loop body
LE: loop exit
PB: predicated region body
PF: predicated region fallthrough
CT: control target
= control target key end

     0   :  { %s4637_s0 = inlined_call_operand.hbm [shape: f32[2,8,128], index: 0, kind: input, shape index: {}]   ;;  %s4638_s1 = inlined_call_operand.hbm [shape: f32[8,128], index: 1, kind: input, shape index: {}]   ;;  %s4639_s2 = inlined_call_operand.hbm [shape: f32[128,384], index: 2, kind: input, shape index: {}]   ;;  %s4640_s3 = inlined_call_operand.hbm [shape: f32[1,384], index: 3, kind: input, shape index: {}]   ;;  %s4641_s4 = inlined_call_operand.hbm [shape: f32[128,128], index: 4, kind: input, shape index: {}]   ;;  %s4642_s5 = inlined_call_operand.hbm [shape: f32[1,128], index: 5, kind: input, shape index: {}]   ;;  %s4643_s6 = inlined_call_operand.hbm [shape: f32[128,512], index: 6, kind: input, shape index: {}]   ;;  %s4644_s7 = inlined_call_operand.vmem [shape: f32[1,512], index: 7, kind: input, shape index: {}]   ;;  %s4645_s8 = inlined_call_operand.hbm [shape: f32[512,128], index: 8, kind: input, shape index: {}]   ;;  %s4646_s9 = inlined_call_operand.hbm [shape: f32[1,128], index: 9, kind: input, shape index: {}]   ;;  %s4647_s10 = inlined_call_operand.hbm [shape: f32[1,128], index: 10, kind: input, shape index: {}]   ;;  %s4648_s11 = inlined_call_operand.hbm [shape: f32[1,128], index: 11, kind: input, shape index: {}]   ;;  %s4649_s12 = inlined_call_operand.hbm [shape: f32[1,128], index: 12, kind: input, shape index: {}]   ;;  %s4650_s13 = inlined_call_operand.vmem [shape: f32[1,128], index: 13, kind: input, shape index: {}]   ;;  %s4651_s14 = inlined_call_operand.hbm [shape: f32[128,384], index: 14, kind: input, shape index: {}]   ;;  %s4652_s15 = inlined_call_operand.vmem [shape: f32[1,384], index: 15, kind: input, shape index: {}]   ;;  %s4653_s16 = inlined_call_operand.hbm [shape: f32[128,128], index: 16, kind: input, shape index: {}]   ;;  %s4654_s17 = inlined_call_operand.vmem [shape: f32[1,128], index: 17, kind: input, shape index: {}]   ;;  %s4655_s18 = inlined_call_operand.hbm [shape: f32[128,512], index: 18, kind: input, shape index: {}]   ;;  %s4656_s19 = inlined_call_operand.vmem [shape: f32[1,512], index: 19, kind: input, shape index: {}]   ;;  %s4657_s20 = inlined_call_operand.hbm [shape: f32[512,128], index: 20, kind: input, shape index: {}]   ;;  %s4658_s21 = inlined_call_operand.vmem [shape: f32[1,128], index: 21, kind: input, shape index: {}]   ;;  %s4659_s22 = inlined_call_operand.vmem [shape: f32[1,128], index: 22, kind: input, shape index: {}]   ;;  %s4660_s23 = inlined_call_operand.vmem [shape: f32[1,128], index: 23, kind: input, shape index: {}]   ;;  %s4661_s24 = inlined_call_operand.vmem [shape: f32[1,128], index: 24, kind: input, shape index: {}]   ;;  %s4662_s25 = inlined_call_operand.vmem [shape: f32[1,128], index: 25, kind: input, shape index: {}]   ;;  %s4663_s26 = inlined_call_operand.hbm [shape: f32[2,128], index: 26, kind: output, shape index: {}]  }
   0x1   :  { %4665 = sst [smem:[#allocation39_spill]] %s4637_s0 }
   0x2   :  { %4666 = sst [smem:[#allocation40_spill]] %s4638_s1 }
   0x3   :  { %4667 = sst [smem:[#allocation41_spill]] %s4639_s2 }
   0x4   :  { %4668 = sst [smem:[#allocation42_spill]] %s4640_s3 }
   0x5   :  { %4669 = sst [smem:[#allocation43_spill]] %s4641_s4 }
   0x6   :  { %4670 = sst [smem:[#allocation44_spill]] %s4642_s5 }
   0x7   :  { %4671 = sst [smem:[#allocation45_spill]] %s4643_s6 }
   0x8   :  { %4672 = sst [smem:[#allocation46_spill]] %s4644_s7 }
   0x9   :  { %4673 = sst [smem:[#allocation47_spill]] %s4645_s8 }
   0xa   :  { %4674 = sst [smem:[#allocation48_spill]] %s4646_s9 }
   0xb   :  { %4675 = sst [smem:[#allocation49_spill]] %s4647_s10 }
   0xc   :  { %4676 = sst [smem:[#allocation50_spill]] %s4661_s24 }
   0xd   :  { %4677 = sst [smem:[#allocation51_spill]] %s4662_s25 }
   0xe   :  { %4678 = sst [smem:[#allocation52_spill]] %s4663_s26 }
   0xf   :  { %31 = vsyncpa [#allocation3], 0 }
  0x10   :  { %32 = vsyncpa [#allocation6], 0 }
  0x11   :  { %33 = vsyncpa [#allocation9], 0 }
  0x12   :  { %34 = vsyncpa [#allocation12], 0 }
  0x13   :  { %35 = vsyncpa [#allocation15], 0 }
  0x14   :  { %36 = vsyncpa [#allocation18], 0 }
  0x15   :  { %37 = vsyncpa [#allocation21], 0 }
  0x16   :  { %38 = vsyncpa [#allocation24], 0 }
  0x17   :  { %39 = vsyncpa [#allocation27], 0  ;;  %s4679_s7 = sld [smem:[#allocation40_spill]] }
  0x1d   :  { %s59_s28 = sshll.u32 %s4679_s7, 4  ;;  %s60_s28 = int_to_ptr.hbm [resolvable:$true] %s59_s28 }
  0x1e   :  { %40 = vsyncpa [#allocation4], 0  ;;  %s3819_s8 = smov [#allocation5]   ;;  %s4680_s9 = sld [smem:[#allocation42_spill]] }
  0x1f   :  { %s61_s4 = sshll.u32 %s3819_s8, 4  ;;  %s3820_s2 = smov [#allocation8]   ;;  %s62_s4 = int_to_ptr.vmem [resolvable:$true] %s61_s4 }
  0x20   :  { %64 = dma.hbm_to_vmem [thread:$0]  %s60_s28, 128, %s62_s4, [#allocation6]  }
  0x21   :  { %s85_s5 = sshll.u32 %s3820_s2, 4  ;;  %s4681_s1 = sld [smem:[#allocation44_spill]]  ;;  %s86_s5 = int_to_ptr.vmem [resolvable:$true] %s85_s5 }
  0x22   :  { %s3821_s27 = smov [#allocation11]   ;;  %s4682_s25 = sld [smem:[#allocation47_spill]] }
  0x23   :  { %s109_s3 = sshll.u32 %s3821_s27, 4  ;;  %s3822_s28 = smov [#allocation14]   ;;  %s110_s3 = int_to_ptr.vmem [resolvable:$true] %s109_s3 }
  0x24   :  { %s83_s30 = sshll.u32 %s4680_s9, 4  ;;  %s134_s4 = sshll.u32 %s3822_s28, 4  ;;  %s84_s30 = int_to_ptr.hbm [resolvable:$true] %s83_s30  ;;  %s135_s4 = int_to_ptr.vmem [resolvable:$true] %s134_s4 }
  0x25   :  { %88 = dma.hbm_to_vmem [thread:$0]  %s84_s30, 48, %s86_s5, [#allocation9]  }
  0x26   :  { %s4683_s9 = sld [smem:[#allocation49_spill]]  ;;  %s4664_s10 = smov 128  }
  0x27   :  { %s107_s26 = sshll.u32 %s4681_s1, 4  ;;  %s3824_s6 = smov 8   ;;  %s108_s26 = int_to_ptr.hbm [resolvable:$true] %s107_s26 }
  0x28   :  { %s132_s24 = sshll.u32 %s4682_s25, 4  ;;  %s179_s25 = sshll.u32 %s4649_s12, 4  ;;  %s133_s24 = int_to_ptr.hbm [resolvable:$true] %s132_s24  ;;  %s180_s25 = int_to_ptr.hbm [resolvable:$true] %s179_s25 }
  0x29   :  { %112 = dma.hbm_to_vmem [thread:$0]  %s108_s26, 16, %s110_s3, [#allocation12]  }
  0x2a   :  { %140 = dma.hbm_to_vmem [thread:$0]  %s133_s24, 8192, %s135_s4, [#allocation15], %s4664_s10, %s4664_s10, %s3824_s6  }
  0x2b   :  { %s3825_s26 = smov [#allocation17]   ;;  %s3826_s27 = smov [#allocation20]  }
  0x2c   :  { %s157_s2 = sshll.u32 %s4683_s9, 4  ;;  %s159_s1 = sshll.u32 %s3825_s26, 4  ;;  %s158_s2 = int_to_ptr.hbm [resolvable:$true] %s157_s2  ;;  %s160_s1 = int_to_ptr.vmem [resolvable:$true] %s159_s1 }
  0x2d   :  { %162 = dma.hbm_to_vmem [thread:$0]  %s158_s2, 16, %s160_s1, [#allocation18]  }
  0x2e   :  { %s181_s3 = sshll.u32 %s3826_s27, 4  ;;  %s206_s28 = sshll.u32 %s4653_s16, 4  ;;  %s182_s3 = int_to_ptr.vmem [resolvable:$true] %s181_s3  ;;  %s207_s28 = int_to_ptr.hbm [resolvable:$true] %s206_s28 }
  0x2f   :  { %184 = dma.hbm_to_vmem [thread:$0]  %s180_s25, 16, %s182_s3, [#allocation21]  }
  0x30   :  { %s4684_s4 = sld [smem:[#allocation39_spill]]  ;;  %s3827_s9 = smov [#allocation23]  }
  0x31   :  { %s208_s12 = sshll.u32 %s3827_s9, 4  ;;  %s3828_s2 = smov [#allocation2]   ;;  %s209_s12 = int_to_ptr.vmem [resolvable:$true] %s208_s12 }
  0x32   :  { %214 = dma.hbm_to_vmem [thread:$0]  %s207_s28, 2048, %s209_s12, [#allocation24], %s4664_s10, %s4664_s10, %s3824_s6  }
  0x33   :  { %s47_s30 = sshll.u32 %s3828_s2, 4  ;;  %s4685_s16 = sld [smem:[#allocation41_spill]]  ;;  %s48_s30 = int_to_ptr.vmem [resolvable:$true] %s47_s30 }
  0x34   :  { %s3829_s25 = smov [#allocation7]   ;;  %s4686_s8 = sld [smem:[#allocation43_spill]] }
  0x35   :  { %s71_s27 = sshll.u32 %s3829_s25, 4  ;;  %s3830_s28 = smov 384   ;;  %s72_s27 = int_to_ptr.vmem [resolvable:$true] %s71_s27 }
  0x36   :  { %s45_s0 = sshll.u32 %s4684_s4, 4  ;;  %s3831_s24 = smov 24   ;;  %s46_s0 = int_to_ptr.hbm [resolvable:$true] %s45_s0 }
  0x37   :  { %53 = dma.hbm_to_vmem [thread:$0]  %s46_s0, 256, %s48_s30, [#allocation3], %s4664_s10, %s4664_s10, %s3824_s6  }
  0x38   :  { %s3832_s4 = smov [#allocation10]   ;;  %s4687_s5 = sld [smem:[#allocation45_spill]] }
  0x39   :  { %s69_s1 = sshll.u32 %s4685_s16, 4  ;;  %s95_s9 = sshll.u32 %s3832_s4, 4  ;;  %s70_s1 = int_to_ptr.hbm [resolvable:$true] %s69_s1  ;;  %s96_s9 = int_to_ptr.vmem [resolvable:$true] %s95_s9 }
  0x3a   :  { %s93_s29 = sshll.u32 %s4686_s8, 4  ;;  %s3833_s30 = smov [#allocation13]   ;;  %s94_s29 = int_to_ptr.hbm [resolvable:$true] %s93_s29 }
  0x3b   :  { %77 = dma.hbm_to_vmem [thread:$0]  %s70_s1, 6144, %s72_s27, [#allocation6], %s3830_s28, %s3830_s28, %s3831_s24  }
  0x3c   :  { %101 = dma.hbm_to_vmem [thread:$0]  %s94_s29, 2048, %s96_s9, [#allocation9], %s4664_s10, %s4664_s10, %s3824_s6  }
  0x3d   :  { %s119_s26 = sshll.u32 %s3833_s30, 4  ;;  %s4688_s3 = sld [smem:[#allocation48_spill]]  ;;  %s120_s26 = int_to_ptr.vmem [resolvable:$true] %s119_s26 }
  0x3e   :  { %s117_s0 = sshll.u32 %s4687_s5, 4  ;;  %s3834_s27 = smov 512   ;;  %s118_s0 = int_to_ptr.hbm [resolvable:$true] %s117_s0 }
  0x3f   :  { %s3835_s7 = smov 32   ;;  %s3836_s8 = smov [#allocation16]  }
  0x40   :  { %125 = dma.hbm_to_vmem [thread:$0]  %s118_s0, 8192, %s120_s26, [#allocation12], %s3834_s27, %s3834_s27, %s3835_s7  }
  0x41   :  { %s148_s4 = sshll.u32 %s3836_s8, 4  ;;  %s168_s29 = sshll.u32 %s4648_s11, 4  ;;  %s149_s4 = int_to_ptr.vmem [resolvable:$true] %s148_s4  ;;  %s169_s29 = int_to_ptr.hbm [resolvable:$true] %s168_s29 }
  0x42   :  { %s191_s30 = sshll.u32 %s4651_s14, 4  ;;  %s3837_s16 = smov [#allocation19]   ;;  %s192_s30 = int_to_ptr.hbm [resolvable:$true] %s191_s30 }
  0x43   :  { %s146_s1 = sshll.u32 %s4688_s3, 4  ;;  %s170_s25 = sshll.u32 %s3837_s16, 4  ;;  %s147_s1 = int_to_ptr.hbm [resolvable:$true] %s146_s1  ;;  %s171_s25 = int_to_ptr.vmem [resolvable:$true] %s170_s25 }
  0x44   :  { %151 = dma.hbm_to_vmem [thread:$0]  %s147_s1, 16, %s149_s4, [#allocation15]  }
  0x45   :  { %173 = dma.hbm_to_vmem [thread:$0]  %s169_s29, 16, %s171_s25, [#allocation18]  }
  0x46   :  { %s3838_s0 = smov [#allocation22]   ;;  %s221_s10 = sshll.u32 %s4655_s18, 4  ;;  %s222_s10 = int_to_ptr.hbm [resolvable:$true] %s221_s10 }
  0x47   :  { %s193_s26 = sshll.u32 %s3838_s0, 4  ;;  %s236_s14 = sshll.u32 %s4657_s20, 4  ;;  %s194_s26 = int_to_ptr.vmem [resolvable:$true] %s193_s26  ;;  %s237_s14 = int_to_ptr.hbm [resolvable:$true] %s236_s14 }
  0x48   :  { %199 = dma.hbm_to_vmem [thread:$0]  %s192_s30, 6144, %s194_s26, [#allocation21], %s3830_s28, %s3830_s28, %s3831_s24  }
  0x49   :  { %s3839_s4 = smov [#allocation25]   ;;  %s3840_s2 = smov [#allocation26]  }
  0x4a   :  { %s223_s12 = sshll.u32 %s3839_s4, 4  ;;  %s238_s18 = sshll.u32 %s3840_s2, 4  ;;  %s224_s12 = int_to_ptr.vmem [resolvable:$true] %s223_s12  ;;  %s239_s18 = int_to_ptr.vmem [resolvable:$true] %s238_s18 }
  0x4b   :  { %229 = dma.hbm_to_vmem [thread:$0]  %s222_s10, 8192, %s224_s12, [#allocation24], %s3834_s27, %s3834_s27, %s3835_s7  }
  0x4c   :  { %s4689_s29 = smov 128  }
  0x4d   :  { %244 = dma.hbm_to_vmem [thread:$0]  %s237_s14, 8192, %s239_s18, [#allocation27], %s4689_s29, %s4689_s29, %s3824_s6  }
  0x4e   :  { %3799 = dma.done.wait [#allocation3], 256  }
  0x4f   :  { %3800 = vsyncadd [#allocation3], 4294967040 }
  0x50   :  { %3801 = dma.done.wait [#allocation6], 6272  }
  0x51   :  { %3802 = vsyncadd [#allocation6], 4294961024 }
  0x52   :  { %3803 = dma.done.wait [#allocation9], 2096  }
  0x53   :  { %3804 = vsyncadd [#allocation9], 4294965200 }
  0x54   :  { %3805 = dma.done.wait [#allocation12], 8208  }
  0x55   :  { %3806 = vsyncadd [#allocation12], 4294959088 }
  0x56   :  { %3807 = dma.done.wait [#allocation15], 8208  }
  0x57   :  { %3808 = vsyncadd [#allocation15], 4294959088 }
  0x58   :  { %3809 = dma.done.wait [#allocation18], 32  }
  0x59   :  { %3810 = vsyncadd [#allocation18], 4294967264 }
  0x5a   :  { %3811 = dma.done.wait [#allocation21], 6160  }
  0x5b   :  { %3812 = vsyncadd [#allocation21], 4294961136 }
  0x5c   :  { %3813 = dma.done.wait [#allocation24], 10240  }
  0x5d   :  { %3814 = vsyncadd [#allocation24], 4294957056 }
  0x5e   :  { %3815 = dma.done.wait [#allocation27], 8192  }
  0x5f   :  { %3816 = vsyncadd [#allocation27], 4294959104  ;;  %v370_v0 = vld [vmem:[#allocation7 + $0x170] sm:$0xff]  ;;  %v367_v1 = vld [vmem:[#allocation7 + $0x158] sm:$0xff]  ;;  %vm600_vm0 = vcmask 261120   ;;  %s3841_s20 = smov 96  }
  0x60   :  { %v369_v2 = vld [vmem:[#allocation7 + $0x168] sm:$0xff]  ;;  %554 = vmatpush.msra.mxu1 %v370_v0  ;;  %v366_v3 = vld [vmem:[#allocation7 + $0x150] sm:$0xff]  ;;  %v364_v4 = vld [vmem:[#allocation7 + $0x140] sm:$0xff]  ;;  %vm655_vm1 = vcmask 64512   ;;  %s3842_s10 = smov 64   ;;  %s4690_s24 = sld [smem:[#allocation46_spill]] }
  0x61   :  { %531 = vmatpush.msra.mxu0 %v369_v2  ;;  %v363_v5 = vld [vmem:[#allocation7 + $0x138] sm:$0xff]  ;;  %v361_v6 = vld [vmem:[#allocation7 + $0x128] sm:$0xff]  ;;  %v360_v7 = vld [vmem:[#allocation7 + $0x120] sm:$0xff]  ;;  %s4699_s3 = sld [smem:[#allocation50_spill]]  ;;  %s3844_s14 = smov [#allocation28]  }
  0x62   :  { %555 = vmatpush.msra.mxu1 %v367_v1  ;;  %v358_v8 = vld [vmem:[#allocation7 + $0x110] sm:$0xff]  ;;  %v357_v9 = vld [vmem:[#allocation7 + $0x108] sm:$0xff]  ;;  %v355_v10 = vld [vmem:[#allocation7 + $0xf8] sm:$0xff]  ;;  %s4700_s1 = sld [smem:[#allocation51_spill]]  ;;  %s3107_s4 = sshll.u32 %s3844_s14, 4  ;;  %s3108_s4 = int_to_ptr.vmem [resolvable:$true] %s3107_s4 }
  0x63   :  { %532 = vmatpush.msra.mxu0 %v366_v3  ;;  %v354_v11 = vld [vmem:[#allocation7 + $0xf0] sm:$0xff]  ;;  %v352_v12 = vld [vmem:[#allocation7 + $0xe0] sm:$0xff]  ;;  %v351_v13 = vld [vmem:[#allocation7 + $0xd8] sm:$0xff]  ;;  %s4701_s18 = sld [smem:[#allocation52_spill]] }
  0x64   :  { %556 = vmatpush.msra.mxu1 %v364_v4  ;;  %v349_v14 = vld [vmem:[#allocation7 + $0xc8] sm:$0xff]  ;;  %v348_v15 = vld [vmem:[#allocation7 + $0xc0] sm:$0xff]  ;;  %v346_v16 = vld [vmem:[#allocation7 + $0xb0] sm:$0xff] }
  0x65   :  { %533 = vmatpush.msra.mxu0 %v363_v5  ;;  %v345_v17 = vld [vmem:[#allocation7 + $0xa8] sm:$0xff]  ;;  %v343_v18 = vld [vmem:[#allocation7 + $0x98] sm:$0xff]  ;;  %v342_v19 = vld [vmem:[#allocation7 + $0x90] sm:$0xff] }
  0x66   :  { %557 = vmatpush.msra.mxu1 %v361_v6  ;;  %v340_v20 = vld [vmem:[#allocation7 + $0x80] sm:$0xff]  ;;  %v339_v21 = vld [vmem:[#allocation7 + $0x78] sm:$0xff]  ;;  %v337_v22 = vld [vmem:[#allocation7 + $0x68] sm:$0xff] }
  0x67   :  { %534 = vmatpush.msra.mxu0 %v360_v7  ;;  %v336_v23 = vld [vmem:[#allocation7 + $0x60] sm:$0xff]  ;;  %v334_v24 = vld [vmem:[#allocation7 + $0x50] sm:$0xff]  ;;  %v333_v25 = vld [vmem:[#allocation7 + $0x48] sm:$0xff] }
  0x68   :  { %558 = vmatpush.msra.mxu1 %v358_v8  ;;  %v331_v26 = vld [vmem:[#allocation7 + $0x38] sm:$0xff]  ;;  %v330_v27 = vld [vmem:[#allocation7 + $0x30] sm:$0xff]  ;;  %v319_v28 = vld [vmem:[#allocation2] sm:$0xff] }
  0x69   :  { %535 = vmatpush.msra.mxu0 %v357_v9  ;;  %v321_v29 = vld [vmem:[#allocation5] sm:$0xff]  ;;  %v328_v30 = vld [vmem:[#allocation7 + $0x20] sm:$0xff]  ;;  %v325_v32 = vld [vmem:[#allocation7 + $0x8] sm:$0xff]  ;;  %s3109_s29 = sshll.u32 %s4701_s18, 4  ;;  %s3110_s29 = int_to_ptr.hbm [resolvable:$true] %s3109_s29 }
  0x6a   :  { %559 = vmatpush.msra.mxu1 %v355_v10  ;;  %v327_v31 = vld [vmem:[#allocation7 + $0x18] sm:$0xff]  ;;  %v4055_v33 = vadd.f32 %v321_v29, %v319_v28  ;;  %v324_v34 = vld [vmem:[#allocation7] sm:$0xff]  ;;  %v320_v35 = vld [vmem:[#allocation2 + $0x8] sm:$0xff] }
  0x6b   :  { %536 = vmatpush.msra.mxu0 %v354_v11  ;;  %v4059_v36 = vadd.f32 %v321_v29, %v320_v35  ;;  %v4063_v37 = vld [vmem:[#allocation8] sm:$0x7]  ;;  %v371_v48 = vld [vmem:[#allocation7 + $0x178] sm:$0xff]  ;;  %v365_v50 = vld [vmem:[#allocation7 + $0x148] sm:$0xff] }
  0x6c   :  { %560 = vmatpush.msra.mxu1 %v352_v12  ;;  %v526_v38 = vperm.slane %v4063_v37, 1  ;;  %v525_v39 = vperm.slane %v4063_v37, 0  ;;  %577 = vmatpush.msra.mxu2 %v371_v48  ;;  %v368_v49 = vld [vmem:[#allocation7 + $0x160] sm:$0xff]  ;;  %v362_v51 = vld [vmem:[#allocation7 + $0x130] sm:$0xff]  ;;  %v359_v52 = vld [vmem:[#allocation7 + $0x118] sm:$0xff] }
  0x6d   :  { %537 = vmatpush.msra.mxu0 %v351_v13  ;;  %v356_v53 = vld [vmem:[#allocation7 + $0x100] sm:$0xff]  ;;  %v353_v54 = vld [vmem:[#allocation7 + $0xe8] sm:$0xff]  ;;  %v350_v55 = vld [vmem:[#allocation7 + $0xd0] sm:$0xff] }
  0x6e   :  { %561 = vmatpush.msra.mxu1 %v349_v14  ;;  %578 = vmatpush.msra.mxu2 %v368_v49  ;;  %v347_v56 = vld [vmem:[#allocation7 + $0xb8] sm:$0xff]  ;;  %v344_v57 = vld [vmem:[#allocation7 + $0xa0] sm:$0xff]  ;;  %v341_v58 = vld [vmem:[#allocation7 + $0x88] sm:$0xff]  ;;  %v527_v14 = vperm.slane %v4063_v37, 2 }
  0x6f   :  { %538 = vmatpush.msra.mxu0 %v348_v15  ;;  %v338_v59 = vld [vmem:[#allocation7 + $0x70] sm:$0xff]  ;;  %v335_v60 = vld [vmem:[#allocation7 + $0x58] sm:$0xff]  ;;  %v332_v62 = vld [vmem:[#allocation7 + $0x40] sm:$0xff] }
  0x70   :  { %562 = vmatpush.msra.mxu1 %v346_v16  ;;  %579 = vmatpush.msra.mxu2 %v365_v50  ;;  %v329_v0 = vld [vmem:[#allocation7 + $0x28] sm:$0xff]  ;;  %v326_v2 = vld [vmem:[#allocation7 + $0x10] sm:$0xff]  ;;  %v376_v29 = vld [vmem:[#allocation10 + $0x18] sm:$0xff] }
  0x71   :  { %539 = vmatpush.msra.mxu0 %v345_v17 }
  0x72   :  { %563 = vmatpush.msra.mxu1 %v343_v18  ;;  %580 = vmatpush.msra.mxu2 %v362_v51 }
  0x73   :  { %540 = vmatpush.msra.mxu0 %v342_v19 }
  0x74   :  { %564 = vmatpush.msra.mxu1 %v340_v20  ;;  %581 = vmatpush.msra.mxu2 %v359_v52 }
  0x75   :  { %541 = vmatpush.msra.mxu0 %v339_v21 }
  0x76   :  { %565 = vmatpush.msra.mxu1 %v337_v22  ;;  %582 = vmatpush.msra.mxu2 %v356_v53 }
  0x77   :  { %542 = vmatpush.msra.mxu0 %v336_v23 }
  0x78   :  { %566 = vmatpush.msra.mxu1 %v334_v24  ;;  %583 = vmatpush.msra.mxu2 %v353_v54 }
  0x79   :  { %543 = vmatpush.msra.mxu0 %v333_v25 }
  0x7a   :  { %567 = vmatpush.msra.mxu1 %v331_v26  ;;  %584 = vmatpush.msra.mxu2 %v350_v55 }
  0x7b   :  { %544 = vmatpush.msra.mxu0 %v330_v27 }
  0x7c   :  { %568 = vmatpush.msra.mxu1 %v328_v30  ;;  %585 = vmatpush.msra.mxu2 %v347_v56 }
  0x7d   :  { %545 = vmatpush.msra.mxu0 %v327_v31  ;;  %v375_v31 = vld [vmem:[#allocation10 + $0x10] sm:$0xff] }
  0x7e   :  { %569 = vmatpush.msra.mxu1 %v325_v32  ;;  %586 = vmatpush.msra.mxu2 %v344_v57  ;;  %v374_v32 = vld [vmem:[#allocation10 + $0x8] sm:$0xff] }
  0x7f   :  { %546 = vmatpush.msra.mxu0 %v324_v34  ;;  %570 = vmatmul.f32.vlgmr.msra.gmra.mxu1 %v4055_v33 }
  0x80   :  { %547 = vmatmul.f32.vlgmr.msra.gmra.mxu0 %v4055_v33  ;;  %587 = vmatpush.msra.mxu2 %v341_v58 }
  0x82   :  { %588 = vmatpush.msra.mxu2 %v338_v59 }
  0x84   :  { %589 = vmatpush.msra.mxu2 %v335_v60 }
  0x86   :  { %590 = vmatpush.msra.mxu2 %v332_v62 }
  0x87   :  { %573 = vmatmul.f32.gmra.mxu1 %v4059_v36 }
  0x88   :  { %550 = vmatmul.f32.gmra.mxu0 %v4059_v36  ;;  %591 = vmatpush.msra.mxu2 %v329_v0 }
  0x8a   :  { %592 = vmatpush.msra.mxu2 %v326_v2 }
  0x8b   :  { %593 = vmatmul.f32.vlgmr.msra.gmra.mxu2 %v4055_v33 }
  0x93   :  { %596 = vmatmul.f32.gmra.mxu2 %v4059_v36 }
  0xfc   :  { %v571_v40 = vpop.f32.mrf.mxu1 }
  0xfd   :  { %v548_v41 = vpop.f32.mrf.mxu0  ;;  %v4067_v42 = vadd.f32 %v571_v40, %v526_v38 }
  0xfe   :  { %v4069_v43 = vadd.f32 %v548_v41, %v525_v39 }
  0xff   :  { %726 = vrot.lane.b32.xlu2 %v4067_v42, %s3841_s20  ;;  %3127 = vmatpush.xpose.msk.msra.mxu3 %vm600_vm0, %v4067_v42 }
 0x102   :  { %3128 = vmatmul.msk.f32.vlgmr.msra.gmra.mxu3 %vm600_vm0, %v4069_v43 }
 0x104   :  { %v574_v44 = vpop.f32.mrf.mxu1 }
 0x105   :  { %v551_v45 = vpop.f32.mrf.mxu0  ;;  %v4077_v46 = vadd.f32 %v574_v44, %v526_v38  ;;  %v373_v38 = vld [vmem:[#allocation10] sm:$0xff] }
 0x106   :  { %v4079_v47 = vadd.f32 %v551_v45, %v525_v39 }
 0x107   :  { %3129 = vmatpush.xpose.msk.msrb.mxu3 %vm600_vm0, %v4077_v46  ;;  %724 = vrot.lane.b32.xlu2 %v4069_v43, %s3841_s20 }
 0x10a   :  { %3130 = vmatmul.msk.f32.vlgmr.msrb.gmra.mxu3 %vm600_vm0, %v4079_v47 }
 0x10e   :  { %v594_v16 = vpop.f32.mrf.mxu2 }
 0x10f   :  { %v4096_v18 = vadd.f32 %v594_v16, %v527_v14 }
 0x111   :  { %696 = vmatpush.msra.mxu3 %v4096_v18 }
 0x116   :  { %v597_v19 = vpop.f32.mrf.mxu2 }
 0x117   :  { %v4107_v20 = vadd.f32 %v597_v19, %v527_v14 }
 0x119   :  { %719 = vmatpush.msrb.mxu3 %v4107_v20 }
 0x159   :  { %v727_v25 = vpop.permute.xlu2 %726 }
 0x161   :  { %v725_v30 = vpop.permute.xlu2 %724 }
 0x185   :  { %v624_v61 = vpop.f32.mrf.mxu3 }
 0x186   :  { %v653_v63 = vmul.f32 0.17677669, %v624_v61 }
 0x188   :  { %v656_v1 = vsel %vm655_vm1, %v653_v63, -inf }
 0x189   :  { %657 = vmax.xlane.f32.xlu0 %v656_v1 }
 0x18d   :  { %v650_v3 = vpop.f32.mrf.mxu3 }
 0x18e   :  { %v654_v4 = vmul.f32 0.17677669, %v650_v3 }
 0x190   :  { %v659_v5 = vsel %vm655_vm1, %v654_v4, -inf }
 0x191   :  { %660 = vmax.xlane.f32.xlu0 %v659_v5  ;;  %v379_v5 = vld [vmem:[#allocation10 + $0x30] sm:$0xff] }
 0x1a5   :  { %754 = vrot.lane.b32.xlu0 %v4077_v46, %s3841_s20 }
 0x1fc   :  { %v658_v6 = vpop.xlane.xlu0 %657 }
 0x1fd   :  { %v662_v7 = vsub.f32 %v653_v63, %v658_v6 }
 0x1ff   :  { %v664_v8 = vmul.f32 1.442695, %v662_v7 }
 0x201   :  { %3245 = vpow2.f32 %v664_v8 }
 0x204   :  { %v661_v9 = vpop.xlane.xlu0 %660 }
 0x205   :  { %v663_v10 = vsub.f32 %v654_v4, %v661_v9  ;;  %v380_v4 = vld [vmem:[#allocation10 + $0x38] sm:$0xff] }
 0x206   :  { %876 = vmatpush.msrb.mxu2 %v380_v4  ;;  %v385_v4 = vld [vmem:[#allocation10 + $0x60] sm:$0xff] }
 0x207   :  { %v3246_v11 = vpop.eup %3245  ;;  %v666_v12 = vmul.f32 1.442695, %v663_v10  ;;  %v377_v10 = vld [vmem:[#allocation10 + $0x20] sm:$0xff] }
 0x208   :  { %v668_v13 = vsel %vm655_vm1, %v3246_v11, 0.0  ;;  %877 = vmatpush.msrb.mxu2 %v379_v5 }
 0x209   :  { %3247 = vpow2.f32 %v666_v12  ;;  %669 = vadd.xlane.f32.xlu1 %v668_v13 }
 0x20f   :  { %v3248_v15 = vpop.eup %3247 }
 0x210   :  { %v671_v17 = vsel %vm655_vm1, %v3248_v15, 0.0 }
 0x211   :  { %672 = vadd.xlane.f32.xlu1 %v671_v17 }
 0x217   :  { %v755_v28 = vpop.permute.xlu0 %754 }
 0x22a   :  { %752 = vrot.lane.b32.xlu1 %v4079_v47, %s3841_s20 }
 0x232   :  { %805 = vrot.lane.b32.xlu1 %v4096_v18, %s3841_s20 }
 0x23a   :  { %918 = vrot.lane.b32.xlu1 %v4067_v42, %s3842_s10 }
 0x242   :  { %916 = vrot.lane.b32.xlu1 %v4069_v43, %s3842_s10 }
 0x27c   :  { %v670_v21 = vpop.xlane.xlu1 %669 }
 0x27d   :  { %3249 = vrcp.f32 %v670_v21 }
 0x283   :  { %v3250_v22 = vpop.eup %3249 }
 0x284   :  { %v676_v23 = vmul.f32 %v3250_v22, %v3246_v11  ;;  %v673_v24 = vpop.xlane.xlu1 %672 }
 0x285   :  { %3251 = vrcp.f32 %v673_v24 }
 0x286   :  { %3131 = vmatmul.msk.f32.vlgmr.msra.gmra.mxu3 %vm655_vm1, %v676_v23 }
 0x287   :  { %3133 = vmatpush.xpose.msk.msra.mxu3 %vm600_vm0, %v727_v25 }
 0x28b   :  { %v3252_v26 = vpop.eup %3251 }
 0x28c   :  { %v677_v27 = vmul.f32 %v3252_v26, %v3248_v15 }
 0x28e   :  { %3132 = vmatmul.msk.f32.vlgmr.msrb.gmra.mxu3 %vm655_vm1, %v677_v27 }
 0x28f   :  { %3135 = vmatpush.xpose.msk.msrb.mxu3 %vm600_vm0, %v755_v28 }
 0x296   :  { %3134 = vmatmul.msk.f32.vlgmr.msra.gmra.mxu3 %vm600_vm0, %v725_v30 }
 0x297   :  { %905 = vmatpush.msra.mxu3 %v376_v29 }
 0x299   :  { %906 = vmatpush.msra.mxu3 %v375_v31 }
 0x29b   :  { %907 = vmatpush.msra.mxu3 %v374_v32 }
 0x29c   :  { %v753_v34 = vpop.permute.xlu1 %752 }
 0x29d   :  { %908 = vmatpush.msra.mxu3 %v373_v38 }
 0x29e   :  { %3136 = vmatmul.msk.f32.vlgmr.msrb.gmra.mxu3 %vm600_vm0, %v753_v34 }
 0x2a4   :  { %v806_v35 = vpop.permute.xlu1 %805 }
 0x2a5   :  { %826 = vmatpush.msrb.mxu0 %v806_v35 }
 0x2ac   :  { %v919_v37 = vpop.permute.xlu1 %918 }
 0x2ad   :  { %3143 = vmatpush.xpose.msk.msra.mxu0 %vm600_vm0, %v919_v37 }
 0x2b4   :  { %v917_v62 = vpop.permute.xlu1 %916 }
 0x309   :  { %v698_v39 = vpop.f32.mrf.mxu3 }
 0x30a   :  { %3141 = vmatmul.msk.f32.vlgmr.msra.gmra.mxu3 %vm600_vm0, %v698_v39 }
 0x311   :  { %v721_v40 = vpop.f32.mrf.mxu3 }
 0x312   :  { %3142 = vmatmul.msk.f32.gmra.mxu3 %vm600_vm0, %v721_v40 }
 0x319   :  { %v749_v41 = vpop.f32.mrf.mxu3 }
 0x31a   :  { %v780_v44 = vmul.f32 0.17677669, %v749_v41 }
 0x31c   :  { %v782_v45 = vsel %vm655_vm1, %v780_v44, -inf }
 0x31d   :  { %783 = vmax.xlane.f32.xlu2 %v782_v45 }
 0x321   :  { %v777_v48 = vpop.f32.mrf.mxu3 }
 0x322   :  { %v781_v49 = vmul.f32 0.17677669, %v777_v48 }
 0x324   :  { %v785_v50 = vsel %vm655_vm1, %v781_v49, -inf }
 0x325   :  { %786 = vmax.xlane.f32.xlu2 %v785_v50  ;;  %v383_v50 = vld [vmem:[#allocation10 + $0x50] sm:$0xff] }
 0x33d   :  { %832 = vrot.lane.b32.xlu2 %v4107_v20, %s3841_s20 }
 0x345   :  { %1081 = vrot.lane.b32.xlu2 %v4067_v42, %s3835_s7 }
 0x34d   :  { %944 = vrot.lane.b32.xlu2 %v4079_v47, %s3842_s10 }
 0x38d   :  { %v4151_v21 = vpop.f32.mrf.mxu3 }
 0x390   :  { %v784_v51 = vpop.xlane.xlu2 %783 }
 0x391   :  { %v788_v52 = vsub.f32 %v780_v44, %v784_v51 }
 0x393   :  { %v790_v53 = vmul.f32 1.442695, %v788_v52  ;;  %v382_v52 = vld [vmem:[#allocation10 + $0x48] sm:$0xff] }
 0x395   :  { %3253 = vpow2.f32 %v790_v53  ;;  %v4153_v25 = vpop.f32.mrf.mxu3 }
 0x398   :  { %v787_v54 = vpop.xlane.xlu2 %786 }
 0x399   :  { %v789_v55 = vsub.f32 %v781_v49, %v787_v54  ;;  %v384_v49 = vld [vmem:[#allocation10 + $0x58] sm:$0xff] }
 0x39b   :  { %v3254_v56 = vpop.eup %3253  ;;  %v792_v57 = vmul.f32 1.442695, %v789_v55 }
 0x39c   :  { %v794_v58 = vsel %vm655_vm1, %v3254_v56, 0.0 }
 0x39d   :  { %3255 = vpow2.f32 %v792_v57  ;;  %795 = vadd.xlane.f32.xlu0 %v794_v58  ;;  %v381_v58 = vld [vmem:[#allocation10 + $0x40] sm:$0xff] }
 0x3a0   :  { %v833_v59 = vpop.permute.xlu2 %832 }
 0x3a1   :  { %853 = vmatpush.msrb.mxu1 %v833_v59 }
 0x3a3   :  { %v3256_v60 = vpop.eup %3255 }
 0x3a4   :  { %v797_v42 = vsel %vm655_vm1, %v3256_v60, 0.0 }
 0x3a5   :  { %798 = vadd.xlane.f32.xlu1 %v797_v42 }
 0x3a8   :  { %v1082_v61 = vpop.permute.xlu2 %1081 }
 0x3a9   :  { %3151 = vmatpush.xpose.msk.msrb.mxu3 %vm600_vm0, %v1082_v61 }
 0x3b0   :  { %v945_v6 = vpop.permute.xlu2 %944 }
 0x3b1   :  { %946 = vrot.lane.b32.xlu0 %v4077_v46, %s3842_s10 }
 0x3b9   :  { %1079 = vrot.lane.b32.xlu0 %v4069_v43, %s3835_s7 }
 0x3be   :  { %996 = vrot.lane.b32.xlu1 %v4096_v18, %s3842_s10 }
 0x3c6   :  { %1109 = vrot.lane.b32.xlu1 %v4077_v46, %s3835_s7  ;;  %v378_v46 = vld [vmem:[#allocation10 + $0x28] sm:$0xff] }
 0x3c7   :  { %878 = vmatpush.msrb.mxu2 %v378_v46 }
 0x3c9   :  { %879 = vmatpush.msrb.mxu2 %v377_v10 }
 0x3cb   :  { %1066 = vmatpush.msra.mxu2 %v384_v49 }
 0x3cd   :  { %1067 = vmatpush.msra.mxu2 %v383_v50  ;;  %v442_v50 = vld [vmem:[#allocation13 + $0x1a0] sm:$0xff] }
 0x3ce   :  { %1107 = vrot.lane.b32.xlu1 %v4079_v47, %s3835_s7 }
 0x3cf   :  { %1068 = vmatpush.msra.mxu2 %v382_v52  ;;  %v444_v52 = vld [vmem:[#allocation13 + $0x1b0] sm:$0xff] }
 0x3d1   :  { %1069 = vmatpush.msra.mxu2 %v381_v58  ;;  %v435_v58 = vld [vmem:[#allocation13 + $0x168] sm:$0xff] }
 0x410   :  { %v796_v63 = vpop.xlane.xlu0 %795 }
 0x411   :  { %3257 = vrcp.f32 %v796_v63 }
 0x417   :  { %v3258_v0 = vpop.eup %3257 }
 0x418   :  { %v799_v1 = vpop.xlane.xlu1 %798  ;;  %v802_v2 = vmul.f32 %v3258_v0, %v3254_v56 }
 0x419   :  { %3259 = vrcp.f32 %v799_v1 }
 0x41a   :  { %3137 = vmatmul.msk.f32.vlgmr.msrb.gmra.mxu0 %vm655_vm1, %v802_v2 }
 0x41f   :  { %v3260_v3 = vpop.eup %3259 }
 0x420   :  { %v803_v43 = vmul.f32 %v3260_v3, %v3256_v60  ;;  %v387_v3 = vld [vmem:[#allocation10 + $0x70] sm:$0xff] }
 0x422   :  { %3138 = vmatmul.msk.f32.vlgmr.msrb.gmra.mxu1 %vm655_vm1, %v803_v43  ;;  %3144 = vmatmul.msk.f32.vlgmr.msra.gmra.mxu0 %vm600_vm0, %v917_v62  ;;  %v386_v43 = vld [vmem:[#allocation10 + $0x68] sm:$0xff] }
 0x423   :  { %v947_v47 = vpop.permute.xlu0 %946 }
 0x424   :  { %3145 = vmatpush.xpose.msk.msra.mxu1 %vm600_vm0, %v947_v47 }
 0x42a   :  { %3146 = vmatmul.msk.f32.vlgmr.msra.gmra.mxu1 %vm600_vm0, %v945_v6 }
 0x42b   :  { %v1080_v7 = vpop.permute.xlu0 %1079 }
 0x42c   :  { %3152 = vmatmul.msk.f32.vlgmr.msrb.gmra.mxu3 %vm600_vm0, %v1080_v7 }
 0x430   :  { %v997_v8 = vpop.permute.xlu1 %996 }
 0x431   :  { %1017 = vmatpush.msrb.mxu0 %v997_v8 }
 0x438   :  { %v1110_v9 = vpop.permute.xlu1 %1109 }
 0x439   :  { %3153 = vmatpush.xpose.msk.msra.mxu0 %vm600_vm0, %v1110_v9 }
 0x440   :  { %v1108_v40 = vpop.permute.xlu1 %1107 }
 0x497   :  { %v828_v11 = vpop.f32.mrf.mxu0 }
 0x498   :  { %3139 = vmatmul.msk.f32.vlgmr.msrb.gmra.mxu2 %vm600_vm0, %v828_v11 }
 0x49f   :  { %v855_v12 = vpop.f32.mrf.mxu1  ;;  %v941_v13 = vpop.f32.mrf.mxu0 }
 0x4a0   :  { %v972_v14 = vmul.f32 0.17677669, %v941_v13  ;;  %3140 = vmatmul.msk.f32.gmra.mxu2 %vm600_vm0, %v855_v12 }
 0x4a2   :  { %v974_v15 = vsel %vm655_vm1, %v972_v14, -inf }
 0x4a3   :  { %975 = vmax.xlane.f32.xlu2 %v974_v15  ;;  %v4177_v15 = vld [vmem:[#allocation11] ss:$0 sm:$0xff] }
 0x4a7   :  { %v969_v16 = vpop.f32.mrf.mxu1 }
 0x4a8   :  { %v973_v17 = vmul.f32 0.17677669, %v969_v16 }
 0x4aa   :  { %v977_v19 = vsel %vm655_vm1, %v973_v17, -inf }
 0x4ab   :  { %978 = vmax.xlane.f32.xlu2 %v977_v19 }
 0x4af   :  { %v1104_v31 = vpop.f32.mrf.mxu3 }
 0x4b0   :  { %v1135_v32 = vmul.f32 0.17677669, %v1104_v31  ;;  %v453_v31 = vld [vmem:[#allocation13 + $0x1f8] sm:$0xff] }
 0x4b2   :  { %v1137_v37 = vsel %vm655_vm1, %v1135_v32, -inf }
 0x516   :  { %v976_v22 = vpop.xlane.xlu2 %975 }
 0x517   :  { %v980_v23 = vsub.f32 %v972_v14, %v976_v22 }
 0x519   :  { %v982_v24 = vmul.f32 1.442695, %v980_v23 }
 0x51b   :  { %3261 = vpow2.f32 %v982_v24  ;;  %v881_v9 = vpop.f32.mrf.mxu2 }
 0x51c   :  { %v911_v13 = vadd.f32 %v4151_v21, %v881_v9  ;;  %v452_v21 = vld [vmem:[#allocation13 + $0x1f0] sm:$0xff]  ;;  %v415_v9 = vld [vmem:[#allocation13 + $0xc8] sm:$0xff] }
 0x51e   :  { %v979_v26 = vpop.xlane.xlu2 %978 }
 0x51f   :  { %v981_v27 = vsub.f32 %v973_v17, %v979_v26  ;;  %v3843_v26 = vmov 128.0  }
 0x521   :  { %v3262_v28 = vpop.eup %3261  ;;  %v984_v29 = vmul.f32 1.442695, %v981_v27 }
 0x522   :  { %v986_v30 = vsel %vm655_vm1, %v3262_v28, 0.0 }
 0x523   :  { %3263 = vpow2.f32 %v984_v29  ;;  %987 = vadd.xlane.f32.xlu0 %v986_v30  ;;  %v4174_v10 = vpop.f32.mrf.mxu2  ;;  %v451_v29 = vld [vmem:[#allocation13 + $0x1e8] sm:$0xff] }
 0x529   :  { %v3264_v34 = vpop.eup %3263 }
 0x52a   :  { %v989_v35 = vsel %vm655_vm1, %v3264_v34, 0.0 }
 0x52b   :  { %990 = vadd.xlane.f32.xlu1 %v989_v35  ;;  %1138 = vmax.xlane.f32.xlu0 %v1137_v37  ;;  %v448_v35 = vld [vmem:[#allocation13 + $0x1d0] sm:$0xff]  ;;  %v449_v37 = vld [vmem:[#allocation13 + $0x1d8] sm:$0xff] }
 0x53f   :  { %1022 = vrot.lane.b32.xlu0 %v4107_v20, %s3842_s10 }
 0x544   :  { %1185 = vrot.lane.b32.xlu1 %v4107_v20, %s3835_s7 }
 0x596   :  { %v988_v38 = vpop.xlane.xlu0 %987 }
 0x597   :  { %3265 = vrcp.f32 %v988_v38 }
 0x59d   :  { %v3266_v39 = vpop.eup %3265 }
 0x59e   :  { %v994_v41 = vmul.f32 %v3266_v39, %v3262_v28  ;;  %v1139_v44 = vpop.xlane.xlu0 %1138  ;;  %v991_v51 = vpop.xlane.xlu1 %990  ;;  %v450_v28 = vld [vmem:[#allocation13 + $0x1e0] sm:$0xff] }
 0x59f   :  { %v1143_v45 = vsub.f32 %v1135_v32, %v1139_v44  ;;  %1315 = vmatpush.msrb.mxu2 %v450_v28  ;;  %v446_v32 = vld [vmem:[#allocation13 + $0x1c0] sm:$0xff]  ;;  %v404_v28 = vld [vmem:[#allocation13 + $0x70] sm:$0xff] }
 0x5a0   :  { %3147 = vmatmul.msk.f32.vlgmr.msrb.gmra.mxu0 %vm655_vm1, %v994_v41 }
 0x5a1   :  { %v1145_v48 = vmul.f32 1.442695, %v1143_v45  ;;  %1316 = vmatpush.msrb.mxu2 %v446_v32  ;;  %v401_v32 = vld [vmem:[#allocation13 + $0x58] sm:$0xff] }
 0x5a3   :  { %3267 = vpow2.f32 %v1145_v48  ;;  %1317 = vmatpush.msrb.mxu2 %v442_v50 }
 0x5a4   :  { %3269 = vrcp.f32 %v991_v51  ;;  %v443_v51 = vld [vmem:[#allocation13 + $0x1a8] sm:$0xff] }
 0x5a8   :  { %3154 = vmatmul.msk.f32.vlgmr.msra.gmra.mxu0 %vm600_vm0, %v1108_v40 }
 0x5a9   :  { %v3268_v20 = vpop.eup %3267 }
 0x5aa   :  { %v1149_v53 = vsel %vm655_vm1, %v3268_v20, 0.0  ;;  %v3270_v54 = vpop.eup %3269 }
 0x5ab   :  { %1150 = vadd.xlane.f32.xlu2 %v1149_v53  ;;  %v995_v55 = vmul.f32 %v3270_v54, %v3264_v34  ;;  %v447_v34 = vld [vmem:[#allocation13 + $0x1c8] sm:$0xff]  ;;  %v438_v53 = vld [vmem:[#allocation13 + $0x180] sm:$0xff] }
 0x5ac   :  { %v439_v54 = vld [vmem:[#allocation13 + $0x188] sm:$0xff]  ;;  %1318 = vmatpush.msrb.mxu2 %v438_v53  ;;  %v914_v53 = vadd.f32 %v4153_v25, %v4174_v10  ;;  %v4198_v25 = vld [vmem:[#allocation19] ss:$0 sm:$0xff] }
 0x5b1   :  { %v1023_v56 = vpop.permute.xlu0 %1022 }
 0x5b2   :  { %1043 = vmatpush.msrb.mxu1 %v1023_v56  ;;  %v441_v56 = vld [vmem:[#allocation13 + $0x198] sm:$0xff] }
 0x5b3   :  { %3148 = vmatmul.msk.f32.vlgmr.msrb.gmra.mxu1 %vm655_vm1, %v995_v55  ;;  %v440_v55 = vld [vmem:[#allocation13 + $0x190] sm:$0xff] }
 0x5b6   :  { %v1186_v57 = vpop.permute.xlu1 %1185 }
 0x5b7   :  { %1206 = vmatpush.msra.mxu3 %v1186_v57  ;;  %v434_v57 = vld [vmem:[#allocation13 + $0x160] sm:$0xff] }
 0x5b8   :  { %1319 = vmatpush.msrb.mxu2 %v434_v57 }
 0x5b9   :  { %1361 = vmatpush.msrb.mxu3 %v452_v21  ;;  %v398_v21 = vld [vmem:[#allocation13 + $0x40] sm:$0xff] }
 0x5bb   :  { %1362 = vmatpush.msrb.mxu3 %v448_v35  ;;  %v395_v35 = vld [vmem:[#allocation13 + $0x28] sm:$0xff] }
 0x5bd   :  { %1363 = vmatpush.msrb.mxu3 %v444_v52 }
 0x5bf   :  { %1364 = vmatpush.msrb.mxu3 %v440_v55 }
 0x5c3   :  { %1159 = vrot.lane.b32.xlu2 %v4096_v18, %s3835_s7  ;;  %v388_v18 = vld [vmem:[#allocation10 + $0x78] sm:$0xff] }
 0x5c4   :  { %1229 = vmatpush.msrb.mxu0 %v388_v18  ;;  %v429_v18 = vld [vmem:[#allocation13 + $0x138] sm:$0xff] }
 0x5c6   :  { %1230 = vmatpush.msrb.mxu0 %v387_v3  ;;  %v422_v3 = vld [vmem:[#allocation13 + $0x100] sm:$0xff] }
 0x5c8   :  { %1231 = vmatpush.msrb.mxu0 %v386_v43  ;;  %v423_v43 = vld [vmem:[#allocation13 + $0x108] sm:$0xff] }
 0x5ca   :  { %1232 = vmatpush.msrb.mxu0 %v385_v4  ;;  %v424_v4 = vld [vmem:[#allocation13 + $0x110] sm:$0xff] }
 0x5cc   :  { %1384 = vmatpush.msra.mxu0 %v453_v31  ;;  %v400_v31 = vld [vmem:[#allocation13 + $0x50] sm:$0xff] }
 0x5ce   :  { %1385 = vmatpush.msra.mxu0 %v449_v37  ;;  %v396_v37 = vld [vmem:[#allocation13 + $0x30] sm:$0xff] }
 0x61d   :  { %v1019_v59 = vpop.f32.mrf.mxu0 }
 0x61e   :  { %3149 = vmatmul.msk.f32.vlgmr.msra.gmra.mxu2 %vm600_vm0, %v1019_v59  ;;  %v1151_v60 = vpop.xlane.xlu2 %1150  ;;  %v436_v59 = vld [vmem:[#allocation13 + $0x170] sm:$0xff] }
 0x61f   :  { %3271 = vrcp.f32 %v1151_v60  ;;  %v437_v60 = vld [vmem:[#allocation13 + $0x178] sm:$0xff]  ;;  %1365 = vmatpush.msrb.mxu3 %v436_v59 }
 0x625   :  { %v3272_v42 = vpop.eup %3271  ;;  %v1132_v61 = vpop.f32.mrf.mxu0 }
 0x626   :  { %v1157_v62 = vmul.f32 %v3272_v42, %v3268_v20  ;;  %v1136_v63 = vmul.f32 0.17677669, %v1132_v61  ;;  %v1160_v0 = vpop.permute.xlu2 %1159  ;;  %v445_v20 = vld [vmem:[#allocation13 + $0x1b8] sm:$0xff]  ;;  %v430_v42 = vld [vmem:[#allocation13 + $0x140] sm:$0xff]  ;;  %v431_v61 = vld [vmem:[#allocation13 + $0x148] sm:$0xff] }
 0x627   :  { %1180 = vmatpush.msra.mxu1 %v1160_v0  ;;  %1386 = vmatpush.msra.mxu0 %v445_v20  ;;  %v426_v0 = vld [vmem:[#allocation13 + $0x120] sm:$0xff] }
 0x628   :  { %3155 = vmatmul.msk.f32.vlgmr.msra.gmra.mxu1 %vm655_vm1, %v1157_v62  ;;  %v1140_v1 = vsel %vm655_vm1, %v1136_v63, -inf  ;;  %v432_v62 = vld [vmem:[#allocation13 + $0x150] sm:$0xff]  ;;  %1320 = vmatpush.msrb.mxu2 %v430_v42 }
 0x629   :  { %1141 = vmax.xlane.f32.xlu0 %v1140_v1  ;;  %1338 = vmatpush.msrb.mxu1 %v451_v29  ;;  %v427_v1 = vld [vmem:[#allocation13 + $0x128] sm:$0xff]  ;;  %v405_v29 = vld [vmem:[#allocation13 + $0x78] sm:$0xff] }
 0x62a   :  { %1387 = vmatpush.msra.mxu0 %v441_v56  ;;  %1366 = vmatpush.msrb.mxu3 %v432_v62 }
 0x62b   :  { %1339 = vmatpush.msrb.mxu1 %v447_v34  ;;  %1321 = vmatpush.msrb.mxu2 %v426_v0  ;;  %v394_v34 = vld [vmem:[#allocation13 + $0x20] sm:$0xff] }
 0x62c   :  { %1388 = vmatpush.msra.mxu0 %v437_v60 }
 0x62d   :  { %1340 = vmatpush.msrb.mxu1 %v443_v51  ;;  %1322 = vmatpush.msrb.mxu2 %v422_v3 }
 0x62f   :  { %1341 = vmatpush.msrb.mxu1 %v439_v54 }
 0x630   :  { %v1045_v2 = vpop.f32.mrf.mxu1 }
 0x631   :  { %3150 = vmatmul.msk.f32.gmra.mxu2 %vm600_vm0, %v1045_v2  ;;  %1342 = vmatpush.msrb.mxu1 %v435_v58  ;;  %v428_v2 = vld [vmem:[#allocation13 + $0x130] sm:$0xff] }
 0x632   :  { %1367 = vmatpush.msrb.mxu3 %v428_v2 }
 0x633   :  { %1343 = vmatpush.msrb.mxu1 %v431_v61  ;;  %v4194_v61 = vld [vmem:[#allocation17] ss:$0 sm:$0xff] }
 0x634   :  { %1368 = vmatpush.msrb.mxu3 %v424_v4  ;;  %v486_v4 = vld [vmem:[#allocation14 + $0xf8] sm:$0xff] }
 0x635   :  { %1344 = vmatpush.msrb.mxu1 %v427_v1 }
 0x637   :  { %1345 = vmatpush.msrb.mxu1 %v423_v43  ;;  %v470_v43 = vld [vmem:[#allocation14 + $0x78] sm:$0xff] }
 0x69c   :  { %v1142_v5 = vpop.xlane.xlu0 %1141 }
 0x69d   :  { %v1144_v46 = vsub.f32 %v1136_v63, %v1142_v5  ;;  %v433_v63 = vld [vmem:[#allocation13 + $0x158] sm:$0xff] }
 0x69e   :  { %1389 = vmatpush.msra.mxu0 %v433_v63  ;;  %v425_v5 = vld [vmem:[#allocation13 + $0x118] sm:$0xff] }
 0x69f   :  { %v1147_v47 = vmul.f32 1.442695, %v1144_v46  ;;  %v418_v46 = vld [vmem:[#allocation13 + $0xe0] sm:$0xff] }
 0x6a0   :  { %1390 = vmatpush.msra.mxu0 %v429_v18  ;;  %1323 = vmatpush.msrb.mxu2 %v418_v46  ;;  %v4216_v18 = vld [vmem:[%s4690_s24] sm:$0xf] }
 0x6a1   :  { %3273 = vpow2.f32 %v1147_v47  ;;  %v1071_v12 = vpop.f32.mrf.mxu2  ;;  %v419_v47 = vld [vmem:[#allocation13 + $0xe8] sm:$0xff]  ;;  %v1308_v3 = vperm.slane %v4216_v18, 1 }
 0x6a2   :  { %v1077_v14 = vadd.f32 %v1071_v12, %v911_v13  ;;  %1391 = vmatpush.msra.mxu0 %v425_v5  ;;  %1346 = vmatpush.msrb.mxu1 %v419_v47  ;;  %v417_v12 = vld [vmem:[#allocation13 + $0xd8] sm:$0xff]  ;;  %v410_v13 = vld [vmem:[#allocation13 + $0xa0] sm:$0xff]  ;;  %v1310_v47 = vperm.slane %v4216_v18, 3 }
 0x6a3   :  { %v502_v5 = vld [vmem:[#allocation14 + $0x178] sm:$0xff] }
 0x6a4   :  { %1347 = vmatpush.msrb.mxu1 %v415_v9  ;;  %v469_v9 = vld [vmem:[#allocation14 + $0x70] sm:$0xff] }
 0x6a5   :  { %v1182_v6 = vpop.f32.mrf.mxu1 }
 0x6a6   :  { %3157 = vmatmul.msk.f32.vlgmr.msrb.gmra.mxu0 %vm600_vm0, %v1182_v6  ;;  %v420_v6 = vld [vmem:[#allocation13 + $0xf0] sm:$0xff] }
 0x6a7   :  { %v3274_v7 = vpop.eup %3273  ;;  %1369 = vmatpush.msrb.mxu3 %v420_v6  ;;  %v518_v6 = vld [vmem:[#allocation14 + $0x1f8] sm:$0xff] }
 0x6a8   :  { %v1152_v8 = vsel %vm655_vm1, %v3274_v7, 0.0 }
 0x6a9   :  { %1153 = vadd.xlane.f32.xlu2 %v1152_v8  ;;  %v414_v8 = vld [vmem:[#allocation13 + $0xc0] sm:$0xff] }
 0x6aa   :  { %1324 = vmatpush.msrb.mxu2 %v414_v8  ;;  %v1307_v8 = vperm.slane %v4216_v18, 0 }
 0x6ac   :  { %1325 = vmatpush.msrb.mxu2 %v410_v13 }
 0x6b4   :  { %v1074_v52 = vpop.f32.mrf.mxu2 }
 0x6b5   :  { %v1078_v55 = vadd.f32 %v1074_v52, %v914_v53  ;;  %v464_v52 = vld [vmem:[#allocation14 + $0x48] sm:$0xff] }
 0x6b6   :  { %v496_v53 = vld [vmem:[#allocation14 + $0x148] sm:$0xff] }
 0x71c   :  { %v1154_v11 = vpop.xlane.xlu2 %1153 }
 0x71d   :  { %3275 = vrcp.f32 %v1154_v11  ;;  %v416_v11 = vld [vmem:[#allocation13 + $0xd0] sm:$0xff] }
 0x71e   :  { %3277 = vrcp.f32 %v3843_v26  ;;  %1370 = vmatpush.msrb.mxu3 %v416_v11  ;;  %v402_v26 = vld [vmem:[#allocation13 + $0x60] sm:$0xff]  ;;  %v485_v11 = vld [vmem:[#allocation14 + $0xf0] sm:$0xff] }
 0x723   :  { %v3276_v16 = vpop.eup %3275  ;;  %v1234_v17 = vpop.f32.mrf.mxu0 }
 0x724   :  { %v1158_v19 = vmul.f32 %v3276_v16, %v3274_v7  ;;  %v1240_v22 = vadd.f32 %v1234_v17, %v1077_v14  ;;  %v3278_v27 = vpop.eup %3277  ;;  %v421_v7 = vld [vmem:[#allocation13 + $0xf8] sm:$0xff]  ;;  %v411_v14 = vld [vmem:[#allocation13 + $0xa8] sm:$0xff]  ;;  %v412_v16 = vld [vmem:[#allocation13 + $0xb0] sm:$0xff] }
 0x725   :  { %v1254_v30 = vmul.f32 128.0, %v3278_v27  ;;  %vm1258_vm2 = vweird.f32 %v3278_v27  ;;  %1392 = vmatpush.msra.mxu0 %v421_v7  ;;  %1348 = vmatpush.msrb.mxu1 %v411_v14  ;;  %v413_v17 = vld [vmem:[#allocation13 + $0xb8] sm:$0xff]  ;;  %v1309_v14 = vperm.slane %v4216_v18, 2 }
 0x726   :  { %v1245_v23 = vadd.f32 %v4177_v15, %v1240_v22  ;;  %3156 = vmatmul.msk.f32.vlgmr.msra.gmra.mxu3 %vm655_vm1, %v1158_v19  ;;  %v406_v19 = vld [vmem:[#allocation13 + $0x80] sm:$0xff]  ;;  %v407_v22 = vld [vmem:[#allocation13 + $0x88] sm:$0xff] }
 0x727   :  { %1393 = vmatpush.msra.mxu0 %v417_v12  ;;  %1371 = vmatpush.msrb.mxu3 %v412_v16  ;;  %v501_v12 = vld [vmem:[#allocation14 + $0x170] sm:$0xff] }
 0x728   :  { %v1247_v24 = vadd.f32 %v1245_v23, %v4055_v33  ;;  %v1255_v33 = vsub.f32 1.0, %v1254_v30  ;;  %v408_v23 = vld [vmem:[#allocation13 + $0x90] sm:$0xff]  ;;  %1326 = vmatpush.msrb.mxu2 %v406_v19  ;;  %1349 = vmatpush.msrb.mxu1 %v407_v22  ;;  %v399_v30 = vld [vmem:[#allocation13 + $0x48] sm:$0xff] }
 0x729   :  { %1394 = vmatpush.msra.mxu0 %v413_v17  ;;  %1372 = vmatpush.msrb.mxu3 %v408_v23  ;;  %v517_v16 = vld [vmem:[#allocation14 + $0x1f0] sm:$0xff]  ;;  %v468_v22 = vld [vmem:[#allocation14 + $0x68] sm:$0xff] }
 0x72a   :  { %1249 = vadd.xlane.f32.xlu1 %v1247_v24  ;;  %v1256_v38 = vmul.f32 %v3278_v27, %v1255_v33  ;;  %1327 = vmatpush.msrb.mxu2 %v402_v26  ;;  %v397_v33 = vld [vmem:[#allocation13 + $0x38] sm:$0xff]  ;;  %v484_v23 = vld [vmem:[#allocation14 + $0xe8] sm:$0xff] }
 0x72b   :  { %1373 = vmatpush.msrb.mxu3 %v404_v28 }
 0x72c   :  { %v1257_v39 = vadd.f32 %v3278_v27, %v1256_v38  ;;  %1328 = vmatpush.msrb.mxu2 %v398_v21  ;;  %v390_v38 = vld [vmem:[#allocation13] sm:$0xff] }
 0x72d   :  { %1374 = vmatpush.msrb.mxu3 %v400_v31  ;;  %v483_v21 = vld [vmem:[#allocation14 + $0xe0] sm:$0xff] }
 0x72e   :  { %v4182_v40 = vsel %vm1258_vm2, %v3278_v27, %v1257_v39  ;;  %v403_v27 = vld [vmem:[#allocation13 + $0x68] sm:$0xff]  ;;  %1329 = vmatpush.msrb.mxu2 %v394_v34 }
 0x72f   :  { %1350 = vmatpush.msrb.mxu1 %v403_v27  ;;  %v391_v39 = vld [vmem:[#allocation13 + $0x8] sm:$0xff]  ;;  %1375 = vmatpush.msrb.mxu3 %v396_v37  ;;  %v482_v37 = vld [vmem:[#allocation14 + $0xd8] sm:$0xff] }
 0x730   :  { %1330 = vmatpush.msrb.mxu2 %v390_v38  ;;  %v516_v27 = vld [vmem:[#allocation14 + $0x1e8] sm:$0xff] }
 0x731   :  { %1351 = vmatpush.msrb.mxu1 %v399_v30  ;;  %v499_v30 = vld [vmem:[#allocation14 + $0x160] sm:$0xff] }
 0x732   :  { %1570 = vmatpush.msra.mxu2 %v470_v43 }
 0x733   :  { %1352 = vmatpush.msrb.mxu1 %v395_v35  ;;  %v466_v35 = vld [vmem:[#allocation14 + $0x58] sm:$0xff] }
 0x734   :  { %1571 = vmatpush.msra.mxu2 %v469_v9  ;;  %v475_v9 = vld [vmem:[#allocation14 + $0xa0] sm:$0xff] }
 0x735   :  { %1353 = vmatpush.msrb.mxu1 %v391_v39  ;;  %v514_v39 = vld [vmem:[#allocation14 + $0x1d8] sm:$0xff] }
 0x736   :  { %1572 = vmatpush.msra.mxu2 %v468_v22  ;;  %v458_v22 = vld [vmem:[#allocation14 + $0x18] sm:$0xff] }
 0x737   :  { %1593 = vmatpush.msra.mxu1 %v486_v4  ;;  %v476_v4 = vld [vmem:[#allocation14 + $0xa8] sm:$0xff] }
 0x739   :  { %1594 = vmatpush.msra.mxu1 %v485_v11 }
 0x73b   :  { %1595 = vmatpush.msra.mxu1 %v484_v23  ;;  %v474_v23 = vld [vmem:[#allocation14 + $0x98] sm:$0xff] }
 0x73d   :  { %1596 = vmatpush.msra.mxu1 %v483_v21 }
 0x73f   :  { %1597 = vmatpush.msra.mxu1 %v482_v37  ;;  %v489_v37 = vld [vmem:[#allocation14 + $0x110] sm:$0xff] }
 0x79d   :  { %v1250_v41 = vpop.xlane.xlu1 %1249 }
 0x79e   :  { %v1260_v44 = vmul.f32 %v4182_v40, %v1250_v41  ;;  %v392_v41 = vld [vmem:[#allocation13 + $0x10] sm:$0xff] }
 0x79f   :  { %1376 = vmatpush.msrb.mxu3 %v392_v41 }
 0x7a0   :  { %v4185_v45 = vsub.f32 %v1247_v24, %v1260_v44  ;;  %v409_v24 = vld [vmem:[#allocation13 + $0x98] sm:$0xff] }
 0x7a1   :  { %1395 = vmatpush.msra.mxu0 %v409_v24  ;;  %v393_v44 = vld [vmem:[#allocation13 + $0x18] sm:$0xff]  ;;  %1616 = vmatpush.msra.mxu3 %v502_v5  ;;  %v500_v24 = vld [vmem:[#allocation14 + $0x168] sm:$0xff] }
 0x7a2   :  { %v1264_v48 = vmul.f32 %v4185_v45, %v4185_v45  ;;  %v492_v5 = vld [vmem:[#allocation14 + $0x128] sm:$0xff] }
 0x7a3   :  { %1396 = vmatpush.msra.mxu0 %v405_v29  ;;  %1617 = vmatpush.msra.mxu3 %v501_v12  ;;  %v467_v29 = vld [vmem:[#allocation14 + $0x60] sm:$0xff] }
 0x7a4   :  { %1266 = vadd.xlane.f32.xlu0 %v1264_v48  ;;  %1573 = vmatpush.msra.mxu2 %v467_v29  ;;  %v506_v29 = vld [vmem:[#allocation14 + $0x198] sm:$0xff] }
 0x7a5   :  { %1397 = vmatpush.msra.mxu0 %v401_v32  ;;  %1618 = vmatpush.msra.mxu3 %v500_v24  ;;  %v515_v32 = vld [vmem:[#allocation14 + $0x1e0] sm:$0xff] }
 0x7a6   :  { %1574 = vmatpush.msra.mxu2 %v466_v35 }
 0x7a7   :  { %1398 = vmatpush.msra.mxu0 %v397_v33  ;;  %1619 = vmatpush.msra.mxu3 %v499_v30  ;;  %v498_v33 = vld [vmem:[#allocation14 + $0x158] sm:$0xff] }
 0x7a9   :  { %v1208_v49 = vpop.f32.mrf.mxu3  ;;  %1399 = vmatpush.msra.mxu0 %v393_v44  ;;  %1620 = vmatpush.msra.mxu3 %v498_v33  ;;  %v465_v44 = vld [vmem:[#allocation14 + $0x50] sm:$0xff] }
 0x7aa   :  { %3158 = vmatmul.msk.f32.gmra.mxu0 %vm600_vm0, %v1208_v49  ;;  %1575 = vmatpush.msra.mxu2 %v465_v44  ;;  %v505_v33 = vld [vmem:[#allocation14 + $0x190] sm:$0xff]  ;;  %v488_v44 = vld [vmem:[#allocation14 + $0x108] sm:$0xff] }
 0x7ab   :  { %1639 = vmatpush.msrb.mxu0 %v518_v6 }
 0x7ac   :  { %1576 = vmatpush.msra.mxu2 %v464_v52  ;;  %v503_v52 = vld [vmem:[#allocation14 + $0x180] sm:$0xff] }
 0x7ad   :  { %1640 = vmatpush.msrb.mxu0 %v517_v16  ;;  %v507_v16 = vld [vmem:[#allocation14 + $0x1a0] sm:$0xff] }
 0x7af   :  { %1641 = vmatpush.msrb.mxu0 %v516_v27  ;;  %v490_v27 = vld [vmem:[#allocation14 + $0x118] sm:$0xff] }
 0x7b1   :  { %1642 = vmatpush.msrb.mxu0 %v515_v32  ;;  %v457_v32 = vld [vmem:[#allocation14 + $0x10] sm:$0xff] }
 0x7b3   :  { %1643 = vmatpush.msrb.mxu0 %v514_v39  ;;  %v472_v39 = vld [vmem:[#allocation14 + $0x88] sm:$0xff] }
 0x817   :  { %v1267_v48 = vpop.xlane.xlu0 %1266 }
 0x818   :  { %v1270_v49 = vmul.f32 %v1267_v48, %v4182_v40  ;;  %v481_v48 = vld [vmem:[#allocation14 + $0xd0] sm:$0xff] }
 0x819   :  { %1598 = vmatpush.msra.mxu1 %v481_v48  ;;  %v504_v48 = vld [vmem:[#allocation14 + $0x188] sm:$0xff] }
 0x81a   :  { %v1272_v50 = vadd.f32 1e-05, %v1270_v49  ;;  %v497_v49 = vld [vmem:[#allocation14 + $0x150] sm:$0xff] }
 0x81b   :  { %1621 = vmatpush.msra.mxu3 %v497_v49  ;;  %v455_v49 = vld [vmem:[#allocation14] sm:$0xff] }
 0x81c   :  { %3279 = vrsqrt.f32 %v1272_v50  ;;  %vm1280_vm4 = vweird.f32 %v1272_v50 }
 0x81d   :  { %1622 = vmatpush.msra.mxu3 %v496_v53 }
 0x822   :  { %v3280_v51 = vpop.eup %3279 }
 0x823   :  { %v1275_v20 = vmul.f32 %v3280_v51, %v1272_v50  ;;  %vm1281_vm3 = vweird.f32 %v3280_v51 }
 0x824   :  { %vm1282_vm5 = vmor %vm1280_vm4, %vm1281_vm3 }
 0x825   :  { %v1276_v54 = vmul.f32 %v3280_v51, %v1275_v20  ;;  %v480_v20 = vld [vmem:[#allocation14 + $0xc8] sm:$0xff] }
 0x826   :  { %1599 = vmatpush.msra.mxu1 %v480_v20 }
 0x827   :  { %v1277_v56 = vmul.f32 0.5, %v1276_v54  ;;  %v1237_v57 = vpop.f32.mrf.mxu0  ;;  %v512_v54 = vld [vmem:[#allocation14 + $0x1c8] sm:$0xff] }
 0x828   :  { %v1241_v58 = vadd.f32 %v1237_v57, %v1078_v55  ;;  %v463_v55 = vld [vmem:[#allocation14 + $0x40] sm:$0xff] }
 0x829   :  { %v1278_v59 = vsub.f32 1.5, %v1277_v56  ;;  %v479_v56 = vld [vmem:[#allocation14 + $0xc0] sm:$0xff]  ;;  %1577 = vmatpush.msra.mxu2 %v463_v55 }
 0x82a   :  { %v1246_v60 = vadd.f32 %v4177_v15, %v1241_v58  ;;  %v495_v57 = vld [vmem:[#allocation14 + $0x140] sm:$0xff]  ;;  %1600 = vmatpush.msra.mxu1 %v479_v56 }
 0x82b   :  { %v1279_v42 = vmul.f32 %v3280_v51, %v1278_v59  ;;  %v511_v58 = vld [vmem:[#allocation14 + $0x1c0] sm:$0xff]  ;;  %1623 = vmatpush.msra.mxu3 %v495_v57  ;;  %v462_v59 = vld [vmem:[#allocation14 + $0x38] sm:$0xff] }
 0x82c   :  { %v1248_v62 = vadd.f32 %v1246_v60, %v4059_v36  ;;  %v478_v60 = vld [vmem:[#allocation14 + $0xb8] sm:$0xff]  ;;  %1578 = vmatpush.msra.mxu2 %v462_v59 }
 0x82d   :  { %v1283_v63 = vsel %vm1282_vm5, %v3280_v51, %v1279_v42  ;;  %v513_v51 = vld [vmem:[#allocation14 + $0x1d0] sm:$0xff]  ;;  %v494_v42 = vld [vmem:[#allocation14 + $0x138] sm:$0xff]  ;;  %1601 = vmatpush.msra.mxu1 %v478_v60 }
 0x82e   :  { %v1294_v0 = vmul.f32 %v1283_v63, %v4185_v45  ;;  %1251 = vadd.xlane.f32.xlu0 %v1248_v62  ;;  %1644 = vmatpush.msrb.mxu0 %v513_v51  ;;  %v461_v63 = vld [vmem:[#allocation14 + $0x30] sm:$0xff]  ;;  %v487_v51 = vld [vmem:[#allocation14 + $0x100] sm:$0xff] }
 0x82f   :  { %1624 = vmatpush.msra.mxu3 %v494_v42  ;;  %1579 = vmatpush.msra.mxu2 %v461_v63 }
 0x830   :  { %v1299_v10 = vmul.f32 %v4194_v61, %v1294_v0  ;;  %1645 = vmatpush.msrb.mxu0 %v512_v54  ;;  %v477_v0 = vld [vmem:[#allocation14 + $0xb0] sm:$0xff] }
 0x831   :  { %1602 = vmatpush.msra.mxu1 %v477_v0 }
 0x832   :  { %v4202_v1 = vadd.f32 %v4198_v25, %v1299_v10  ;;  %1646 = vmatpush.msrb.mxu0 %v511_v58 }
 0x833   :  { %1603 = vmatpush.msra.mxu1 %v476_v4 }
 0x834   :  { %1331 = vmatmul.f32.vlgmr.msrb.gmra.mxu2 %v4202_v1  ;;  %1354 = vmatmul.f32.vlgmr.msrb.gmra.mxu1 %v4202_v1 }
 0x835   :  { %1377 = vmatmul.f32.vlgmr.msrb.gmra.mxu3 %v4202_v1  ;;  %1400 = vmatmul.f32.vlgmr.msra.gmra.mxu0 %v4202_v1 }
 0x836   :  { %1604 = vmatpush.msra.mxu1 %v475_v9 }
 0x838   :  { %1605 = vmatpush.msra.mxu1 %v474_v23 }
 0x8a1   :  { %v1252_v36 = vpop.xlane.xlu0 %1251 }
 0x8a2   :  { %v1261_v15 = vmul.f32 %v4182_v40, %v1252_v36  ;;  %v493_v36 = vld [vmem:[#allocation14 + $0x130] sm:$0xff] }
 0x8a3   :  { %1625 = vmatpush.msra.mxu3 %v493_v36 }
 0x8a4   :  { %v4209_v45 = vsub.f32 %v1248_v62, %v1261_v15  ;;  %v510_v62 = vld [vmem:[#allocation14 + $0x1b8] sm:$0xff]  ;;  %v509_v15 = vld [vmem:[#allocation14 + $0x1b0] sm:$0xff] }
 0x8a5   :  { %1647 = vmatpush.msrb.mxu0 %v510_v62  ;;  %1626 = vmatpush.msra.mxu3 %v492_v5 }
 0x8a6   :  { %v1265_v2 = vmul.f32 %v4209_v45, %v4209_v45 }
 0x8a7   :  { %1648 = vmatpush.msrb.mxu0 %v509_v15 }
 0x8a8   :  { %1268 = vadd.xlane.f32.xlu2 %v1265_v2  ;;  %v460_v2 = vld [vmem:[#allocation14 + $0x28] sm:$0xff] }
 0x8a9   :  { %1580 = vmatpush.msra.mxu2 %v460_v2 }
 0x8b1   :  { %v1355_v46 = vpop.f32.mrf.mxu1 }
 0x8b2   :  { %v1401_v7 = vpop.f32.mrf.mxu0  ;;  %v4224_v17 = vadd.f32 %v1355_v46, %v1308_v3  ;;  %v508_v46 = vld [vmem:[#allocation14 + $0x1a8] sm:$0xff] }
 0x8b3   :  { %v4228_v26 = vadd.f32 %v1401_v7, %v1310_v47  ;;  %v459_v7 = vld [vmem:[#allocation14 + $0x20] sm:$0xff]  ;;  %1649 = vmatpush.msrb.mxu0 %v508_v46 }
 0x8b4   :  { %v3160_v34 = vmul.f32 -1.442695, %v4224_v17  ;;  %1581 = vmatpush.msra.mxu2 %v459_v7 }
 0x8b5   :  { %v3162_v38 = vmul.f32 -1.442695, %v4228_v26  ;;  %1650 = vmatpush.msrb.mxu0 %v507_v16 }
 0x8b6   :  { %3281 = vpow2.f32 %v3160_v34  ;;  %v473_v34 = vld [vmem:[#allocation14 + $0x90] sm:$0xff]  ;;  %1582 = vmatpush.msra.mxu2 %v458_v22 }
 0x8b7   :  { %v1332_v13 = vpop.f32.mrf.mxu2  ;;  %3283 = vpow2.f32 %v3162_v38  ;;  %1651 = vmatpush.msrb.mxu0 %v506_v29  ;;  %v456_v38 = vld [vmem:[#allocation14 + $0x8] sm:$0xff]  ;;  %1606 = vmatpush.msra.mxu1 %v473_v34 }
 0x8b8   :  { %v1378_v19 = vpop.f32.mrf.mxu3  ;;  %v4232_v28 = vadd.f32 %v1332_v13, %v1307_v8  ;;  %v491_v13 = vld [vmem:[#allocation14 + $0x120] sm:$0xff]  ;;  %1583 = vmatpush.msra.mxu2 %v457_v32 }
 0x8b9   :  { %v4236_v31 = vadd.f32 %v1378_v19, %v1309_v14  ;;  %1627 = vmatpush.msra.mxu3 %v491_v13  ;;  %1652 = vmatpush.msrb.mxu0 %v505_v33 }
 0x8ba   :  { %v3159_v41 = vmul.f32 -1.442695, %v4232_v28  ;;  %1584 = vmatpush.msra.mxu2 %v456_v38  ;;  %1607 = vmatpush.msra.mxu1 %v472_v39 }
 0x8bb   :  { %v3161_v50 = vmul.f32 -1.442695, %v4236_v31  ;;  %1628 = vmatpush.msra.mxu3 %v490_v27  ;;  %1653 = vmatpush.msrb.mxu0 %v504_v48 }
 0x8bc   :  { %3285 = vpow2.f32 %v3159_v41  ;;  %v3282_v10 = vpop.eup %3281  ;;  %1585 = vmatpush.msra.mxu2 %v455_v49 }
 0x8bd   :  { %3287 = vpow2.f32 %v3161_v50  ;;  %v3284_v43 = vpop.eup %3283  ;;  %v4242_v12 = vadd.f32 1.0, %v3282_v10  ;;  %1629 = vmatpush.msra.mxu3 %v489_v37  ;;  %v471_v50 = vld [vmem:[#allocation14 + $0x80] sm:$0xff]  ;;  %1654 = vmatpush.msrb.mxu0 %v503_v52 }
 0x8be   :  { %v4244_v19 = vadd.f32 1.0, %v3284_v43  ;;  %1608 = vmatpush.msra.mxu1 %v471_v50 }
 0x8bf   :  { %3289 = vrcp.f32 %v4242_v12  ;;  %1630 = vmatpush.msra.mxu3 %v488_v44  ;;  %vm1459_vm9 = vweird.f32 %v4242_v12  ;;  %v1463_v9 = vand.u32 2147483647, %v4242_v12  ;;  %v1465_v13 = vand.u32 2147483648, %v4242_v12 }
 0x8c0   :  { %3291 = vrcp.f32 %v4244_v19  ;;  %vm1489_vm11 = vweird.f32 %v4244_v19  ;;  %v1495_v16 = vand.u32 2147483648, %v4244_v19  ;;  %v1493_v37 = vand.u32 2147483647, %v4244_v19 }
 0x8c1   :  { %1631 = vmatpush.msra.mxu3 %v487_v51 }
 0x8c2   :  { %v3286_v6 = vpop.eup %3285  ;;  %v1496_v48 = vor.u32 1.1754944e-38, %v1495_v16 }
 0x8c3   :  { %v3288_v11 = vpop.eup %3287  ;;  %v4246_v24 = vadd.f32 1.0, %v3286_v6 }
 0x8c4   :  { %v4248_v21 = vadd.f32 1.0, %v3288_v11 }
 0x8c5   :  { %3293 = vrcp.f32 %v4246_v24  ;;  %v4255_v20 = vpop.eup %3289  ;;  %vm1444_vm3 = vweird.f32 %v4246_v24 }
 0x8c6   :  { %3295 = vrcp.f32 %v4248_v21  ;;  %v4257_v53 = vpop.eup %3291  ;;  %v1455_v58 = vmul.f32 %v4255_v20, %v4242_v12  ;;  %vm1460_vm10 = vweird.f32 %v4255_v20  ;;  %v1450_v12 = vand.u32 2147483648, %v4246_v24 }
 0x8c7   :  { %v1485_v60 = vmul.f32 %v4257_v53, %v4244_v19  ;;  %vm1490_vm12 = vweird.f32 %v4257_v53  ;;  %vm4287_vm14 = vmor %vm1459_vm9, %vm1460_vm10  ;;  %v1480_v34 = vand.u32 2147483648, %v4248_v21  ;;  %vm1474_vm5 = vweird.f32 %v4248_v21 }
 0x8c8   :  { %v1456_v0 = vsub.f32 1.0, %v1455_v58  ;;  %vm4295_vm2 = vmor %vm1489_vm11, %vm1490_vm12  ;;  %v1478_v38 = vand.u32 2147483647, %v4248_v21  ;;  %v1466_v19 = vor.u32 1.1754944e-38, %v1465_v13  ;;  %vm1494_vm9 = vcmp.eq.f32.partialorder %v1493_v37, 8.507059e+37 }
 0x8c9   :  { %v1486_v36 = vsub.f32 1.0, %v1485_v60  ;;  %v1481_v49 = vor.u32 1.1754944e-38, %v1480_v34 }
 0x8ca   :  { %v1457_v4 = vmul.f32 %v4255_v20, %v1456_v0  ;;  %vm1479_vm10 = vcmp.eq.f32.partialorder %v1478_v38, 8.507059e+37  ;;  %v4356_v0 = vld [vmem:[#allocation16] ss:$0 sm:$0xff] }
 0x8cb   :  { %v4259_v54 = vpop.eup %3293  ;;  %v1487_v46 = vmul.f32 %v4257_v53, %v1486_v36 }
 0x8cc   :  { %v4261_v55 = vpop.eup %3295  ;;  %v1440_v59 = vmul.f32 %v4259_v54, %v4246_v24  ;;  %v1458_v22 = vadd.f32 %v4255_v20, %v1457_v4  ;;  %vm1445_vm13 = vweird.f32 %v4259_v54 }
 0x8cd   :  { %v1470_v42 = vmul.f32 %v4261_v55, %v4248_v21  ;;  %vm1475_vm15 = vweird.f32 %v4261_v55  ;;  %vm4306_vm4 = vmor %vm1444_vm3, %vm1445_vm13 }
 0x8ce   :  { %v1441_v10 = vsub.f32 1.0, %v1440_v59  ;;  %v1462_v39 = vsel %vm4287_vm14, %v4255_v20, %v1458_v22 }
 0x8cf   :  { %v1471_v15 = vsub.f32 1.0, %v1470_v42 }
 0x8d0   :  { %v1442_v5 = vmul.f32 %v4259_v54, %v1441_v10 }
 0x8d1   :  { %v1472_v6 = vmul.f32 %v4261_v55, %v1471_v15 }
 0x8d2   :  { %v1443_v23 = vadd.f32 %v4259_v54, %v1442_v5 }
 0x91b   :  { %v1269_v30 = vpop.xlane.xlu2 %1268 }
 0x91c   :  { %v1271_v35 = vmul.f32 %v1269_v30, %v4182_v40  ;;  %v1473_v30 = vadd.f32 %v4261_v55, %v1472_v6 }
 0x91e   :  { %v1273_v41 = vadd.f32 1e-05, %v1271_v35 }
 0x920   :  { %3297 = vrsqrt.f32 %v1273_v41  ;;  %vm1290_vm7 = vweird.f32 %v1273_v41 }
 0x926   :  { %v3298_v56 = vpop.eup %3297 }
 0x927   :  { %v1285_v57 = vmul.f32 %v3298_v56, %v1273_v41  ;;  %vm1291_vm6 = vweird.f32 %v3298_v56  ;;  %v1451_v41 = vor.u32 1.1754944e-38, %v1450_v12 }
 0x928   :  { %vm1292_vm8 = vmor %vm1290_vm7, %vm1291_vm6  ;;  %vm1464_vm7 = vcmp.eq.f32.partialorder %v1463_v9, 8.507059e+37 }
 0x929   :  { %v1286_v62 = vmul.f32 %v3298_v56, %v1285_v57  ;;  %vm4318_vm6 = vmor %vm1474_vm5, %vm1475_vm15  ;;  %v1467_v50 = vsel %vm1464_vm7, %v1466_v19, %v1462_v39 }
 0x92a   :  { %v1477_v44 = vsel %vm4318_vm6, %v4261_v55, %v1473_v30 }
 0x92b   :  { %v1287_v63 = vmul.f32 0.5, %v1286_v62  ;;  %v1482_v20 = vsel %vm1479_vm10, %v1481_v49, %v1477_v44 }
 0x92d   :  { %v1288_v2 = vsub.f32 1.5, %v1287_v63 }
 0x92f   :  { %v1289_v43 = vmul.f32 %v3298_v56, %v1288_v2 }
 0x931   :  { %v1293_v7 = vsel %vm1292_vm8, %v3298_v56, %v1289_v43  ;;  %v1561_v56 = vmul.f32 %v1482_v20, %v4236_v31 }
 0x932   :  { %v1295_v11 = vmul.f32 %v1293_v7, %v4209_v45  ;;  %v1488_v45 = vadd.f32 %v4257_v53, %v1487_v46 }
 0x934   :  { %v1300_v27 = vmul.f32 %v4194_v61, %v1295_v11  ;;  %v1448_v61 = vand.u32 2147483647, %v4246_v24  ;;  %v1447_v24 = vsel %vm4306_vm4, %v4259_v54, %v1443_v23  ;;  %v1492_v21 = vsel %vm4295_vm2, %v4257_v53, %v1488_v45 }
 0x935   :  { %v1497_v52 = vsel %vm1494_vm9, %v1496_v48, %v1492_v21  ;;  %v1560_v53 = vmul.f32 %v1467_v50, %v4224_v17 }
 0x936   :  { %v4303_v35 = vadd.f32 %v4198_v25, %v1300_v27  ;;  %vm1449_vm8 = vcmp.eq.f32.partialorder %v1448_v61, 8.507059e+37  ;;  %v1562_v55 = vmul.f32 %v1497_v52, %v4228_v26 }
 0x937   :  { %v1452_v51 = vsel %vm1449_vm8, %v1451_v41, %v1447_v24 }
 0x938   :  { %1334 = vmatmul.f32.gmra.mxu2 %v4303_v35  ;;  %1357 = vmatmul.f32.gmra.mxu1 %v4303_v35  ;;  %v1559_v54 = vmul.f32 %v1452_v51, %v4232_v28 }
 0x939   :  { %1380 = vmatmul.f32.gmra.mxu3 %v4303_v35  ;;  %1403 = vmatmul.f32.gmra.mxu0 %v4303_v35 }
 0x940   :  { %1586 = vmatmul.f32.vlgmr.msra.gmra.mxu2 %v1559_v54  ;;  %1609 = vmatmul.f32.vlgmr.msra.gmra.mxu1 %v1560_v53 }
 0x941   :  { %1632 = vmatmul.f32.vlgmr.msra.gmra.mxu3 %v1561_v56  ;;  %1655 = vmatmul.f32.vlgmr.msrb.gmra.mxu0 %v1562_v55 }
 0x9b5   :  { %v1358_v57 = vpop.f32.mrf.mxu1 }
 0x9b6   :  { %v4338_v58 = vadd.f32 %v1358_v57, %v1308_v3  ;;  %v1404_v59 = vpop.f32.mrf.mxu0 }
 0x9b7   :  { %v4342_v60 = vadd.f32 %v1404_v59, %v1310_v47 }
 0x9b8   :  { %v3164_v17 = vmul.f32 -1.442695, %v4338_v58 }
 0x9b9   :  { %v3166_v26 = vmul.f32 -1.442695, %v4342_v60 }
 0x9ba   :  { %3299 = vpow2.f32 %v3164_v17 }
 0x9bb   :  { %3301 = vpow2.f32 %v3166_v26  ;;  %v1335_v28 = vpop.f32.mrf.mxu2 }
 0x9bc   :  { %v4348_v31 = vadd.f32 %v1335_v28, %v1307_v8  ;;  %v1381_v42 = vpop.f32.mrf.mxu3 }
 0x9bd   :  { %v4352_v3 = vadd.f32 %v1381_v42, %v1309_v14  ;;  %v1610_v18 = vpop.f32.mrf.mxu1 }
 0x9be   :  { %v3163_v62 = vmul.f32 -1.442695, %v4348_v31  ;;  %v1656_v11 = vpop.f32.mrf.mxu0 }
 0x9bf   :  { %v3165_v47 = vmul.f32 -1.442695, %v4352_v3 }
 0x9c0   :  { %v3300_v63 = vpop.eup %3299  ;;  %3303 = vpow2.f32 %v3163_v62 }
 0x9c1   :  { %v3302_v10 = vpop.eup %3301  ;;  %v1436_v36 = vadd.f32 1.0, %v3300_v63  ;;  %3305 = vpow2.f32 %v3165_v47 }
 0x9c2   :  { %v1438_v15 = vadd.f32 1.0, %v3302_v10 }
 0x9c3   :  { %3307 = vrcp.f32 %v1436_v36  ;;  %v1587_v8 = vpop.f32.mrf.mxu2  ;;  %v1523_v45 = vand.u32 2147483647, %v1436_v36  ;;  %v1525_v12 = vand.u32 2147483648, %v1436_v36  ;;  %vm1519_vm12 = vweird.f32 %v1436_v36 }
 0x9c4   :  { %3309 = vrcp.f32 %v1438_v15  ;;  %v1588_v2 = vadd.f32 %v4356_v0, %v1587_v8  ;;  %v1633_v46 = vpop.f32.mrf.mxu3  ;;  %v1553_v32 = vand.u32 2147483647, %v1438_v15  ;;  %v1555_v61 = vand.u32 2147483648, %v1438_v15 }
 0x9c5   :  { %vm1549_vm13 = vweird.f32 %v1438_v15  ;;  %vm1524_vm15 = vcmp.eq.f32.partialorder %v1523_v45, 8.507059e+37  ;;  %v1750_v45 = vld [vmem:[#allocation22 + $0x120] sm:$0xff] }
 0x9c6   :  { %v3304_v14 = vpop.eup %3303  ;;  %v1611_v43 = vadd.f32 %v1610_v18, %v1588_v2  ;;  %vm1554_vm3 = vcmp.eq.f32.partialorder %v1553_v32, 8.507059e+37  ;;  %v1556_v19 = vor.u32 1.1754944e-38, %v1555_v61  ;;  %v1759_v18 = vld [vmem:[#allocation22 + $0x168] sm:$0xff]  ;;  %v1748_v32 = vld [vmem:[#allocation22 + $0x110] sm:$0xff]  ;;  %v1749_v61 = vld [vmem:[#allocation22 + $0x118] sm:$0xff] }
 0x9c7   :  { %v3306_v4 = vpop.eup %3305  ;;  %v4359_v5 = vadd.f32 1.0, %v3304_v14  ;;  %v1760_v14 = vld [vmem:[#allocation22 + $0x170] sm:$0xff]  ;;  %1921 = vmatpush.msrb.mxu2 %v1759_v18 }
 0x9c8   :  { %v4361_v6 = vadd.f32 1.0, %v3306_v4  ;;  %v1634_v7 = vadd.f32 %v1633_v46, %v1611_v43  ;;  %v1761_v43 = vld [vmem:[#allocation22 + $0x178] sm:$0xff]  ;;  %1944 = vmatpush.msrb.mxu1 %v1760_v14 }
 0x9c9   :  { %v3308_v9 = vpop.eup %3307  ;;  %3311 = vrcp.f32 %v4359_v5  ;;  %v1508_v48 = vand.u32 2147483647, %v4359_v5  ;;  %v1510_v49 = vand.u32 2147483648, %v4359_v5  ;;  %vm1504_vm7 = vweird.f32 %v4359_v5  ;;  %v1757_v4 = vld [vmem:[#allocation22 + $0x158] sm:$0xff]  ;;  %1967 = vmatpush.msrb.mxu3 %v1761_v43 }
 0x9ca   :  { %v3310_v13 = vpop.eup %3309  ;;  %3313 = vrcp.f32 %v4361_v6  ;;  %v1657_v16 = vadd.f32 %v1656_v11, %v1634_v7  ;;  %v1515_v22 = vmul.f32 %v3308_v9, %v1436_v36  ;;  %vm1520_vm11 = vweird.f32 %v3308_v9  ;;  %1945 = vmatpush.msrb.mxu1 %v1757_v4  ;;  %v3237_v4 = vld [vmem:[#allocation20] ss:$0 sm:$0xff] }
 0x9cb   :  { %v1545_v23 = vmul.f32 %v3310_v13, %v1438_v15  ;;  %vm1550_vm14 = vweird.f32 %v3310_v13  ;;  %vm1521_vm2 = vmor %vm1519_vm12, %vm1520_vm11  ;;  %v1540_v20 = vand.u32 2147483648, %v4361_v6  ;;  %v1538_v59 = vand.u32 2147483647, %v4361_v6 }
 0x9cc   :  { %v4366_v27 = vadd.f32 %v1657_v16, %v4202_v1  ;;  %v1516_v29 = vsub.f32 1.0, %v1515_v22  ;;  %v1526_v1 = vor.u32 1.1754944e-38, %v1525_v12  ;;  %vm1551_vm4 = vmor %vm1549_vm13, %vm1550_vm14  ;;  %v1511_v26 = vor.u32 1.1754944e-38, %v1510_v49  ;;  %v1751_v12 = vld [vmem:[#allocation22 + $0x128] sm:$0xff]  ;;  %v1734_v49 = vld [vmem:[#allocation22 + $0xa0] sm:$0xff] }
 0x9cd   :  { %v1546_v30 = vsub.f32 1.0, %v1545_v23  ;;  %vm1534_vm9 = vweird.f32 %v4361_v6  ;;  %vm1509_vm10 = vcmp.eq.f32.partialorder %v1508_v48, 8.507059e+37  ;;  %v1541_v42 = vor.u32 1.1754944e-38, %v1540_v20  ;;  %v1753_v23 = vld [vmem:[#allocation22 + $0x138] sm:$0xff]  ;;  %v1726_v20 = vld [vmem:[#allocation22 + $0x60] sm:$0xff] }
 0x9ce   :  { %1664 = vadd.xlane.f32.xlu0 %v4366_v27  ;;  %v1517_v34 = vmul.f32 %v3308_v9, %v1516_v29  ;;  %vm1539_vm12 = vcmp.eq.f32.partialorder %v1538_v59, 8.507059e+37  ;;  %v1755_v29 = vld [vmem:[#allocation22 + $0x148] sm:$0xff]  ;;  %v1733_v48 = vld [vmem:[#allocation22 + $0x98] sm:$0xff]  ;;  %v1720_v59 = vld [vmem:[#allocation22 + $0x30] sm:$0xff] }
 0x9cf   :  { %v3312_v37 = vpop.eup %3311  ;;  %v1547_v33 = vmul.f32 %v3310_v13, %v1546_v30  ;;  %v1747_v30 = vld [vmem:[#allocation22 + $0x108] sm:$0xff] }
 0x9d0   :  { %v3314_v38 = vpop.eup %3313  ;;  %v1518_v39 = vadd.f32 %v3308_v9, %v1517_v34  ;;  %v1500_v24 = vmul.f32 %v3312_v37, %v4359_v5  ;;  %vm1505_vm5 = vweird.f32 %v3312_v37  ;;  %v1745_v34 = vld [vmem:[#allocation22 + $0xf8] sm:$0xff] }
 0x9d1   :  { %v1548_v25 = vadd.f32 %v3310_v13, %v1547_v33  ;;  %v1530_v21 = vmul.f32 %v3314_v38, %v4361_v6  ;;  %vm1535_vm6 = vweird.f32 %v3314_v38  ;;  %vm1506_vm8 = vmor %vm1504_vm7, %vm1505_vm5  ;;  %v1741_v33 = vld [vmem:[#allocation22 + $0xd8] sm:$0xff] }
 0x9d2   :  { %v1522_v41 = vsel %vm1521_vm2, %v3308_v9, %v1518_v39  ;;  %v1501_v44 = vsub.f32 1.0, %v1500_v24  ;;  %vm1536_vm11 = vmor %vm1534_vm9, %vm1535_vm6  ;;  %v1743_v39 = vld [vmem:[#allocation22 + $0xe8] sm:$0xff] }
 0x9d3   :  { %v1527_v50 = vsel %vm1524_vm15, %v1526_v1, %v1522_v41  ;;  %v1552_v51 = vsel %vm1551_vm4, %v3310_v13, %v1548_v25  ;;  %v1531_v52 = vsub.f32 1.0, %v1530_v21  ;;  %v1738_v1 = vld [vmem:[#allocation22 + $0xc0] sm:$0xff]  ;;  %v1739_v24 = vld [vmem:[#allocation22 + $0xc8] sm:$0xff]  ;;  %v1740_v25 = vld [vmem:[#allocation22 + $0xd0] sm:$0xff] }
 0x9d4   :  { %v1564_v53 = vmul.f32 %v1527_v50, %v4338_v58  ;;  %v1557_v54 = vsel %vm1554_vm3, %v1556_v19, %v1552_v51  ;;  %v1502_v55 = vmul.f32 %v3312_v37, %v1501_v44  ;;  %v1735_v19 = vld [vmem:[#allocation22 + $0xa8] sm:$0xff]  ;;  %v1736_v21 = vld [vmem:[#allocation22 + $0xb0] sm:$0xff]  ;;  %v1737_v41 = vld [vmem:[#allocation22 + $0xb8] sm:$0xff] }
 0x9d5   :  { %v1566_v56 = vmul.f32 %v1557_v54, %v4342_v60  ;;  %v1532_v57 = vmul.f32 %v3314_v38, %v1531_v52  ;;  %v1732_v44 = vld [vmem:[#allocation22 + $0x90] sm:$0xff]  ;;  %v1729_v50 = vld [vmem:[#allocation22 + $0x78] sm:$0xff]  ;;  %v1730_v51 = vld [vmem:[#allocation22 + $0x80] sm:$0xff] }
 0x9d6   :  { %1612 = vmatmul.f32.gmra.mxu1 %v1564_v53  ;;  %v1503_v17 = vadd.f32 %v3312_v37, %v1502_v55  ;;  %v1731_v52 = vld [vmem:[#allocation22 + $0x88] sm:$0xff]  ;;  %v1728_v54 = vld [vmem:[#allocation22 + $0x70] sm:$0xff] }
 0x9d7   :  { %1658 = vmatmul.f32.gmra.mxu0 %v1566_v56  ;;  %v1533_v28 = vadd.f32 %v3314_v38, %v1532_v57  ;;  %v1727_v53 = vld [vmem:[#allocation22 + $0x68] sm:$0xff]  ;;  %v1724_v56 = vld [vmem:[#allocation22 + $0x50] sm:$0xff]  ;;  %v1725_v57 = vld [vmem:[#allocation22 + $0x58] sm:$0xff] }
 0x9d8   :  { %v1507_v58 = vsel %vm1506_vm8, %v3312_v37, %v1503_v17  ;;  %v1746_v37 = vld [vmem:[#allocation22 + $0x100] sm:$0xff]  ;;  %v1723_v55 = vld [vmem:[#allocation22 + $0x48] sm:$0xff]  ;;  %v1721_v17 = vld [vmem:[#allocation22 + $0x38] sm:$0xff] }
 0x9d9   :  { %v1512_v62 = vsel %vm1509_vm10, %v1511_v26, %v1507_v58  ;;  %v1537_v60 = vsel %vm1536_vm11, %v3314_v38, %v1533_v28  ;;  %v1742_v38 = vld [vmem:[#allocation22 + $0xe0] sm:$0xff]  ;;  %v1717_v28 = vld [vmem:[#allocation22 + $0x18] sm:$0xff] }
 0x9da   :  { %v1563_v47 = vmul.f32 %v1512_v62, %v4348_v31  ;;  %v1542_v63 = vsel %vm1539_vm12, %v1541_v42, %v1537_v60  ;;  %v1756_v31 = vld [vmem:[#allocation22 + $0x150] sm:$0xff]  ;;  %v1722_v26 = vld [vmem:[#allocation22 + $0x40] sm:$0xff]  ;;  %v1719_v42 = vld [vmem:[#allocation22 + $0x28] sm:$0xff] }
 0x9db   :  { %v1565_v10 = vmul.f32 %v1542_v63, %v4352_v3  ;;  %v1758_v3 = vld [vmem:[#allocation22 + $0x160] sm:$0xff]  ;;  %1922 = vmatpush.msrb.mxu2 %v1756_v31  ;;  %v1715_v60 = vld [vmem:[#allocation22 + $0x8] sm:$0xff] }
 0x9dc   :  { %1589 = vmatmul.f32.gmra.mxu2 %v1563_v47  ;;  %1968 = vmatpush.msrb.mxu3 %v1758_v3  ;;  %v1718_v58 = vld [vmem:[#allocation22 + $0x20] sm:$0xff]  ;;  %v1716_v47 = vld [vmem:[#allocation22 + $0x10] sm:$0xff] }
 0x9dd   :  { %1635 = vmatmul.f32.gmra.mxu3 %v1565_v10  ;;  %1923 = vmatpush.msrb.mxu2 %v1753_v23  ;;  %v1714_v62 = vld [vmem:[#allocation22] sm:$0xff] }
 0x9de   :  { %1969 = vmatpush.msrb.mxu3 %v1755_v29 }
 0x9df   :  { %1924 = vmatpush.msrb.mxu2 %v1750_v45 }
 0x9e1   :  { %1925 = vmatpush.msrb.mxu2 %v1747_v30 }
 0xa41   :  { %v1665_v36 = vpop.xlane.xlu0 %1664 }
 0xa42   :  { %v1668_v15 = vmul.f32 %v1665_v36, %v4182_v40 }
 0xa44   :  { %v4383_v8 = vsub.f32 %v4366_v27, %v1668_v15  ;;  %v1754_v27 = vld [vmem:[#allocation22 + $0x140] sm:$0xff] }
 0xa45   :  { %1946 = vmatpush.msrb.mxu1 %v1754_v27 }
 0xa46   :  { %v1672_v2 = vmul.f32 %v4383_v8, %v4383_v8 }
 0xa47   :  { %1947 = vmatpush.msrb.mxu1 %v1751_v12 }
 0xa48   :  { %1674 = vadd.xlane.f32.xlu2 %v1672_v2 }
 0xa49   :  { %1948 = vmatpush.msrb.mxu1 %v1748_v32 }
 0xa4b   :  { %1949 = vmatpush.msrb.mxu1 %v1745_v34 }
 0xa4d   :  { %1950 = vmatpush.msrb.mxu1 %v1742_v38 }
 0xa4f   :  { %1951 = vmatpush.msrb.mxu1 %v1739_v24 }
 0xa51   :  { %1952 = vmatpush.msrb.mxu1 %v1736_v21 }
 0xa53   :  { %v1613_v6 = vpop.f32.mrf.mxu1  ;;  %1953 = vmatpush.msrb.mxu1 %v1733_v48 }
 0xa54   :  { %v1659_v13 = vpop.f32.mrf.mxu0 }
 0xa55   :  { %1954 = vmatpush.msrb.mxu1 %v1730_v51 }
 0xa57   :  { %1955 = vmatpush.msrb.mxu1 %v1727_v53 }
 0xa59   :  { %1956 = vmatpush.msrb.mxu1 %v1724_v56 }
 0xa5b   :  { %1957 = vmatpush.msrb.mxu1 %v1721_v17 }
 0xa5d   :  { %1958 = vmatpush.msrb.mxu1 %v1718_v58 }
 0xa5f   :  { %v1590_v5 = vpop.f32.mrf.mxu2  ;;  %1959 = vmatpush.msrb.mxu1 %v1715_v60 }
 0xa60   :  { %v1591_v46 = vadd.f32 %v4356_v0, %v1590_v5  ;;  %v1636_v9 = vpop.f32.mrf.mxu3  ;;  %v1752_v0 = vld [vmem:[#allocation22 + $0x130] sm:$0xff] }
 0xa61   :  { %1970 = vmatpush.msrb.mxu3 %v1752_v0 }
 0xa62   :  { %v1614_v7 = vadd.f32 %v1613_v6, %v1591_v46  ;;  %v3238_v46 = vld [vmem:[%s4650_s13] ss:$0 sm:$0xff] }
 0xa63   :  { %1971 = vmatpush.msrb.mxu3 %v1749_v61 }
 0xa64   :  { %v1637_v11 = vadd.f32 %v1636_v9, %v1614_v7 }
 0xa65   :  { %1972 = vmatpush.msrb.mxu3 %v1746_v37 }
 0xa66   :  { %v1660_v16 = vadd.f32 %v1659_v13, %v1637_v11 }
 0xa67   :  { %1973 = vmatpush.msrb.mxu3 %v1743_v39 }
 0xa68   :  { %v4389_v22 = vadd.f32 %v1660_v16, %v4303_v35  ;;  %v1744_v35 = vld [vmem:[#allocation22 + $0xf0] sm:$0xff] }
 0xa69   :  { %1926 = vmatpush.msrb.mxu2 %v1744_v35  ;;  %1974 = vmatpush.msrb.mxu3 %v1740_v25 }
 0xa6a   :  { %1666 = vadd.xlane.f32.xlu0 %v4389_v22 }
 0xa6b   :  { %1927 = vmatpush.msrb.mxu2 %v1741_v33  ;;  %1975 = vmatpush.msrb.mxu3 %v1737_v41 }
 0xa6d   :  { %1928 = vmatpush.msrb.mxu2 %v1738_v1  ;;  %1976 = vmatpush.msrb.mxu3 %v1734_v49 }
 0xa6f   :  { %1929 = vmatpush.msrb.mxu2 %v1735_v19  ;;  %1977 = vmatpush.msrb.mxu3 %v1731_v52 }
 0xa71   :  { %1930 = vmatpush.msrb.mxu2 %v1732_v44  ;;  %1978 = vmatpush.msrb.mxu3 %v1728_v54 }
 0xa73   :  { %1931 = vmatpush.msrb.mxu2 %v1729_v50  ;;  %1979 = vmatpush.msrb.mxu3 %v1725_v57 }
 0xa75   :  { %1932 = vmatpush.msrb.mxu2 %v1726_v20  ;;  %1980 = vmatpush.msrb.mxu3 %v1722_v26 }
 0xa77   :  { %1933 = vmatpush.msrb.mxu2 %v1723_v55  ;;  %1981 = vmatpush.msrb.mxu3 %v1719_v42 }
 0xa79   :  { %1934 = vmatpush.msrb.mxu2 %v1720_v59  ;;  %1982 = vmatpush.msrb.mxu3 %v1716_v47 }
 0xa7b   :  { %1935 = vmatpush.msrb.mxu2 %v1717_v28 }
 0xa7d   :  { %1936 = vmatpush.msrb.mxu2 %v1714_v62 }
 0xabb   :  { %v1675_v63 = vpop.xlane.xlu2 %1674 }
 0xabc   :  { %v1678_v10 = vmul.f32 %v1675_v63, %v4182_v40 }
 0xabe   :  { %v1680_v36 = vadd.f32 1e-05, %v1678_v10 }
 0xac0   :  { %3315 = vrsqrt.f32 %v1680_v36  ;;  %vm1688_vm14 = vweird.f32 %v1680_v36 }
 0xac6   :  { %v3316_v15 = vpop.eup %3315 }
 0xac7   :  { %v1683_v2 = vmul.f32 %v3316_v15, %v1680_v36  ;;  %vm1689_vm13 = vweird.f32 %v3316_v15 }
 0xac8   :  { %vm1690_vm15 = vmor %vm1688_vm14, %vm1689_vm13 }
 0xac9   :  { %v1684_v18 = vmul.f32 %v3316_v15, %v1683_v2 }
 0xacb   :  { %v1685_v14 = vmul.f32 0.5, %v1684_v18 }
 0xacd   :  { %v1686_v43 = vsub.f32 1.5, %v1685_v14 }
 0xacf   :  { %v1687_v31 = vmul.f32 %v3316_v15, %v1686_v43 }
 0xad1   :  { %v1691_v3 = vsel %vm1690_vm15, %v3316_v15, %v1687_v31 }
 0xad2   :  { %v1702_v5 = vmul.f32 %v1691_v3, %v4383_v8  ;;  %v1762_v8 = vld [vmem:[%s4652_s15] sm:$0x7] }
 0xad3   :  { %v1916_v23 = vperm.slane %v1762_v8, 1  ;;  %v1917_v44 = vperm.slane %v1762_v8, 2 }
 0xad4   :  { %v1707_v6 = vmul.f32 %v3237_v4, %v1702_v5 }
 0xad6   :  { %v4397_v7 = vadd.f32 %v3238_v46, %v1707_v6  ;;  %v1765_v6 = vld [vmem:[#allocation23 + $0x10] sm:$0xff] }
 0xad8   :  { %1937 = vmatmul.f32.vlgmr.msrb.gmra.mxu2 %v4397_v7  ;;  %1960 = vmatmul.f32.vlgmr.msrb.gmra.mxu1 %v4397_v7 }
 0xad9   :  { %1983 = vmatmul.f32.vlgmr.msrb.gmra.mxu3 %v4397_v7 }
 0xadd   :  { %v1667_v9 = vpop.xlane.xlu0 %1666 }
 0xade   :  { %v1669_v11 = vmul.f32 %v1667_v9, %v4182_v40  ;;  %v1764_v9 = vld [vmem:[#allocation23 + $0x8] sm:$0xff] }
 0xae0   :  { %v1671_v13 = vsub.f32 %v4389_v22, %v1669_v11  ;;  %v1915_v22 = vperm.slane %v1762_v8, 0  ;;  %v1763_v11 = vld [vmem:[#allocation23] sm:$0xff] }
 0xae2   :  { %v1673_v16 = vmul.f32 %v1671_v13, %v1671_v13 }
 0xae4   :  { %1676 = vadd.xlane.f32.xlu2 %v1673_v16 }
 0xb55   :  { %v1961_v27 = vpop.f32.mrf.mxu1 }
 0xb56   :  { %v4407_v29 = vadd.f32 %v1961_v27, %v1916_v23 }
 0xb57   :  { %v1677_v45 = vpop.xlane.xlu2 %1676 }
 0xb58   :  { %v1679_v12 = vmul.f32 %v1677_v45, %v4182_v40  ;;  %2114 = vrot.lane.b32.xlu1 %v4407_v29, %s3841_s20  ;;  %3167 = vmatpush.xpose.msk.msra.mxu0 %vm600_vm0, %v4407_v29 }
 0xb5a   :  { %v1681_v0 = vadd.f32 1e-05, %v1679_v12 }
 0xb5b   :  { %v1938_v30 = vpop.f32.mrf.mxu2 }
 0xb5c   :  { %3317 = vrsqrt.f32 %v1681_v0  ;;  %v4414_v32 = vadd.f32 %v1938_v30, %v1915_v22  ;;  %vm1698_vm3 = vweird.f32 %v1681_v0  ;;  %v1984_v48 = vpop.f32.mrf.mxu3 }
 0xb5d   :  { %v4426_v51 = vadd.f32 %v1984_v48, %v1917_v44 }
 0xb5e   :  { %3168 = vmatmul.msk.f32.vlgmr.msra.gmra.mxu0 %vm600_vm0, %v4414_v32 }
 0xb62   :  { %v3318_v61 = vpop.eup %3317 }
 0xb63   :  { %v1693_v35 = vmul.f32 %v3318_v61, %v1681_v0  ;;  %vm1699_vm2 = vweird.f32 %v3318_v61 }
 0xb64   :  { %vm1700_vm4 = vmor %vm1698_vm3, %vm1699_vm2 }
 0xb65   :  { %v1694_v34 = vmul.f32 %v3318_v61, %v1693_v35 }
 0xb67   :  { %v1695_v37 = vmul.f32 0.5, %v1694_v34 }
 0xb69   :  { %v1696_v33 = vsub.f32 1.5, %v1695_v37 }
 0xb6b   :  { %v1697_v38 = vmul.f32 %v3318_v61, %v1696_v33 }
 0xb6d   :  { %v1701_v39 = vsel %vm1700_vm4, %v3318_v61, %v1697_v38 }
 0xb6e   :  { %v1703_v1 = vmul.f32 %v1701_v39, %v1671_v13 }
 0xb70   :  { %v1708_v24 = vmul.f32 %v3237_v4, %v1703_v1 }
 0xb72   :  { %v4418_v25 = vadd.f32 %v3238_v46, %v1708_v24  ;;  %v1766_v46 = vld [vmem:[#allocation23 + $0x18] sm:$0xff] }
 0xb73   :  { %v1770_v24 = vld [vmem:[#allocation23 + $0x38] sm:$0xff] }
 0xb74   :  { %1940 = vmatmul.f32.gmra.mxu2 %v4418_v25  ;;  %1963 = vmatmul.f32.gmra.mxu1 %v4418_v25 }
 0xb75   :  { %1986 = vmatmul.f32.gmra.mxu3 %v4418_v25 }
 0xbca   :  { %v2115_v55 = vpop.permute.xlu1 %2114 }
 0xbdb   :  { %v2013_v19 = vpop.f32.mrf.mxu0 }
 0xbdc   :  { %v2042_v21 = vmul.f32 0.17677669, %v2013_v19  ;;  %v1769_v19 = vld [vmem:[#allocation23 + $0x30] sm:$0xff] }
 0xbde   :  { %v2044_v41 = vsel %vm655_vm1, %v2042_v21, -inf }
 0xbdf   :  { %2045 = vmax.xlane.f32.xlu0 %v2044_v41  ;;  %v1767_v41 = vld [vmem:[#allocation23 + $0x20] sm:$0xff] }
 0xbf1   :  { %v1964_v49 = vpop.f32.mrf.mxu1 }
 0xbf2   :  { %v4424_v50 = vadd.f32 %v1964_v49, %v1916_v23 }
 0xbf3   :  { %2112 = vrot.lane.b32.xlu0 %v4414_v32, %s3841_s20 }
 0xbf4   :  { %3169 = vmatpush.xpose.msk.msrb.mxu0 %vm600_vm0, %v4424_v50 }
 0xbf7   :  { %v1941_v52 = vpop.f32.mrf.mxu2 }
 0xbf8   :  { %2084 = vmatpush.msra.mxu0 %v4426_v51  ;;  %v4433_v20 = vadd.f32 %v1941_v52, %v1915_v22  ;;  %v1987_v53 = vpop.f32.mrf.mxu3 }
 0xbf9   :  { %v4435_v54 = vadd.f32 %v1987_v53, %v1917_v44 }
 0xbfa   :  { %3170 = vmatmul.msk.f32.vlgmr.msrb.gmra.mxu0 %vm600_vm0, %v4433_v20 }
 0xbfb   :  { %2107 = vmatpush.msra.mxu2 %v4435_v54  ;;  %3173 = vmatpush.xpose.msk.msrb.mxu0 %vm600_vm0, %v2115_v55 }
 0xbfc   :  { %2142 = vrot.lane.b32.xlu0 %v4424_v50, %s3841_s20 }
 0xc04   :  { %2193 = vrot.lane.b32.xlu0 %v4426_v51, %s3841_s20 }
 0xc0c   :  { %2306 = vrot.lane.b32.xlu0 %v4407_v29, %s3842_s10 }
 0xc14   :  { %2304 = vrot.lane.b32.xlu0 %v4414_v32, %s3842_s10 }
 0xc52   :  { %v2046_v56 = vpop.xlane.xlu0 %2045 }
 0xc53   :  { %v2050_v57 = vsub.f32 %v2042_v21, %v2046_v56  ;;  %v1768_v21 = vld [vmem:[#allocation23 + $0x28] sm:$0xff] }
 0xc55   :  { %v2052_v59 = vmul.f32 1.442695, %v2050_v57 }
 0xc57   :  { %3319 = vpow2.f32 %v2052_v59 }
 0xc5d   :  { %v3320_v17 = vpop.eup %3319 }
 0xc5e   :  { %v2056_v26 = vsel %vm655_vm1, %v3320_v17, 0.0 }
 0xc5f   :  { %2057 = vadd.xlane.f32.xlu2 %v2056_v26 }
 0xc65   :  { %v2113_v28 = vpop.permute.xlu0 %2112 }
 0xc6e   :  { %v2143_v58 = vpop.permute.xlu0 %2142 }
 0xc6f   :  { %3175 = vmatpush.xpose.msk.msra.mxu1 %vm600_vm0, %v2143_v58 }
 0xc73   :  { %2293 = vmatpush.msrb.mxu1 %v1766_v46  ;;  %v1772_v46 = vld [vmem:[#allocation23 + $0x48] sm:$0xff] }
 0xc75   :  { %2294 = vmatpush.msrb.mxu1 %v1765_v6 }
 0xc76   :  { %v2194_v42 = vpop.permute.xlu0 %2193 }
 0xc77   :  { %2214 = vmatpush.msrb.mxu2 %v2194_v42  ;;  %v2039_v62 = vpop.f32.mrf.mxu0  ;;  %2295 = vmatpush.msrb.mxu1 %v1764_v9 }
 0xc78   :  { %v2043_v60 = vmul.f32 0.17677669, %v2039_v62 }
 0xc79   :  { %2296 = vmatpush.msrb.mxu1 %v1763_v11 }
 0xc7a   :  { %v2047_v47 = vsel %vm655_vm1, %v2043_v60, -inf }
 0xc7b   :  { %2048 = vmax.xlane.f32.xlu2 %v2047_v47 }
 0xc7e   :  { %v2307_v30 = vpop.permute.xlu0 %2306 }
 0xc86   :  { %v2305_v38 = vpop.permute.xlu0 %2304 }
 0xcd2   :  { %v2058_v63 = vpop.xlane.xlu2 %2057 }
 0xcd3   :  { %3321 = vrcp.f32 %v2058_v63 }
 0xcd9   :  { %v3322_v10 = vpop.eup %3321 }
 0xcda   :  { %v2064_v36 = vmul.f32 %v3322_v10, %v3320_v17 }
 0xcdc   :  { %3171 = vmatmul.msk.f32.vlgmr.msra.gmra.mxu0 %vm655_vm1, %v2064_v36 }
 0xcdd   :  { %2264 = vmatpush.msra.mxu0 %v1770_v24 }
 0xcdf   :  { %2265 = vmatpush.msra.mxu0 %v1769_v19 }
 0xce1   :  { %2266 = vmatpush.msra.mxu0 %v1768_v21 }
 0xce3   :  { %2267 = vmatpush.msra.mxu0 %v1767_v41 }
 0xce4   :  { %3174 = vmatmul.msk.f32.vlgmr.msrb.gmra.mxu0 %vm600_vm0, %v2113_v28 }
 0xcee   :  { %v2049_v15 = vpop.xlane.xlu2 %2048 }
 0xcef   :  { %v2051_v18 = vsub.f32 %v2043_v60, %v2049_v15 }
 0xcf1   :  { %v2054_v14 = vmul.f32 1.442695, %v2051_v18 }
 0xcf3   :  { %3323 = vpow2.f32 %v2054_v14 }
 0xcf9   :  { %v3324_v3 = vpop.eup %3323 }
 0xcfa   :  { %v2059_v5 = vsel %vm655_vm1, %v3324_v3, 0.0 }
 0xd59   :  { %v2086_v2 = vpop.f32.mrf.mxu0 }
 0xd61   :  { %v2137_v43 = vpop.f32.mrf.mxu0 }
 0xd62   :  { %v2168_v31 = vmul.f32 0.17677669, %v2137_v43 }
 0xd64   :  { %v2170_v4 = vsel %vm655_vm1, %v2168_v31, -inf }
 0xd65   :  { %2171 = vmax.xlane.f32.xlu2 %v2170_v4 }
 0xd6d   :  { %2060 = vadd.xlane.f32.xlu2 %v2059_v5  ;;  %v1773_v5 = vld [vmem:[#allocation23 + $0x50] sm:$0xff] }
 0xd85   :  { %2140 = vrot.lane.b32.xlu2 %v4433_v20, %s3841_s20 }
 0xdd8   :  { %v2172_v13 = vpop.xlane.xlu2 %2171 }
 0xdd9   :  { %v2176_v16 = vsub.f32 %v2168_v31, %v2172_v13 }
 0xddb   :  { %v2178_v8 = vmul.f32 1.442695, %v2176_v16 }
 0xddd   :  { %3325 = vpow2.f32 %v2178_v8 }
 0xde0   :  { %v2061_v23 = vpop.xlane.xlu2 %2060 }
 0xde1   :  { %3327 = vrcp.f32 %v2061_v23  ;;  %v1771_v23 = vld [vmem:[#allocation23 + $0x40] sm:$0xff] }
 0xde3   :  { %v3326_v27 = vpop.eup %3325 }
 0xde4   :  { %v2182_v45 = vsel %vm655_vm1, %v3326_v27, 0.0 }
 0xde5   :  { %2183 = vadd.xlane.f32.xlu1 %v2182_v45 }
 0xde7   :  { %v3328_v12 = vpop.eup %3327 }
 0xde8   :  { %v2065_v22 = vmul.f32 %v3328_v12, %v3324_v3  ;;  %v2141_v0 = vpop.permute.xlu2 %2140  ;;  %v1774_v3 = vld [vmem:[#allocation23 + $0x58] sm:$0xff] }
 0xde9   :  { %3176 = vmatmul.msk.f32.vlgmr.msra.gmra.mxu1 %vm600_vm0, %v2141_v0  ;;  %2454 = vmatpush.msrb.mxu0 %v1774_v3 }
 0xdea   :  { %3172 = vmatmul.msk.f32.vlgmr.msra.gmra.mxu2 %vm655_vm1, %v2065_v22 }
 0xdeb   :  { %3183 = vmatpush.xpose.msk.msra.mxu2 %vm600_vm0, %v2307_v30  ;;  %2455 = vmatpush.msrb.mxu0 %v1773_v5 }
 0xded   :  { %2456 = vmatpush.msrb.mxu0 %v1772_v46 }
 0xdef   :  { %2457 = vmatpush.msrb.mxu0 %v1771_v23  ;;  %v1842_v23 = vld [vmem:[#allocation25 + $0x1f0] sm:$0xff] }
 0xdf1   :  { %3181 = vmatmul.msk.f32.vlgmr.msrb.gmra.mxu1 %vm600_vm0, %v2086_v2 }
 0xe58   :  { %v2184_v61 = vpop.xlane.xlu1 %2183 }
 0xe59   :  { %3329 = vrcp.f32 %v2184_v61 }
 0xe5f   :  { %v3330_v35 = vpop.eup %3329 }
 0xe60   :  { %v2190_v34 = vmul.f32 %v3330_v35, %v3326_v27 }
 0xe62   :  { %3177 = vmatmul.msk.f32.vlgmr.msrb.gmra.mxu2 %vm655_vm1, %v2190_v34 }
 0xe66   :  { %v2165_v37 = vpop.f32.mrf.mxu1 }
 0xe67   :  { %v2169_v33 = vmul.f32 0.17677669, %v2165_v37 }
 0xe69   :  { %v2173_v39 = vsel %vm655_vm1, %v2169_v33, -inf }
 0xe6a   :  { %2174 = vmax.xlane.f32.xlu2 %v2173_v39  ;;  %3184 = vmatmul.msk.f32.vlgmr.msra.gmra.mxu2 %vm600_vm0, %v2305_v38 }
 0xe6d   :  { %v2109_v1 = vpop.f32.mrf.mxu2 }
 0xe6e   :  { %3182 = vmatmul.msk.f32.gmra.mxu1 %vm600_vm0, %v2109_v1  ;;  %v4494_v14 = vpop.f32.mrf.mxu1 }
 0xe82   :  { %2334 = vrot.lane.b32.xlu2 %v4424_v50, %s3842_s10 }
 0xe8a   :  { %2384 = vrot.lane.b32.xlu2 %v4426_v51, %s3842_s10 }
 0xe92   :  { %2497 = vrot.lane.b32.xlu2 %v4424_v50, %s3835_s7 }
 0xedd   :  { %v2175_v44 = vpop.xlane.xlu2 %2174 }
 0xede   :  { %v2177_v48 = vsub.f32 %v2169_v33, %v2175_v44 }
 0xee0   :  { %v2180_v49 = vmul.f32 1.442695, %v2177_v48 }
 0xee2   :  { %3331 = vpow2.f32 %v2180_v49 }
 0xee5   :  { %v2335_v52 = vpop.permute.xlu2 %2334  ;;  %v2216_v53 = vpop.f32.mrf.mxu2 }
 0xee6   :  { %3179 = vmatmul.msk.f32.vlgmr.msra.gmra.mxu0 %vm600_vm0, %v2216_v53 }
 0xee8   :  { %v3332_v55 = vpop.eup %3331 }
 0xee9   :  { %v2185_v56 = vsel %vm655_vm1, %v3332_v55, 0.0 }
 0xeea   :  { %2186 = vadd.xlane.f32.xlu1 %v2185_v56 }
 0xeeb   :  { %v4498_v4 = vpop.f32.mrf.mxu1 }
 0xeed   :  { %v2385_v50 = vpop.permute.xlu2 %2384  ;;  %v2329_v57 = vpop.f32.mrf.mxu2 }
 0xeee   :  { %v2360_v59 = vmul.f32 0.17677669, %v2329_v57  ;;  %2405 = vmatpush.msrb.mxu2 %v2385_v50  ;;  %v1778_v57 = vld [vmem:[#allocation23 + $0x78] sm:$0xff] }
 0xef0   :  { %v2362_v17 = vsel %vm655_vm1, %v2360_v59, -inf }
 0xef1   :  { %2363 = vmax.xlane.f32.xlu0 %v2362_v17  ;;  %v1776_v17 = vld [vmem:[#allocation23 + $0x68] sm:$0xff] }
 0xef5   :  { %v2498_v26 = vpop.permute.xlu2 %2497 }
 0xef6   :  { %3193 = vmatpush.xpose.msk.msra.mxu2 %vm600_vm0, %v2498_v26  ;;  %v1775_v26 = vld [vmem:[#allocation23 + $0x60] sm:$0xff] }
 0xf03   :  { %2220 = vrot.lane.b32.xlu1 %v4435_v54, %s3841_s20 }
 0xf05   :  { %2332 = vrot.lane.b32.xlu0 %v4433_v20, %s3842_s10 }
 0xf0d   :  { %2469 = vrot.lane.b32.xlu0 %v4407_v29, %s3835_s7 }
 0xf15   :  { %2467 = vrot.lane.b32.xlu0 %v4414_v32, %s3835_s7 }
 0xf1d   :  { %2495 = vrot.lane.b32.xlu0 %v4433_v20, %s3835_s7 }
 0xf5d   :  { %v2187_v62 = vpop.xlane.xlu1 %2186 }
 0xf64   :  { %v2364_v28 = vpop.xlane.xlu0 %2363 }
 0xf65   :  { %v2368_v58 = vsub.f32 %v2360_v59, %v2364_v28  ;;  %v1777_v59 = vld [vmem:[#allocation23 + $0x70] sm:$0xff] }
 0xf67   :  { %v2370_v42 = vmul.f32 1.442695, %v2368_v58 }
 0xf69   :  { %3333 = vpow2.f32 %v2370_v42 }
 0xf6a   :  { %3335 = vrcp.f32 %v2187_v62 }
 0xf6f   :  { %v3334_v60 = vpop.eup %3333 }
 0xf70   :  { %v2374_v47 = vsel %vm655_vm1, %v3334_v60, 0.0  ;;  %v3336_v63 = vpop.eup %3335 }
 0xf71   :  { %2375 = vadd.xlane.f32.xlu1 %v2374_v47  ;;  %v2191_v10 = vmul.f32 %v3336_v63, %v3332_v55  ;;  %v2269_v63 = vpop.f32.mrf.mxu0 }
 0xf75   :  { %v2221_v36 = vpop.permute.xlu1 %2220 }
 0xf76   :  { %2241 = vmatpush.msra.mxu3 %v2221_v36 }
 0xf77   :  { %3178 = vmatmul.msk.f32.vlgmr.msra.gmra.mxu3 %vm655_vm1, %v2191_v10  ;;  %v2333_v29 = vpop.permute.xlu0 %2332 }
 0xf78   :  { %3185 = vmatpush.xpose.msk.msrb.mxu3 %vm600_vm0, %v2335_v52 }
 0xf7f   :  { %3186 = vmatmul.msk.f32.vlgmr.msrb.gmra.mxu3 %vm600_vm0, %v2333_v29  ;;  %v2470_v32 = vpop.permute.xlu0 %2469  ;;  %v2299_v29 = vadd.f32 %v4494_v14, %v2269_v63  ;;  %v1800_v63 = vld [vmem:[#allocation25 + $0xa0] sm:$0xff] }
 0xf80   :  { %3191 = vmatpush.xpose.msk.msra.mxu1 %vm600_vm0, %v2470_v32 }
 0xf87   :  { %v2468_v20 = vpop.permute.xlu0 %2467 }
 0xf88   :  { %3192 = vmatmul.msk.f32.vlgmr.msra.gmra.mxu1 %vm600_vm0, %v2468_v20  ;;  %v3239_v20 = vld [vmem:[%s4654_s17] ss:$0 sm:$0xff] }
 0xf8f   :  { %v2496_v43 = vpop.permute.xlu0 %2495 }
 0xfe4   :  { %v2376_v15 = vpop.xlane.xlu1 %2375 }
 0xfe5   :  { %3337 = vrcp.f32 %v2376_v15 }
 0xfeb   :  { %v3338_v2 = vpop.eup %3337 }
 0xfec   :  { %v2382_v18 = vmul.f32 %v3338_v2, %v3334_v60 }
 0xfee   :  { %3187 = vmatmul.msk.f32.vlgmr.msrb.gmra.mxu2 %vm655_vm1, %v2382_v18 }
 0xfef   :  { %2617 = vmatpush.msrb.mxu2 %v1778_v57  ;;  %v1815_v57 = vld [vmem:[#allocation25 + $0x118] sm:$0xff] }
 0xff1   :  { %2618 = vmatpush.msrb.mxu2 %v1777_v59  ;;  %v1808_v59 = vld [vmem:[#allocation25 + $0xe0] sm:$0xff] }
 0xff3   :  { %2619 = vmatpush.msrb.mxu2 %v1776_v17  ;;  %v1809_v17 = vld [vmem:[#allocation25 + $0xe8] sm:$0xff] }
 0xff5   :  { %2620 = vmatpush.msrb.mxu2 %v1775_v26  ;;  %v1810_v26 = vld [vmem:[#allocation25 + $0xf0] sm:$0xff] }
 0xff6   :  { %3194 = vmatmul.msk.f32.vlgmr.msra.gmra.mxu2 %vm600_vm0, %v2496_v43 }
 0xffa   :  { %v2243_v31 = vpop.f32.mrf.mxu3 }
 0xffb   :  { %3180 = vmatmul.msk.f32.gmra.mxu0 %vm600_vm0, %v2243_v31 }
0x1002   :  { %v2357_v6 = vpop.f32.mrf.mxu3 }
0x1003   :  { %v2361_v9 = vmul.f32 0.17677669, %v2357_v6 }
0x1005   :  { %v2492_v11 = vpop.f32.mrf.mxu1  ;;  %v2365_v13 = vsel %vm655_vm1, %v2361_v9, -inf }
0x1006   :  { %v2523_v16 = vmul.f32 0.17677669, %v2492_v11  ;;  %2366 = vmax.xlane.f32.xlu2 %v2365_v13 }
0x1008   :  { %v2525_v8 = vsel %vm655_vm1, %v2523_v16, -inf }
0x1009   :  { %2526 = vmax.xlane.f32.xlu0 %v2525_v8  ;;  %v1840_v8 = vld [vmem:[#allocation25 + $0x1e0] sm:$0xff] }
0x100a   :  { %2696 = vmatpush.msra.mxu0 %v1840_v8  ;;  %v1786_v8 = vld [vmem:[#allocation25 + $0x30] sm:$0xff] }
0x101e   :  { %2547 = vrot.lane.b32.xlu2 %v4426_v51, %s3835_s7 }
0x1071   :  { %v2407_v27 = vpop.f32.mrf.mxu2 }
0x1072   :  { %3189 = vmatmul.msk.f32.vlgmr.msrb.gmra.mxu0 %vm600_vm0, %v2407_v27  ;;  %v1843_v27 = vld [vmem:[#allocation25 + $0x1f8] sm:$0xff] }
0x1073   :  { %2765 = vmatpush.msra.mxu2 %v1843_v27  ;;  %v1781_v27 = vld [vmem:[#allocation25 + $0x8] sm:$0xff] }
0x1078   :  { %v2272_v10 = vpop.f32.mrf.mxu0 }
0x1079   :  { %v2367_v45 = vpop.xlane.xlu2 %2366  ;;  %v2520_v33 = vpop.f32.mrf.mxu2  ;;  %v2302_v3 = vadd.f32 %v4498_v4, %v2272_v10  ;;  %v1841_v4 = vld [vmem:[#allocation25 + $0x1e8] sm:$0xff] }
0x107a   :  { %v2369_v12 = vsub.f32 %v2361_v9, %v2367_v45  ;;  %v2524_v38 = vmul.f32 0.17677669, %v2520_v33  ;;  %v1836_v45 = vld [vmem:[#allocation25 + $0x1c0] sm:$0xff]  ;;  %v1831_v33 = vld [vmem:[#allocation25 + $0x198] sm:$0xff]  ;;  %v1801_v10 = vld [vmem:[#allocation25 + $0xa8] sm:$0xff] }
0x107b   :  { %2697 = vmatpush.msra.mxu0 %v1836_v45  ;;  %v1782_v45 = vld [vmem:[#allocation25 + $0x10] sm:$0xff] }
0x107c   :  { %v2372_v22 = vmul.f32 1.442695, %v2369_v12  ;;  %v2527_v0 = vpop.xlane.xlu0 %2526  ;;  %v2528_v39 = vsel %vm655_vm1, %v2524_v38, -inf  ;;  %v1838_v12 = vld [vmem:[#allocation25 + $0x1d0] sm:$0xff] }
0x107d   :  { %v2531_v30 = vsub.f32 %v2523_v16, %v2527_v0  ;;  %v1832_v0 = vld [vmem:[#allocation25 + $0x1a0] sm:$0xff] }
0x107e   :  { %3339 = vpow2.f32 %v2372_v22  ;;  %v1839_v22 = vld [vmem:[#allocation25 + $0x1d8] sm:$0xff]  ;;  %2698 = vmatpush.msra.mxu0 %v1832_v0 }
0x107f   :  { %v2533_v61 = vmul.f32 1.442695, %v2531_v30  ;;  %2766 = vmatpush.msra.mxu2 %v1839_v22  ;;  %v1833_v30 = vld [vmem:[#allocation25 + $0x1a8] sm:$0xff] }
0x1081   :  { %3341 = vpow2.f32 %v2533_v61  ;;  %v2548_v55 = vpop.permute.xlu2 %2547  ;;  %v1834_v61 = vld [vmem:[#allocation25 + $0x1b0] sm:$0xff] }
0x1084   :  { %v3340_v35 = vpop.eup %3339 }
0x1085   :  { %v2377_v34 = vsel %vm655_vm1, %v3340_v35, 0.0 }
0x1086   :  { %2378 = vadd.xlane.f32.xlu1 %v2377_v34  ;;  %v1828_v34 = vld [vmem:[#allocation25 + $0x180] sm:$0xff] }
0x1087   :  { %v3342_v37 = vpop.eup %3341  ;;  %2699 = vmatpush.msra.mxu0 %v1828_v34 }
0x1088   :  { %v2537_v51 = vsel %vm655_vm1, %v3342_v37, 0.0 }
0x108e   :  { %2538 = vadd.xlane.f32.xlu1 %v2537_v51  ;;  %v1830_v51 = vld [vmem:[#allocation25 + $0x190] sm:$0xff] }
0x1096   :  { %2529 = vmax.xlane.f32.xlu1 %v2528_v39  ;;  %v1825_v39 = vld [vmem:[#allocation25 + $0x168] sm:$0xff] }
0x10af   :  { %2410 = vrot.lane.b32.xlu1 %v4435_v54, %s3842_s10 }
0x10ef   :  { %v2459_v36 = vpop.f32.mrf.mxu0 }
0x10f0   :  { %v2465_v32 = vadd.f32 %v2459_v36, %v2299_v29  ;;  %v1802_v36 = vld [vmem:[#allocation25 + $0xb0] sm:$0xff] }
0x10f9   :  { %v2379_v1 = vpop.xlane.xlu1 %2378 }
0x1101   :  { %v2539_v24 = vpop.xlane.xlu1 %2538 }
0x1109   :  { %v2530_v19 = vpop.xlane.xlu1 %2529 }
0x110a   :  { %v2532_v21 = vsub.f32 %v2524_v38, %v2530_v19  ;;  %v1824_v38 = vld [vmem:[#allocation25 + $0x160] sm:$0xff] }
0x110b   :  { %2700 = vmatpush.msra.mxu0 %v1824_v38  ;;  %v1820_v19 = vld [vmem:[#allocation25 + $0x140] sm:$0xff] }
0x110c   :  { %v2535_v41 = vmul.f32 1.442695, %v2532_v21  ;;  %v1821_v21 = vld [vmem:[#allocation25 + $0x148] sm:$0xff] }
0x110d   :  { %2701 = vmatpush.msra.mxu0 %v1820_v19 }
0x110e   :  { %3343 = vpow2.f32 %v2535_v41  ;;  %v1822_v41 = vld [vmem:[#allocation25 + $0x150] sm:$0xff] }
0x110f   :  { %3345 = vrcp.f32 %v2379_v1  ;;  %v1826_v1 = vld [vmem:[#allocation25 + $0x170] sm:$0xff] }
0x1110   :  { %3347 = vrcp.f32 %v2539_v24  ;;  %v1827_v24 = vld [vmem:[#allocation25 + $0x178] sm:$0xff] }
0x1114   :  { %v3344_v44 = vpop.eup %3343 }
0x1115   :  { %v2540_v48 = vsel %vm655_vm1, %v3344_v44, 0.0  ;;  %v3346_v49 = vpop.eup %3345 }
0x1116   :  { %2541 = vadd.xlane.f32.xlu0 %v2540_v48  ;;  %v2383_v52 = vmul.f32 %v3346_v49, %v3340_v35  ;;  %v3348_v56 = vpop.eup %3347  ;;  %v1835_v35 = vld [vmem:[#allocation25 + $0x1b8] sm:$0xff]  ;;  %v1816_v48 = vld [vmem:[#allocation25 + $0x120] sm:$0xff]  ;;  %v1817_v49 = vld [vmem:[#allocation25 + $0x128] sm:$0xff] }
0x1117   :  { %v2545_v50 = vmul.f32 %v3348_v56, %v3342_v37  ;;  %2767 = vmatpush.msra.mxu2 %v1835_v35  ;;  %v1829_v37 = vld [vmem:[#allocation25 + $0x188] sm:$0xff]  ;;  %2702 = vmatpush.msra.mxu0 %v1816_v48 }
0x1118   :  { %v1813_v56 = vld [vmem:[#allocation25 + $0x108] sm:$0xff] }
0x1119   :  { %2768 = vmatpush.msra.mxu2 %v1831_v33  ;;  %v3240_v33 = vld [vmem:[%s4659_s22] ss:$0 sm:$0xff] }
0x111b   :  { %2769 = vmatpush.msra.mxu2 %v1827_v24 }
0x1121   :  { %v2411_v53 = vpop.permute.xlu1 %2410 }
0x1122   :  { %2431 = vmatpush.msra.mxu3 %v2411_v53  ;;  %v1819_v53 = vld [vmem:[#allocation25 + $0x138] sm:$0xff] }
0x1123   :  { %3188 = vmatmul.msk.f32.vlgmr.msra.gmra.mxu3 %vm655_vm1, %v2383_v52  ;;  %v1818_v52 = vld [vmem:[#allocation25 + $0x130] sm:$0xff] }
0x1124   :  { %2568 = vmatpush.msrb.mxu3 %v2548_v55  ;;  %v1812_v55 = vld [vmem:[#allocation25 + $0x100] sm:$0xff] }
0x1125   :  { %2703 = vmatpush.msra.mxu0 %v1812_v55  ;;  %v1860_v55 = vld [vmem:[#allocation26 + $0x78] sm:$0xff] }
0x1126   :  { %2719 = vmatpush.msra.mxu3 %v1841_v4  ;;  %v1787_v4 = vld [vmem:[#allocation25 + $0x38] sm:$0xff] }
0x1127   :  { %2704 = vmatpush.msra.mxu0 %v1808_v59  ;;  %v1891_v59 = vld [vmem:[#allocation26 + $0x170] sm:$0xff] }
0x112a   :  { %2573 = vrot.lane.b32.xlu0 %v4435_v54, %s3835_s7 }
0x112b   :  { %3195 = vmatmul.msk.f32.vlgmr.msrb.gmra.mxu3 %vm655_vm1, %v2545_v50  ;;  %v1814_v50 = vld [vmem:[#allocation25 + $0x110] sm:$0xff] }
0x1189   :  { %v2542_v28 = vpop.xlane.xlu0 %2541 }
0x118a   :  { %3349 = vrcp.f32 %v2542_v28  ;;  %v1811_v28 = vld [vmem:[#allocation25 + $0xf8] sm:$0xff] }
0x1190   :  { %v3350_v58 = vpop.eup %3349 }
0x1191   :  { %v2546_v42 = vmul.f32 %v3350_v58, %v3344_v44  ;;  %v1823_v44 = vld [vmem:[#allocation25 + $0x158] sm:$0xff] }
0x1192   :  { %2770 = vmatpush.msra.mxu2 %v1823_v44 }
0x1194   :  { %2771 = vmatpush.msra.mxu2 %v1819_v53 }
0x1196   :  { %2772 = vmatpush.msra.mxu2 %v1815_v57  ;;  %v1859_v57 = vld [vmem:[#allocation26 + $0x70] sm:$0xff] }
0x1198   :  { %2773 = vmatpush.msra.mxu2 %v1811_v28  ;;  %v1890_v28 = vld [vmem:[#allocation26 + $0x168] sm:$0xff] }
0x119c   :  { %v2574_v62 = vpop.permute.xlu0 %2573 }
0x119d   :  { %2594 = vmatpush.msrb.mxu1 %v2574_v62  ;;  %v1805_v62 = vld [vmem:[#allocation25 + $0xc8] sm:$0xff] }
0x119e   :  { %3196 = vmatmul.msk.f32.vlgmr.msrb.gmra.mxu1 %vm655_vm1, %v2546_v42  ;;  %v1804_v42 = vld [vmem:[#allocation25 + $0xc0] sm:$0xff] }
0x119f   :  { %2742 = vmatpush.msra.mxu1 %v1842_v23  ;;  %2705 = vmatpush.msra.mxu0 %v1804_v42  ;;  %v1780_v23 = vld [vmem:[#allocation25] sm:$0xff] }
0x11a0   :  { %v1857_v42 = vld [vmem:[#allocation26 + $0x60] sm:$0xff] }
0x11a1   :  { %2743 = vmatpush.msra.mxu1 %v1838_v12  ;;  %2706 = vmatpush.msra.mxu0 %v1800_v63  ;;  %v1856_v63 = vld [vmem:[#allocation26 + $0x58] sm:$0xff] }
0x11a3   :  { %2744 = vmatpush.msra.mxu1 %v1834_v61 }
0x11a5   :  { %2745 = vmatpush.msra.mxu1 %v1830_v51 }
0x11a6   :  { %v2433_v60 = vpop.f32.mrf.mxu3 }
0x11a7   :  { %3190 = vmatmul.msk.f32.gmra.mxu0 %vm600_vm0, %v2433_v60  ;;  %2746 = vmatpush.msra.mxu1 %v1826_v1  ;;  %v1806_v60 = vld [vmem:[#allocation25 + $0xd0] sm:$0xff]  ;;  %v3241_v1 = vld [vmem:[%s4660_s23] ss:$0 sm:$0xff] }
0x11a9   :  { %2747 = vmatpush.msra.mxu1 %v1822_v41 }
0x11ab   :  { %2748 = vmatpush.msra.mxu1 %v1818_v52 }
0x11ad   :  { %2749 = vmatpush.msra.mxu1 %v1814_v50 }
0x11ae   :  { %v2570_v54 = vpop.f32.mrf.mxu3 }
0x11af   :  { %3197 = vmatmul.msk.f32.vlgmr.msrb.gmra.mxu2 %vm600_vm0, %v2570_v54  ;;  %2750 = vmatpush.msra.mxu1 %v1810_v26  ;;  %v1858_v26 = vld [vmem:[#allocation26 + $0x68] sm:$0xff] }
0x11b1   :  { %2751 = vmatpush.msra.mxu1 %v1806_v60  ;;  %v1889_v60 = vld [vmem:[#allocation26 + $0x160] sm:$0xff] }
0x11b3   :  { %2752 = vmatpush.msra.mxu1 %v1802_v36  ;;  %v1888_v36 = vld [vmem:[#allocation26 + $0x158] sm:$0xff] }
0x121b   :  { %v2596_v47 = vpop.f32.mrf.mxu1 }
0x121c   :  { %3198 = vmatmul.msk.f32.gmra.mxu2 %vm600_vm0, %v2596_v47  ;;  %v1807_v47 = vld [vmem:[#allocation25 + $0xd8] sm:$0xff] }
0x121d   :  { %2774 = vmatpush.msra.mxu2 %v1807_v47  ;;  %v1908_v47 = vld [vmem:[#allocation26 + $0x1f8] sm:$0xff] }
0x1224   :  { %v2462_v31 = vpop.f32.mrf.mxu0 }
0x1225   :  { %v2466_v5 = vadd.f32 %v2462_v31, %v2302_v3  ;;  %v1792_v31 = vld [vmem:[#allocation25 + $0x60] sm:$0xff]  ;;  %v1793_v3 = vld [vmem:[#allocation25 + $0x68] sm:$0xff] }
0x1232   :  { %v2622_v15 = vpop.f32.mrf.mxu2 }
0x1233   :  { %v2628_v2 = vadd.f32 %v2622_v15, %v2465_v32  ;;  %v1803_v32 = vld [vmem:[#allocation25 + $0xb8] sm:$0xff]  ;;  %v1797_v15 = vld [vmem:[#allocation25 + $0x88] sm:$0xff] }
0x1234   :  { %2775 = vmatpush.msra.mxu2 %v1803_v32 }
0x1235   :  { %v2633_v18 = vadd.f32 %v3239_v20, %v2628_v2  ;;  %v1798_v2 = vld [vmem:[#allocation25 + $0x90] sm:$0xff] }
0x1236   :  { %2753 = vmatpush.msra.mxu1 %v1798_v2  ;;  %v1887_v2 = vld [vmem:[#allocation26 + $0x150] sm:$0xff] }
0x1237   :  { %v2635_v43 = vadd.f32 %v2633_v18, %v4397_v7 }
0x1239   :  { %2637 = vadd.xlane.f32.xlu1 %v2635_v43 }
0x129f   :  { %v2625_v46 = vpop.f32.mrf.mxu2 }
0x12a0   :  { %v2629_v6 = vadd.f32 %v2625_v46, %v2466_v5  ;;  %v1794_v5 = vld [vmem:[#allocation25 + $0x70] sm:$0xff]  ;;  %v1795_v46 = vld [vmem:[#allocation25 + $0x78] sm:$0xff] }
0x12a1   :  { %2754 = vmatpush.msra.mxu1 %v1794_v5  ;;  %v1905_v5 = vld [vmem:[#allocation26 + $0x1e0] sm:$0xff] }
0x12a2   :  { %v2634_v9 = vadd.f32 %v3239_v20, %v2629_v6  ;;  %v1796_v20 = vld [vmem:[#allocation25 + $0x80] sm:$0xff] }
0x12a3   :  { %2707 = vmatpush.msra.mxu0 %v1796_v20  ;;  %v1788_v6 = vld [vmem:[#allocation25 + $0x40] sm:$0xff]  ;;  %v1907_v20 = vld [vmem:[#allocation26 + $0x1f0] sm:$0xff] }
0x12a4   :  { %v4526_v14 = vadd.f32 %v2634_v9, %v4418_v25  ;;  %v1837_v25 = vld [vmem:[#allocation25 + $0x1c8] sm:$0xff] }
0x12a5   :  { %2720 = vmatpush.msra.mxu3 %v1837_v25  ;;  %2708 = vmatpush.msra.mxu0 %v1792_v31  ;;  %v1789_v9 = vld [vmem:[#allocation25 + $0x48] sm:$0xff]  ;;  %v1783_v25 = vld [vmem:[#allocation25 + $0x18] sm:$0xff]  ;;  %v1873_v31 = vld [vmem:[#allocation26 + $0xe0] sm:$0xff] }
0x12a6   :  { %2639 = vadd.xlane.f32.xlu2 %v4526_v14 }
0x12a7   :  { %2721 = vmatpush.msra.mxu3 %v1833_v30  ;;  %2709 = vmatpush.msra.mxu0 %v1788_v6  ;;  %v1872_v6 = vld [vmem:[#allocation26 + $0xd8] sm:$0xff] }
0x12a9   :  { %2722 = vmatpush.msra.mxu3 %v1829_v37 }
0x12ab   :  { %2723 = vmatpush.msra.mxu3 %v1825_v39 }
0x12ac   :  { %v2638_v11 = vpop.xlane.xlu1 %2637 }
0x12ad   :  { %v2641_v13 = vmul.f32 %v2638_v11, %v4182_v40  ;;  %2724 = vmatpush.msra.mxu3 %v1821_v21  ;;  %v1791_v11 = vld [vmem:[#allocation25 + $0x58] sm:$0xff] }
0x12af   :  { %v4530_v16 = vsub.f32 %v2635_v43, %v2641_v13  ;;  %2725 = vmatpush.msra.mxu3 %v1817_v49  ;;  %v1799_v43 = vld [vmem:[#allocation25 + $0x98] sm:$0xff]  ;;  %v1784_v13 = vld [vmem:[#allocation25 + $0x20] sm:$0xff] }
0x12b0   :  { %2776 = vmatpush.msra.mxu2 %v1799_v43  ;;  %2710 = vmatpush.msra.mxu0 %v1784_v13  ;;  %v1854_v43 = vld [vmem:[#allocation26 + $0x48] sm:$0xff]  ;;  %v1871_v13 = vld [vmem:[#allocation26 + $0xd0] sm:$0xff] }
0x12b1   :  { %v2645_v7 = vmul.f32 %v4530_v16, %v4530_v16  ;;  %2726 = vmatpush.msra.mxu3 %v1813_v56  ;;  %v1892_v56 = vld [vmem:[#allocation26 + $0x178] sm:$0xff] }
0x12b2   :  { %2777 = vmatpush.msra.mxu2 %v1795_v46  ;;  %2711 = vmatpush.msra.mxu0 %v1780_v23  ;;  %v1853_v46 = vld [vmem:[#allocation26 + $0x40] sm:$0xff]  ;;  %v1870_v23 = vld [vmem:[#allocation26 + $0xc8] sm:$0xff] }
0x12b3   :  { %2647 = vadd.xlane.f32.xlu0 %v2645_v7  ;;  %2727 = vmatpush.msra.mxu3 %v1809_v17  ;;  %v1785_v7 = vld [vmem:[#allocation25 + $0x28] sm:$0xff] }
0x12b4   :  { %2778 = vmatpush.msra.mxu2 %v1791_v11  ;;  %2951 = vmatpush.msrb.mxu0 %v1860_v55  ;;  %v1852_v11 = vld [vmem:[#allocation26 + $0x38] sm:$0xff]  ;;  %v1865_v55 = vld [vmem:[#allocation26 + $0xa0] sm:$0xff] }
0x12b5   :  { %2728 = vmatpush.msra.mxu3 %v1805_v62  ;;  %v1876_v62 = vld [vmem:[#allocation26 + $0xf8] sm:$0xff] }
0x12b6   :  { %2779 = vmatpush.msra.mxu2 %v1787_v4  ;;  %2952 = vmatpush.msrb.mxu0 %v1859_v57  ;;  %v1851_v4 = vld [vmem:[#allocation26 + $0x30] sm:$0xff]  ;;  %v1897_v57 = vld [vmem:[#allocation26 + $0x1a0] sm:$0xff] }
0x12b7   :  { %2729 = vmatpush.msra.mxu3 %v1801_v10  ;;  %v1875_v10 = vld [vmem:[#allocation26 + $0xf0] sm:$0xff] }
0x12b8   :  { %2780 = vmatpush.msra.mxu2 %v1783_v25  ;;  %2953 = vmatpush.msrb.mxu0 %v1858_v26  ;;  %v1850_v25 = vld [vmem:[#allocation26 + $0x28] sm:$0xff]  ;;  %v1845_v26 = vld [vmem:[#allocation26] sm:$0xff] }
0x12b9   :  { %2730 = vmatpush.msra.mxu3 %v1797_v15  ;;  %v1874_v15 = vld [vmem:[#allocation26 + $0xe8] sm:$0xff] }
0x12ba   :  { %2954 = vmatpush.msrb.mxu0 %v1857_v42  ;;  %3020 = vmatpush.msrb.mxu2 %v1908_v47 }
0x12bb   :  { %2731 = vmatpush.msra.mxu3 %v1793_v3  ;;  %v1886_v3 = vld [vmem:[#allocation26 + $0x148] sm:$0xff] }
0x12bc   :  { %2955 = vmatpush.msrb.mxu0 %v1856_v63  ;;  %3021 = vmatpush.msrb.mxu2 %v1907_v20  ;;  %v1895_v63 = vld [vmem:[#allocation26 + $0x190] sm:$0xff]  ;;  %v1862_v20 = vld [vmem:[#allocation26 + $0x88] sm:$0xff] }
0x12bd   :  { %2732 = vmatpush.msra.mxu3 %v1789_v9  ;;  %v1885_v9 = vld [vmem:[#allocation26 + $0x140] sm:$0xff] }
0x12bf   :  { %2733 = vmatpush.msra.mxu3 %v1785_v7  ;;  %v1884_v7 = vld [vmem:[#allocation26 + $0x138] sm:$0xff] }
0x12c1   :  { %2734 = vmatpush.msra.mxu3 %v1781_v27  ;;  %v1883_v27 = vld [vmem:[#allocation26 + $0x130] sm:$0xff] }
0x12c3   :  { %2974 = vmatpush.msrb.mxu3 %v1876_v62  ;;  %v1877_v62 = vld [vmem:[#allocation26 + $0x100] sm:$0xff] }
0x12c5   :  { %2975 = vmatpush.msrb.mxu3 %v1875_v10 }
0x12c7   :  { %2976 = vmatpush.msrb.mxu3 %v1874_v15  ;;  %v1894_v15 = vld [vmem:[#allocation26 + $0x188] sm:$0xff] }
0x12c9   :  { %2977 = vmatpush.msrb.mxu3 %v1873_v31  ;;  %v1893_v31 = vld [vmem:[#allocation26 + $0x180] sm:$0xff] }
0x12cb   :  { %2978 = vmatpush.msrb.mxu3 %v1872_v6 }
0x12cd   :  { %2979 = vmatpush.msrb.mxu3 %v1871_v13 }
0x12cf   :  { %2980 = vmatpush.msrb.mxu3 %v1870_v23 }
0x1319   :  { %v2640_v58 = vpop.xlane.xlu2 %2639 }
0x131a   :  { %v2642_v54 = vmul.f32 %v2640_v58, %v4182_v40 }
0x131c   :  { %v4536_v29 = vsub.f32 %v4526_v14, %v2642_v54  ;;  %v1790_v14 = vld [vmem:[#allocation25 + $0x50] sm:$0xff] }
0x131d   :  { %2755 = vmatpush.msra.mxu1 %v1790_v14  ;;  %v1904_v14 = vld [vmem:[#allocation26 + $0x1d8] sm:$0xff] }
0x131e   :  { %v2646_v18 = vmul.f32 %v4536_v29, %v4536_v29 }
0x131f   :  { %2756 = vmatpush.msra.mxu1 %v1786_v8  ;;  %v1903_v8 = vld [vmem:[#allocation26 + $0x1d0] sm:$0xff] }
0x1320   :  { %2649 = vadd.xlane.f32.xlu1 %v2646_v18  ;;  %v1906_v18 = vld [vmem:[#allocation26 + $0x1e8] sm:$0xff] }
0x1321   :  { %2757 = vmatpush.msra.mxu1 %v1782_v45  ;;  %3022 = vmatpush.msrb.mxu2 %v1906_v18  ;;  %v1902_v45 = vld [vmem:[#allocation26 + $0x1c8] sm:$0xff]  ;;  %v1861_v18 = vld [vmem:[#allocation26 + $0x80] sm:$0xff] }
0x1323   :  { %2997 = vmatpush.msrb.mxu1 %v1892_v56  ;;  %3023 = vmatpush.msrb.mxu2 %v1905_v5 }
0x1325   :  { %2998 = vmatpush.msrb.mxu1 %v1891_v59  ;;  %3024 = vmatpush.msrb.mxu2 %v1904_v14 }
0x1326   :  { %v2648_v12 = vpop.xlane.xlu0 %2647 }
0x1327   :  { %v2651_v22 = vmul.f32 %v2648_v12, %v4182_v40  ;;  %2999 = vmatpush.msrb.mxu1 %v1890_v28  ;;  %3025 = vmatpush.msrb.mxu2 %v1903_v8  ;;  %v1869_v12 = vld [vmem:[#allocation26 + $0xc0] sm:$0xff]  ;;  %v1864_v28 = vld [vmem:[#allocation26 + $0x98] sm:$0xff] }
0x1328   :  { %2981 = vmatpush.msrb.mxu3 %v1869_v12 }
0x1329   :  { %v2653_v0 = vadd.f32 1e-05, %v2651_v22  ;;  %3000 = vmatpush.msrb.mxu1 %v1889_v60  ;;  %v4565_v22 = vld [vmem:[%s4656_s19] sm:$0xf]  ;;  %3026 = vmatpush.msrb.mxu2 %v1902_v45 }
0x132a   :  { %v2691_v42 = vperm.slane %v4565_v22, 3  ;;  %v1896_v60 = vld [vmem:[#allocation26 + $0x198] sm:$0xff] }
0x132b   :  { %3351 = vrsqrt.f32 %v2653_v0  ;;  %vm2661_vm1 = vweird.f32 %v2653_v0  ;;  %3001 = vmatpush.msrb.mxu1 %v1888_v36 }
0x132d   :  { %3002 = vmatpush.msrb.mxu1 %v1887_v2 }
0x132f   :  { %3003 = vmatpush.msrb.mxu1 %v1886_v3 }
0x1331   :  { %v3352_v30 = vpop.eup %3351  ;;  %3004 = vmatpush.msrb.mxu1 %v1885_v9 }
0x1332   :  { %v2656_v61 = vmul.f32 %v3352_v30, %v2653_v0  ;;  %vm2662_vm0 = vweird.f32 %v3352_v30  ;;  %v1882_v0 = vld [vmem:[#allocation26 + $0x128] sm:$0xff] }
0x1333   :  { %vm2663_vm5 = vmor %vm2661_vm1, %vm2662_vm0  ;;  %3005 = vmatpush.msrb.mxu1 %v1884_v7 }
0x1334   :  { %v2657_v35 = vmul.f32 %v3352_v30, %v2656_v61  ;;  %v1849_v61 = vld [vmem:[#allocation26 + $0x20] sm:$0xff] }
0x1335   :  { %3006 = vmatpush.msrb.mxu1 %v1883_v27 }
0x1336   :  { %v2658_v34 = vmul.f32 0.5, %v2657_v35  ;;  %v1868_v35 = vld [vmem:[#allocation26 + $0xb8] sm:$0xff] }
0x1337   :  { %3007 = vmatpush.msrb.mxu1 %v1882_v0  ;;  %2982 = vmatpush.msrb.mxu3 %v1868_v35 }
0x1338   :  { %v2659_v37 = vsub.f32 1.5, %v2658_v34  ;;  %v1881_v34 = vld [vmem:[#allocation26 + $0x120] sm:$0xff] }
0x1339   :  { %3008 = vmatpush.msrb.mxu1 %v1881_v34 }
0x133a   :  { %v2660_v51 = vmul.f32 %v3352_v30, %v2659_v37  ;;  %v1900_v37 = vld [vmem:[#allocation26 + $0x1b8] sm:$0xff] }
0x133c   :  { %v2664_v38 = vsel %vm2663_vm5, %v3352_v30, %v2660_v51  ;;  %v1901_v30 = vld [vmem:[#allocation26 + $0x1c0] sm:$0xff]  ;;  %v2688_v51 = vperm.slane %v4565_v22, 0 }
0x133d   :  { %v2675_v39 = vmul.f32 %v2664_v38, %v4530_v16  ;;  %3027 = vmatpush.msrb.mxu2 %v1901_v30  ;;  %v1867_v38 = vld [vmem:[#allocation26 + $0xb0] sm:$0xff] }
0x133e   :  { %2983 = vmatpush.msrb.mxu3 %v1867_v38 }
0x133f   :  { %v2680_v24 = vmul.f32 %v3240_v33, %v2675_v39  ;;  %v2690_v39 = vperm.slane %v4565_v22, 2  ;;  %3028 = vmatpush.msrb.mxu2 %v1900_v37 }
0x1341   :  { %v4548_v19 = vadd.f32 %v3241_v1, %v2680_v24  ;;  %v1899_v24 = vld [vmem:[#allocation26 + $0x1b0] sm:$0xff] }
0x1342   :  { %3029 = vmatpush.msrb.mxu2 %v1899_v24 }
0x1343   :  { %2712 = vmatmul.f32.vlgmr.msra.gmra.mxu0 %v4548_v19  ;;  %2735 = vmatmul.f32.vlgmr.msra.gmra.mxu3 %v4548_v19 }
0x1344   :  { %2758 = vmatmul.f32.vlgmr.msra.gmra.mxu1 %v4548_v19  ;;  %2781 = vmatmul.f32.vlgmr.msra.gmra.mxu2 %v4548_v19 }
0x1393   :  { %v2650_v21 = vpop.xlane.xlu1 %2649 }
0x1394   :  { %v2652_v41 = vmul.f32 %v2650_v21, %v4182_v40  ;;  %v1847_v21 = vld [vmem:[#allocation26 + $0x10] sm:$0xff] }
0x1396   :  { %v2654_v44 = vadd.f32 1e-05, %v2652_v41  ;;  %v1866_v41 = vld [vmem:[#allocation26 + $0xa8] sm:$0xff] }
0x1397   :  { %2984 = vmatpush.msrb.mxu3 %v1866_v41 }
0x1398   :  { %3353 = vrsqrt.f32 %v2654_v44  ;;  %vm2671_vm7 = vweird.f32 %v2654_v44 }
0x1399   :  { %2985 = vmatpush.msrb.mxu3 %v1865_v55 }
0x139b   :  { %2986 = vmatpush.msrb.mxu3 %v1864_v28 }
0x139e   :  { %v3354_v16 = vpop.eup %3353 }
0x139f   :  { %v2666_v48 = vmul.f32 %v3354_v16, %v2654_v44  ;;  %vm2672_vm6 = vweird.f32 %v3354_v16 }
0x13a0   :  { %vm2673_vm8 = vmor %vm2671_vm7, %vm2672_vm6 }
0x13a1   :  { %v2667_v49 = vmul.f32 %v3354_v16, %v2666_v48  ;;  %v1898_v48 = vld [vmem:[#allocation26 + $0x1a8] sm:$0xff] }
0x13a2   :  { %3030 = vmatpush.msrb.mxu2 %v1898_v48 }
0x13a3   :  { %v2668_v52 = vmul.f32 0.5, %v2667_v49 }
0x13a4   :  { %3031 = vmatpush.msrb.mxu2 %v1897_v57 }
0x13a5   :  { %v2669_v53 = vsub.f32 1.5, %v2668_v52 }
0x13a6   :  { %3032 = vmatpush.msrb.mxu2 %v1896_v60 }
0x13a7   :  { %v2670_v50 = vmul.f32 %v3354_v16, %v2669_v53  ;;  %v1846_v53 = vld [vmem:[#allocation26 + $0x8] sm:$0xff] }
0x13a8   :  { %3033 = vmatpush.msrb.mxu2 %v1895_v63 }
0x13a9   :  { %v2674_v17 = vsel %vm2673_vm8, %v3354_v16, %v2670_v50  ;;  %v1879_v16 = vld [vmem:[#allocation26 + $0x110] sm:$0xff]  ;;  %v1878_v50 = vld [vmem:[#allocation26 + $0x108] sm:$0xff] }
0x13aa   :  { %v2676_v58 = vmul.f32 %v2674_v17, %v4536_v29  ;;  %v1855_v29 = vld [vmem:[#allocation26 + $0x50] sm:$0xff]  ;;  %v2689_v17 = vperm.slane %v4565_v22, 1  ;;  %3034 = vmatpush.msrb.mxu2 %v1894_v15 }
0x13ab   :  { %2956 = vmatpush.msrb.mxu0 %v1855_v29 }
0x13ac   :  { %v2681_v54 = vmul.f32 %v3240_v33, %v2676_v58  ;;  %v1848_v33 = vld [vmem:[#allocation26 + $0x18] sm:$0xff]  ;;  %3035 = vmatpush.msrb.mxu2 %v1893_v31 }
0x13ad   :  { %2957 = vmatpush.msrb.mxu0 %v1854_v43 }
0x13ae   :  { %v4556_v32 = vadd.f32 %v3241_v1, %v2681_v54  ;;  %v1880_v1 = vld [vmem:[#allocation26 + $0x118] sm:$0xff]  ;;  %v1863_v54 = vld [vmem:[#allocation26 + $0x90] sm:$0xff] }
0x13af   :  { %2958 = vmatpush.msrb.mxu0 %v1853_v46  ;;  %3009 = vmatpush.msrb.mxu1 %v1880_v1 }
0x13b0   :  { %2715 = vmatmul.f32.gmra.mxu0 %v4556_v32  ;;  %2738 = vmatmul.f32.gmra.mxu3 %v4556_v32 }
0x13b1   :  { %2761 = vmatmul.f32.gmra.mxu1 %v4556_v32  ;;  %2784 = vmatmul.f32.gmra.mxu2 %v4556_v32 }
0x13b2   :  { %2959 = vmatpush.msrb.mxu0 %v1852_v11  ;;  %3010 = vmatpush.msrb.mxu1 %v1879_v16 }
0x13b3   :  { %2987 = vmatpush.msrb.mxu3 %v1863_v54 }
0x13b4   :  { %2960 = vmatpush.msrb.mxu0 %v1851_v4  ;;  %3011 = vmatpush.msrb.mxu1 %v1878_v50 }
0x13b5   :  { %2988 = vmatpush.msrb.mxu3 %v1862_v20 }
0x13b6   :  { %2961 = vmatpush.msrb.mxu0 %v1850_v25  ;;  %3012 = vmatpush.msrb.mxu1 %v1877_v62 }
0x13b7   :  { %2989 = vmatpush.msrb.mxu3 %v1861_v18 }
0x13b8   :  { %2962 = vmatpush.msrb.mxu0 %v1849_v61 }
0x13ba   :  { %2963 = vmatpush.msrb.mxu0 %v1848_v33 }
0x13bc   :  { %2964 = vmatpush.msrb.mxu0 %v1847_v21 }
0x13be   :  { %2965 = vmatpush.msrb.mxu0 %v1846_v53 }
0x13c0   :  { %v2713_v44 = vpop.f32.mrf.mxu0  ;;  %2966 = vmatpush.msrb.mxu0 %v1845_v26 }
0x13c1   :  { %v4571_v49 = vadd.f32 %v2713_v44, %v2688_v51  ;;  %v2759_v52 = vpop.f32.mrf.mxu1 }
0x13c2   :  { %v4575_v56 = vadd.f32 %v2759_v52, %v2690_v39 }
0x13c3   :  { %v3199_v59 = vmul.f32 -1.442695, %v4571_v49 }
0x13c4   :  { %v3201_v58 = vmul.f32 -1.442695, %v4575_v56 }
0x13c5   :  { %3355 = vpow2.f32 %v3199_v59 }
0x13c6   :  { %3357 = vpow2.f32 %v3201_v58  ;;  %v2736_v47 = vpop.f32.mrf.mxu3 }
0x13c7   :  { %v4583_v10 = vadd.f32 %v2736_v47, %v2689_v17  ;;  %v2782_v36 = vpop.f32.mrf.mxu2 }
0x13c8   :  { %v4587_v29 = vadd.f32 %v2782_v36, %v2691_v42 }
0x13c9   :  { %v3200_v2 = vmul.f32 -1.442695, %v4583_v10 }
0x13ca   :  { %v3202_v43 = vmul.f32 -1.442695, %v4587_v29 }
0x13cb   :  { %v3356_v3 = vpop.eup %3355  ;;  %3359 = vpow2.f32 %v3200_v2 }
0x13cc   :  { %v3358_v5 = vpop.eup %3357  ;;  %v2812_v46 = vadd.f32 1.0, %v3356_v3  ;;  %3361 = vpow2.f32 %v3202_v43 }
0x13cd   :  { %v2814_v6 = vadd.f32 1.0, %v3358_v5 }
0x13ce   :  { %3363 = vrcp.f32 %v2812_v46  ;;  %v2829_v45 = vand.u32 2147483647, %v2812_v46  ;;  %v2831_v25 = vand.u32 2147483648, %v2812_v46  ;;  %vm2825_vm10 = vweird.f32 %v2812_v46 }
0x13cf   :  { %3365 = vrcp.f32 %v2814_v6  ;;  %v2859_v0 = vand.u32 2147483647, %v2814_v6  ;;  %v2861_v30 = vand.u32 2147483648, %v2814_v6  ;;  %vm2855_vm11 = vweird.f32 %v2814_v6 }
0x13d0   :  { %vm2830_vm13 = vcmp.eq.f32.partialorder %v2829_v45, 8.507059e+37  ;;  %v2832_v38 = vor.u32 1.1754944e-38, %v2831_v25 }
0x13d1   :  { %v3360_v9 = vpop.eup %3359  ;;  %vm2860_vm15 = vcmp.eq.f32.partialorder %v2859_v0, 8.507059e+37  ;;  %v2862_v21 = vor.u32 1.1754944e-38, %v2861_v30 }
0x13d2   :  { %v3362_v14 = vpop.eup %3361  ;;  %v2813_v11 = vadd.f32 1.0, %v3360_v9 }
0x13d3   :  { %v2815_v13 = vadd.f32 1.0, %v3362_v14 }
0x13d4   :  { %v3364_v7 = vpop.eup %3363  ;;  %3367 = vrcp.f32 %v2813_v11  ;;  %v2844_v48 = vand.u32 2147483647, %v2813_v11  ;;  %v2846_v52 = vand.u32 2147483648, %v2813_v11  ;;  %vm2840_vm0 = vweird.f32 %v2813_v11 }
0x13d5   :  { %v3366_v8 = vpop.eup %3365  ;;  %v2821_v4 = vmul.f32 %v3364_v7, %v2812_v46  ;;  %3369 = vrcp.f32 %v2815_v13  ;;  %vm2826_vm9 = vweird.f32 %v3364_v7  ;;  %v2876_v57 = vand.u32 2147483648, %v2815_v13 }
0x13d6   :  { %v2851_v23 = vmul.f32 %v3366_v8, %v2814_v6  ;;  %vm2856_vm12 = vweird.f32 %v3366_v8  ;;  %vm2827_vm14 = vmor %vm2825_vm10, %vm2826_vm9  ;;  %v2874_v60 = vand.u32 2147483647, %v2815_v13  ;;  %v2847_v47 = vor.u32 1.1754944e-38, %v2846_v52 }
0x13d7   :  { %v2822_v27 = vsub.f32 1.0, %v2821_v4  ;;  %vm2857_vm2 = vmor %vm2855_vm11, %vm2856_vm12  ;;  %vm2870_vm5 = vweird.f32 %v2815_v13  ;;  %vm2845_vm6 = vcmp.eq.f32.partialorder %v2844_v48, 8.507059e+37 }
0x13d8   :  { %v2852_v12 = vsub.f32 1.0, %v2851_v23  ;;  %vm2875_vm8 = vcmp.eq.f32.partialorder %v2874_v60, 8.507059e+37 }
0x13d9   :  { %v2823_v61 = vmul.f32 %v3364_v7, %v2822_v27 }
0x13da   :  { %v3368_v35 = vpop.eup %3367  ;;  %v2853_v34 = vmul.f32 %v3366_v8, %v2852_v12 }
0x13db   :  { %v3370_v37 = vpop.eup %3369  ;;  %v2824_v33 = vadd.f32 %v3364_v7, %v2823_v61  ;;  %v2836_v1 = vmul.f32 %v3368_v35, %v2813_v11  ;;  %vm2841_vm3 = vweird.f32 %v3368_v35 }
0x13dc   :  { %v2854_v24 = vadd.f32 %v3366_v8, %v2853_v34  ;;  %v2866_v41 = vmul.f32 %v3370_v37, %v2815_v13  ;;  %vm2871_vm4 = vweird.f32 %v3370_v37  ;;  %vm2842_vm1 = vmor %vm2840_vm0, %vm2841_vm3 }
0x13dd   :  { %v2828_v44 = vsel %vm2827_vm14, %v3364_v7, %v2824_v33  ;;  %v2837_v16 = vsub.f32 1.0, %v2836_v1  ;;  %vm2872_vm7 = vmor %vm2870_vm5, %vm2871_vm4 }
0x13de   :  { %v2833_v53 = vsel %vm2830_vm13, %v2832_v38, %v2828_v44  ;;  %v2858_v55 = vsel %vm2857_vm2, %v3366_v8, %v2854_v24  ;;  %v2867_v50 = vsub.f32 1.0, %v2866_v41 }
0x13df   :  { %v2940_v59 = vmul.f32 %v2833_v53, %v4571_v49  ;;  %v2863_v26 = vsel %vm2860_vm15, %v2862_v21, %v2858_v55  ;;  %v2838_v28 = vmul.f32 %v3368_v35, %v2837_v16  ;;  %v2877_v49 = vor.u32 1.1754944e-38, %v2876_v57 }
0x13e0   :  { %v2942_v58 = vmul.f32 %v2863_v26, %v4575_v56  ;;  %v2868_v62 = vmul.f32 %v3370_v37, %v2867_v50 }
0x13e1   :  { %v2839_v54 = vadd.f32 %v3368_v35, %v2838_v28  ;;  %2967 = vmatmul.f32.vlgmr.msrb.gmra.mxu0 %v2940_v59 }
0x13e2   :  { %v2869_v63 = vadd.f32 %v3370_v37, %v2868_v62  ;;  %3013 = vmatmul.f32.vlgmr.msrb.gmra.mxu1 %v2942_v58 }
0x13e3   :  { %v2843_v36 = vsel %vm2842_vm1, %v3368_v35, %v2839_v54 }
0x13e4   :  { %v2848_v20 = vsel %vm2845_vm6, %v2847_v47, %v2843_v36  ;;  %v2873_v15 = vsel %vm2872_vm7, %v3370_v37, %v2869_v63 }
0x13e5   :  { %v2941_v56 = vmul.f32 %v2848_v20, %v4583_v10  ;;  %v2878_v2 = vsel %vm2875_vm8, %v2877_v49, %v2873_v15 }
0x13e6   :  { %v2943_v18 = vmul.f32 %v2878_v2, %v4587_v29 }
0x13e7   :  { %2990 = vmatmul.f32.vlgmr.msrb.gmra.mxu3 %v2941_v56 }
0x13e8   :  { %3036 = vmatmul.f32.vlgmr.msrb.gmra.mxu2 %v2943_v18 }
0x142d   :  { %v2716_v43 = vpop.f32.mrf.mxu0 }
0x142e   :  { %v4597_v31 = vadd.f32 %v2716_v43, %v2688_v51  ;;  %v2762_v3 = vpop.f32.mrf.mxu1 }
0x142f   :  { %v4601_v5 = vadd.f32 %v2762_v3, %v2690_v39 }
0x1430   :  { %v3203_v46 = vmul.f32 -1.442695, %v4597_v31 }
0x1431   :  { %v3205_v6 = vmul.f32 -1.442695, %v4601_v5 }
0x1432   :  { %3371 = vpow2.f32 %v3203_v46 }
0x1433   :  { %3373 = vpow2.f32 %v3205_v6  ;;  %v2739_v10 = vpop.f32.mrf.mxu3 }
0x1434   :  { %v4607_v29 = vadd.f32 %v2739_v10, %v2689_v17  ;;  %v2785_v9 = vpop.f32.mrf.mxu2 }
0x1435   :  { %v4611_v51 = vadd.f32 %v2785_v9, %v2691_v42 }
0x1436   :  { %v3204_v14 = vmul.f32 -1.442695, %v4607_v29 }
0x1437   :  { %v3206_v39 = vmul.f32 -1.442695, %v4611_v51 }
0x1438   :  { %v3372_v11 = vpop.eup %3371  ;;  %3375 = vpow2.f32 %v3204_v14 }
0x1439   :  { %v3374_v13 = vpop.eup %3373  ;;  %v2816_v7 = vadd.f32 1.0, %v3372_v11  ;;  %3377 = vpow2.f32 %v3206_v39 }
0x143a   :  { %v2818_v8 = vadd.f32 1.0, %v3374_v13 }
0x143b   :  { %3379 = vrcp.f32 %v2816_v7  ;;  %v2889_v0 = vand.u32 2147483647, %v2816_v7  ;;  %v2891_v30 = vand.u32 2147483648, %v2816_v7  ;;  %vm2885_vm10 = vweird.f32 %v2816_v7 }
0x143c   :  { %3381 = vrcp.f32 %v2818_v8  ;;  %v2919_v35 = vand.u32 2147483647, %v2818_v8  ;;  %v2921_v34 = vand.u32 2147483648, %v2818_v8  ;;  %vm2915_vm11 = vweird.f32 %v2818_v8 }
0x143d   :  { %vm2890_vm13 = vcmp.eq.f32.partialorder %v2889_v0, 8.507059e+37  ;;  %v2892_v21 = vor.u32 1.1754944e-38, %v2891_v30 }
0x143e   :  { %v3376_v4 = vpop.eup %3375  ;;  %vm2920_vm15 = vcmp.eq.f32.partialorder %v2919_v35, 8.507059e+37  ;;  %v2922_v16 = vor.u32 1.1754944e-38, %v2921_v34 }
0x143f   :  { %v3378_v17 = vpop.eup %3377  ;;  %v2817_v23 = vadd.f32 1.0, %v3376_v4 }
0x1440   :  { %v2819_v27 = vadd.f32 1.0, %v3378_v17 }
0x1441   :  { %v3380_v45 = vpop.eup %3379  ;;  %3383 = vrcp.f32 %v2817_v23  ;;  %v2904_v55 = vand.u32 2147483647, %v2817_v23  ;;  %v2906_v50 = vand.u32 2147483648, %v2817_v23  ;;  %vm2900_vm0 = vweird.f32 %v2817_v23 }
0x1442   :  { %v3382_v22 = vpop.eup %3381  ;;  %3385 = vrcp.f32 %v2819_v27  ;;  %v2881_v42 = vmul.f32 %v3380_v45, %v2816_v7  ;;  %vm2886_vm9 = vweird.f32 %v3380_v45  ;;  %v2936_v28 = vand.u32 2147483648, %v2819_v27 }
0x1443   :  { %v2911_v25 = vmul.f32 %v3382_v22, %v2818_v8  ;;  %vm2916_vm12 = vweird.f32 %v3382_v22  ;;  %vm2887_vm14 = vmor %vm2885_vm10, %vm2886_vm9  ;;  %v2934_v63 = vand.u32 2147483647, %v2819_v27  ;;  %v2907_v49 = vor.u32 1.1754944e-38, %v2906_v50 }
0x1444   :  { %v2882_v12 = vsub.f32 1.0, %v2881_v42  ;;  %vm2917_vm2 = vmor %vm2915_vm11, %vm2916_vm12  ;;  %vm2930_vm5 = vweird.f32 %v2819_v27  ;;  %vm2905_vm6 = vcmp.eq.f32.partialorder %v2904_v55, 8.507059e+37  ;;  %v2937_v56 = vor.u32 1.1754944e-38, %v2936_v28 }
0x1445   :  { %v2912_v61 = vsub.f32 1.0, %v2911_v25  ;;  %vm2935_vm8 = vcmp.eq.f32.partialorder %v2934_v63, 8.507059e+37 }
0x1446   :  { %v2883_v37 = vmul.f32 %v3380_v45, %v2882_v12 }
0x1447   :  { %v3384_v33 = vpop.eup %3383  ;;  %v2913_v38 = vmul.f32 %v3382_v22, %v2912_v61 }
0x1448   :  { %v3386_v1 = vpop.eup %3385  ;;  %v2884_v24 = vadd.f32 %v3380_v45, %v2883_v37  ;;  %v2896_v41 = vmul.f32 %v3384_v33, %v2817_v23  ;;  %vm2901_vm3 = vweird.f32 %v3384_v33 }
0x1449   :  { %v2914_v44 = vadd.f32 %v3382_v22, %v2913_v38  ;;  %v2926_v48 = vmul.f32 %v3386_v1, %v2819_v27  ;;  %vm2931_vm4 = vweird.f32 %v3386_v1  ;;  %vm2902_vm1 = vmor %vm2900_vm0, %vm2901_vm3 }
0x144a   :  { %v2888_v52 = vsel %vm2887_vm14, %v3380_v45, %v2884_v24  ;;  %v2897_v53 = vsub.f32 1.0, %v2896_v41  ;;  %vm2932_vm7 = vmor %vm2930_vm5, %vm2931_vm4 }
0x144b   :  { %v2893_v57 = vsel %vm2890_vm13, %v2892_v21, %v2888_v52  ;;  %v2918_v59 = vsel %vm2917_vm2, %v3382_v22, %v2914_v44  ;;  %v2927_v26 = vsub.f32 1.0, %v2926_v48  ;;  %v3243_v44 = vld [vmem:[%s4699_s3] ss:$0 sm:$0xff] }
0x144c   :  { %v2944_v58 = vmul.f32 %v2893_v57, %v4597_v31  ;;  %v2923_v62 = vsel %vm2920_vm15, %v2922_v16, %v2918_v59  ;;  %v2898_v60 = vmul.f32 %v3384_v33, %v2897_v53  ;;  %v3244_v52 = vld [vmem:[%s4700_s1] ss:$0 sm:$0xff] }
0x144d   :  { %v2946_v54 = vmul.f32 %v2923_v62, %v4601_v5  ;;  %v2928_v47 = vmul.f32 %v3386_v1, %v2927_v26  ;;  %v3242_v5 = vld [vmem:[%s4658_s21] ss:$0 sm:$0xff] }
0x144e   :  { %2970 = vmatmul.f32.gmra.mxu0 %v2944_v58  ;;  %v2899_v36 = vadd.f32 %v3384_v33, %v2898_v60 }
0x144f   :  { %3016 = vmatmul.f32.gmra.mxu1 %v2946_v54  ;;  %v2929_v20 = vadd.f32 %v3386_v1, %v2928_v47 }
0x1450   :  { %v2903_v15 = vsel %vm2902_vm1, %v3384_v33, %v2899_v36 }
0x1451   :  { %v2908_v2 = vsel %vm2905_vm6, %v2907_v49, %v2903_v15  ;;  %v2933_v18 = vsel %vm2932_vm7, %v3386_v1, %v2929_v20 }
0x1452   :  { %v2945_v43 = vmul.f32 %v2908_v2, %v4607_v29  ;;  %v2938_v31 = vsel %vm2935_vm8, %v2937_v56, %v2933_v18 }
0x1453   :  { %v2947_v3 = vmul.f32 %v2938_v31, %v4611_v51 }
0x1454   :  { %2993 = vmatmul.f32.gmra.mxu3 %v2945_v43 }
0x1455   :  { %3039 = vmatmul.f32.gmra.mxu2 %v2947_v3 }
0x145e   :  { %v2968_v46 = vpop.f32.mrf.mxu0 }
0x145f   :  { %v2969_v6 = vadd.f32 %v3242_v5, %v2968_v46  ;;  %v3014_v14 = vpop.f32.mrf.mxu1 }
0x146a   :  { %v2991_v10 = vpop.f32.mrf.mxu3 }
0x146b   :  { %v2992_v9 = vadd.f32 %v2991_v10, %v2969_v6  ;;  %v3037_v11 = vpop.f32.mrf.mxu2 }
0x146d   :  { %v3015_v39 = vadd.f32 %v3014_v14, %v2992_v9 }
0x146f   :  { %v3038_v13 = vadd.f32 %v3037_v11, %v3015_v39 }
0x1471   :  { %v3043_v7 = vadd.f32 %v3038_v13, %v4548_v19 }
0x1473   :  { %3045 = vadd.xlane.f32.xlu1 %v3043_v7 }
0x14cb   :  { %v2971_v29 = vpop.f32.mrf.mxu0 }
0x14cc   :  { %v2972_v8 = vadd.f32 %v3242_v5, %v2971_v29  ;;  %v3017_v17 = vpop.f32.mrf.mxu1 }
0x14d7   :  { %v2994_v51 = vpop.f32.mrf.mxu3 }
0x14d8   :  { %v2995_v4 = vadd.f32 %v2994_v51, %v2972_v8  ;;  %v3040_v27 = vpop.f32.mrf.mxu2 }
0x14da   :  { %v3018_v23 = vadd.f32 %v3017_v17, %v2995_v4 }
0x14dc   :  { %v3041_v45 = vadd.f32 %v3040_v27, %v3018_v23 }
0x14de   :  { %v3044_v22 = vadd.f32 %v3041_v45, %v4556_v32 }
0x14e0   :  { %3047 = vadd.xlane.f32.xlu2 %v3044_v22 }
0x14e6   :  { %v3046_v42 = vpop.xlane.xlu1 %3045 }
0x14e7   :  { %v3049_v25 = vmul.f32 %v3046_v42, %v4182_v40 }
0x14e9   :  { %v3051_v12 = vsub.f32 %v3043_v7, %v3049_v25 }
0x14eb   :  { %v3053_v0 = vmul.f32 %v3051_v12, %v3051_v12 }
0x14ed   :  { %3055 = vadd.xlane.f32.xlu1 %v3053_v0 }
0x1553   :  { %v3048_v30 = vpop.xlane.xlu2 %3047 }
0x1554   :  { %v3050_v19 = vmul.f32 %v3048_v30, %v4182_v40 }
0x1556   :  { %v3052_v61 = vsub.f32 %v3044_v22, %v3050_v19 }
0x1558   :  { %v3054_v35 = vmul.f32 %v3052_v61, %v3052_v61 }
0x155a   :  { %3057 = vadd.xlane.f32.xlu2 %v3054_v35 }
0x1560   :  { %v3056_v34 = vpop.xlane.xlu1 %3055 }
0x1561   :  { %v3059_v37 = vmul.f32 %v3056_v34, %v4182_v40 }
0x1563   :  { %v3061_v33 = vadd.f32 1e-05, %v3059_v37 }
0x1565   :  { %3387 = vrsqrt.f32 %v3061_v33  ;;  %vm3069_vm10 = vweird.f32 %v3061_v33 }
0x156b   :  { %v3388_v38 = vpop.eup %3387 }
0x156c   :  { %v3064_v32 = vmul.f32 %v3388_v38, %v3061_v33  ;;  %vm3070_vm9 = vweird.f32 %v3388_v38 }
0x156d   :  { %vm3071_vm11 = vmor %vm3069_vm10, %vm3070_vm9 }
0x156e   :  { %v3065_v1 = vmul.f32 %v3388_v38, %v3064_v32 }
0x1570   :  { %v3066_v24 = vmul.f32 0.5, %v3065_v1 }
0x1572   :  { %v3067_v21 = vsub.f32 1.5, %v3066_v24 }
0x1574   :  { %v3068_v41 = vmul.f32 %v3388_v38, %v3067_v21 }
0x1576   :  { %v3072_v16 = vsel %vm3071_vm11, %v3388_v38, %v3068_v41 }
0x1577   :  { %v3083_v48 = vmul.f32 %v3072_v16, %v3051_v12 }
0x1579   :  { %v3088_v53 = vmul.f32 %v3243_v44, %v3083_v48 }
0x157b   :  { %v3093_v55 = vadd.f32 %v3244_v52, %v3088_v53 }
0x157d   :  { %3100 = vst [vmem:[#allocation28 - $0x7] sm:$0x80] %v3093_v55 }
0x15cd   :  { %v3058_v50 = vpop.xlane.xlu2 %3057 }
0x15ce   :  { %v3060_v57 = vmul.f32 %v3058_v50, %v4182_v40 }
0x15d0   :  { %v3062_v59 = vadd.f32 1e-05, %v3060_v57 }
0x15d2   :  { %3389 = vrsqrt.f32 %v3062_v59  ;;  %vm3079_vm13 = vweird.f32 %v3062_v59 }
0x15d8   :  { %v3390_v26 = vpop.eup %3389 }
0x15d9   :  { %v3074_v28 = vmul.f32 %v3390_v26, %v3062_v59  ;;  %vm3080_vm12 = vweird.f32 %v3390_v26 }
0x15da   :  { %vm3081_vm14 = vmor %vm3079_vm13, %vm3080_vm12 }
0x15db   :  { %v3075_v58 = vmul.f32 %v3390_v26, %v3074_v28 }
0x15dd   :  { %v3076_v62 = vmul.f32 0.5, %v3075_v58 }
0x15df   :  { %v3077_v60 = vsub.f32 1.5, %v3076_v62 }
0x15e1   :  { %v3078_v54 = vmul.f32 %v3390_v26, %v3077_v60 }
0x15e3   :  { %v3082_v47 = vsel %vm3081_vm14, %v3390_v26, %v3078_v54 }
0x15e4   :  { %v3084_v63 = vmul.f32 %v3082_v47, %v3052_v61 }
0x15e6   :  { %v3089_v36 = vmul.f32 %v3243_v44, %v3084_v63 }
0x15e8   :  { %v3094_v40 = vadd.f32 %v3244_v52, %v3089_v36 }
0x15ea   :  { %v3097_v49 = vrot.slane %v3094_v40, 7 }
0x15ec   :  { %3101 = vst [vmem:[#allocation28 + $0x1] sm:$0x1] %v3097_v49 }
0x15ed   :  { %3112 = dma.vmem_to_hbm [thread:$0]  %s3108_s4, 32, %s3110_s29, [#allocation4]  }
0x15ee   :  { %3817 = dma.done.wait [#allocation4], 32  }
0x15ef   :  { %3818 = vsyncadd [#allocation4], 4294967264 }
0x15f0   :  { %3117 = vsyncpa [#allocation3], 1 }
0x15f1   :  { %3118 = vsyncpa [#allocation6], 1 }
0x15f2   :  { %3119 = vsyncpa [#allocation9], 1 }
0x15f3   :  { %3120 = vsyncpa [#allocation12], 1 }
0x15f4   :  { %3121 = vsyncpa [#allocation15], 1 }
0x15f5   :  { %3122 = vsyncpa [#allocation18], 1 }
0x15f6   :  { %3123 = vsyncpa [#allocation21], 1 }
0x15f7   :  { %3124 = vsyncpa [#allocation24], 1 }
0x15f8   :  { %3125 = vsyncpa [#allocation27], 1 }
0x15f9   :  { %3126 = vsyncpa [#allocation4], 1 }

</bundles_post_ra>
